<compile_context>
chip_gen: v5e
topology: v5e:2x2
jax: 0.10.0
libtpu: 0.0.40
codegen_flags: <defaults>
</compile_context>

<pallas_src>
import math
import numpy as np
import jax
import jax.numpy as jnp
from jax import lax
from jax.experimental import pallas as pl
from jax.experimental.pallas import tpu as pltpu


def _bilinear_up2_matrix(n: int) -> np.ndarray:
    """(2n, n) 1-D interpolation matrix: scale_factor=2 bilinear, align_corners=True."""
    m = np.zeros((2 * n, n), np.float32)
    if n == 1:
        m[:, 0] = 1.0
        return m
    for i in range(2 * n):
        src = i * (n - 1) / (2 * n - 1)
        i0 = min(int(np.floor(src)), n - 1)
        frac = src - i0
        m[i, i0] += 1.0 - frac
        if frac > 0.0 and i0 + 1 < n:
            m[i, i0 + 1] += frac
    return m


def _make_mp_up_block_kernel(has_x2: bool):
    def kernel(*refs):
        if has_x2:
            (x1_ref, x2_ref, wp_ref, bp_ref, mt_ref, wq_ref, bq_ref,
             o_ref, xpad_ref) = refs
        else:
            (x1_ref, wp_ref, bp_ref, mt_ref, wq_ref, bq_ref,
             o_ref, xpad_ref) = refs
            x2_ref = None
        _, H, W, Cin = x1_ref.shape

        # 1) Halo in-kernel: zero a padded VMEM scratch and copy the interior in.
        xpad_ref[...] = jnp.zeros(xpad_ref.shape, xpad_ref.dtype)
        xpad_ref[1:H + 1, 1:W + 1, :] = x1_ref[0].astype(xpad_ref.dtype)
        xp = xpad_ref[...]

        # 2) im2col slab: 9 shifted taps concatenated on channels -> (H*W, 9*Cin).
        taps = [xp[kh:kh + H, kw:kw + W, :] for kh in range(3) for kw in range(3)]
        patches = jnp.concatenate(taps, axis=-1).reshape(H * W, 9 * Cin)

        # 3) prep: 3x3 conv (+BN folded into wp/bp) as a single MXU matmul, then LeakyReLU.
        y = jnp.dot(patches, wp_ref[...], preferred_element_type=jnp.float32)
        y = y + bp_ref[...]                          # (H*W, Cout) + (1, Cout)
        y = jnp.where(y > 0.0, y, 0.01 * y)          # LeakyReLU(negative_slope=0.01)

        # 4) channel-major + 2x bilinear upsample (align_corners=True) as one matmul.
        y_cm = jnp.transpose(y)                                               # (Cout, H*W)
        z = jnp.dot(y_cm, mt_ref[...], preferred_element_type=jnp.float32)    # (Cout, 4*H*W)

        # 5) optional skip connection (x2 already NCHW, spatially flattened -> lane dense).
        if has_x2:
            z = z + x2_ref[0].astype(jnp.float32)

        # 6) post: 1x1 conv, channel-major; lane-dense store, NCHW layout directly.
        out = jnp.dot(wq_ref[...], z, preferred_element_type=jnp.float32) + bq_ref[...]
        o_ref[0] = out.astype(o_ref.dtype)

    return kernel


def mp_up_block(x1, x2, params):
    """MPUpBlock.forward.  x1: (B, Cin, H, W); x2: (B, Cout, 2H, 2W) or None.  Returns NCHW."""
    (w_prep, b_prep, gamma, beta, run_mean, run_var, w_post, b_post) = params
    eps = 1e-5
    B, Cin, H, W = x1.shape
    Cout = w_prep.shape[0]
    H2, W2 = 2 * H, 2 * W

    # Fold inference-mode BatchNorm into the prep conv weights/bias.
    # TODO(synk): PyTorch BatchNorm2d defaults to training mode (batch statistics); we
    # implement inference-mode BN using the module's running statistics.
    scale = gamma / jnp.sqrt(run_var + eps)
    shift = beta - run_mean * scale
    wp = jnp.transpose(w_prep, (2, 3, 1, 0)).reshape(9 * Cin, Cout) * scale[None, :]
    bp = (b_prep * scale + shift).reshape(1, Cout)
    wq = w_post.reshape(Cout, Cout)
    bq = b_post.reshape(Cout, 1)

    # Precomputed 2-D bilinear (align_corners=True) upsample matrix, (H*W, 4*H*W).
    mt = jnp.asarray(np.kron(_bilinear_up2_matrix(H), _bilinear_up2_matrix(W)).T)

    x1_nhwc = jnp.transpose(x1, (0, 2, 3, 1))   # only the small input is transposed

    has_x2 = x2 is not None
    inputs = [x1_nhwc]
    in_specs = [pl.BlockSpec((1, H, W, Cin), lambda b: (b, 0, 0, 0))]
    if has_x2:
        inputs.append(x2.reshape(B, Cout, H2 * W2))        # free reshape, stays NCHW-major
        in_specs.append(pl.BlockSpec((1, Cout, H2 * W2), lambda b: (b, 0, 0)))
    inputs += [wp, bp, mt, wq, bq]
    in_specs += [
        pl.BlockSpec((9 * Cin, Cout), lambda b: (0, 0)),
        pl.BlockSpec((1, Cout), lambda b: (0, 0)),
        pl.BlockSpec((H * W, H2 * W2), lambda b: (0, 0)),
        pl.BlockSpec((Cout, Cout), lambda b: (0, 0)),
        pl.BlockSpec((Cout, 1), lambda b: (0, 0)),
    ]

    out_flat = pl.pallas_call(
        _make_mp_up_block_kernel(has_x2),
        out_shape=jax.ShapeDtypeStruct((B, Cout, H2 * W2), x1.dtype),
        grid_spec=pltpu.PrefetchScalarGridSpec(
            num_scalar_prefetch=0,
            grid=(B,),
            in_specs=in_specs,
            out_specs=pl.BlockSpec((1, Cout, H2 * W2), lambda b: (b, 0, 0)),
            scratch_shapes=[pltpu.VMEM((H + 2, W + 2, Cin), jnp.float32)],
        ),
        compiler_params=pltpu.CompilerParams(
            dimension_semantics=("parallel",)),
    )(*inputs)
    return out_flat.reshape(B, Cout, H2, W2)


# ----------------------- pure-JAX reference (for checking) -----------------------
def _ref_mp_up_block(x1, x2, params):
    (w_prep, b_prep, gamma, beta, run_mean, run_var, w_post, b_post) = params
    eps = 1e-5
    prec = lax.Precision.HIGHEST
    y = lax.conv_general_dilated(x1, w_prep, (1, 1), "SAME",
                                 dimension_numbers=("NCHW", "OIHW", "NCHW"),
                                 precision=prec)
    y = y + b_prep[None, :, None, None]
    scale = gamma / jnp.sqrt(run_var + eps)
    shift = beta - run_mean * scale
    y = y * scale[None, :, None, None] + shift[None, :, None, None]
    y = jnp.where(y > 0.0, y, 0.01 * y)
    H, W = x1.shape[2], x1.shape[3]
    uh = jnp.asarray(_bilinear_up2_matrix(H))
    uw = jnp.asarray(_bilinear_up2_matrix(W))
    y = jnp.einsum("uh,vw,bchw->bcuv", uh, uw, y, precision=prec)
    if x2 is not None:
        y = y + x2
    out = lax.conv_general_dilated(y, w_post, (1, 1), "VALID",
                                   dimension_numbers=("NCHW", "OIHW", "NCHW"),
                                   precision=prec)
    return out + b_post[None, :, None, None]


if __name__ == "__main__":
    key = jax.random.PRNGKey(0)
    B, Cin, Cout, H, W = 2, 8, 32, 16, 16
    ks = jax.random.split(key, 10)
    x1 = jax.random.normal(ks[0], (B, Cin, H, W), jnp.float32)
    x2 = jax.random.normal(ks[1], (B, Cout, 2 * H, 2 * W), jnp.float32)

    w_prep = jax.random.normal(ks[2], (Cout, Cin, 3, 3), jnp.float32) * math.sqrt(2.0 / (9 * Cin))
    b_prep = 0.05 * jax.random.normal(ks[3], (Cout,), jnp.float32)
    gamma = 1.0 + 0.1 * jax.random.normal(ks[4], (Cout,), jnp.float32)
    beta = 0.1 * jax.random.normal(ks[5], (Cout,), jnp.float32)
    run_mean = 0.1 * jax.random.normal(ks[6], (Cout,), jnp.float32)
    run_var = 1.0 + 0.1 * jnp.abs(jax.random.normal(ks[7], (Cout,), jnp.float32))
    w_post = jax.random.normal(ks[8], (Cout, Cout, 1, 1), jnp.float32) * math.sqrt(2.0 / Cout)
    b_post = 0.05 * jax.random.normal(ks[9], (Cout,), jnp.float32)
    params = (w_prep, b_prep, gamma, beta, run_mean, run_var, w_post, b_post)

    # Forward with the skip connection.
    out = jax.block_until_ready(mp_up_block(x1, x2, params))
    assert out.shape == (B, Cout, 2 * H, 2 * W)
    ref = _ref_mp_up_block(x1, x2, params)
    if not jnp.allclose(out, ref, atol=1e-3, rtol=1e-3):
        err = float(jnp.max(jnp.abs(out - ref)))
        raise AssertionError(f"Pallas output mismatch vs JAX reference (max abs err {err})")

    # Forward without the skip connection (x2=None path).
    out_nx = jax.block_until_ready(mp_up_block(x1, None, params))
    ref_nx = _ref_mp_up_block(x1, None, params)
    if not jnp.allclose(out_nx, ref_nx, atol=1e-3, rtol=1e-3):
        raise AssertionError("Pallas output mismatch vs JAX reference (x2=None)")

    print("KERNEL_OK")
</pallas_src>

<mosaic_0001>
module attributes {stable_mosaic.version = 11 : i64} {
  func.func @kernel(%arg0: i32, %arg1: memref<1x16x16x8xf32, #tpu.memory_space<vmem>>, %arg2: memref<1x32x1024xf32, #tpu.memory_space<vmem>>, %arg3: memref<72x32xf32, #tpu.memory_space<vmem>>, %arg4: memref<1x32xf32, #tpu.memory_space<vmem>>, %arg5: memref<256x1024xf32, #tpu.memory_space<vmem>>, %arg6: memref<32x32xf32, #tpu.memory_space<vmem>>, %arg7: memref<32x1xf32, #tpu.memory_space<vmem>>, %arg8: memref<1x32x1024xf32, #tpu.memory_space<vmem>>, %arg9: memref<18x18x8xf32, #tpu.memory_space<vmem>>) attributes {dimension_semantics = [#tpu.dimension_semantics<parallel>], iteration_bounds = array<i64: 2>, scalar_prefetch = 0 : i64, scratch_operands = 1 : i64, tpu.core_type = #tpu.core_type<tc>, window_params = [{transform_indices = @transform_0, window_bounds = array<i64: 1, 16, 16, 8>}, {transform_indices = @transform_1, window_bounds = array<i64: 1, 32, 1024>}, {pipeline_mode = #tpu.pipeline_mode<synchronous>, transform_indices = @transform_2, window_bounds = array<i64: 72, 32>}, {pipeline_mode = #tpu.pipeline_mode<synchronous>, transform_indices = @transform_3, window_bounds = array<i64: 1, 32>}, {pipeline_mode = #tpu.pipeline_mode<synchronous>, transform_indices = @transform_4, window_bounds = array<i64: 256, 1024>}, {pipeline_mode = #tpu.pipeline_mode<synchronous>, transform_indices = @transform_5, window_bounds = array<i64: 32, 32>}, {pipeline_mode = #tpu.pipeline_mode<synchronous>, transform_indices = @transform_6, window_bounds = array<i64: 32, 1>}, {transform_indices = @transform_7, window_bounds = array<i64: 1, 32, 1024>}]} {
    %cst = arith.constant 0.000000e+00 : f32
    %0 = vector.broadcast %cst : f32 to vector<18x18x8xf32>
    %c0 = arith.constant 0 : index
    %c0_0 = arith.constant 0 : index
    %c0_1 = arith.constant 0 : index
    %1 = vector.load %arg9[%c0, %c0_0, %c0_1] : memref<18x18x8xf32, #tpu.memory_space<vmem>>, vector<18x18x8xf32>
    tpu.vector_store %arg9[%c0, %c0_0, %c0_1], %0 {strides = array<i32>} : memref<18x18x8xf32, #tpu.memory_space<vmem>>, vector<18x18x8xf32>,
    %c0_2 = arith.constant 0 : index
    %c0_3 = arith.constant 0 : index
    %c0_4 = arith.constant 0 : index
    %c0_5 = arith.constant 0 : index
    %2 = vector.load %arg1[%c0_2, %c0_3, %c0_4, %c0_5] : memref<1x16x16x8xf32, #tpu.memory_space<vmem>>, vector<1x16x16x8xf32>
    %3 = vector.shape_cast %2 : vector<1x16x16x8xf32> to vector<16x16x8xf32>
    %c1 = arith.constant 1 : index
    %c1_6 = arith.constant 1 : index
    %c0_7 = arith.constant 0 : index
    %4 = vector.load %arg9[%c1, %c1_6, %c0_7] : memref<18x18x8xf32, #tpu.memory_space<vmem>>, vector<16x16x8xf32>
    tpu.vector_store %arg9[%c1, %c1_6, %c0_7], %3 {strides = array<i32>} : memref<18x18x8xf32, #tpu.memory_space<vmem>>, vector<16x16x8xf32>,
    %c0_8 = arith.constant 0 : index
    %c0_9 = arith.constant 0 : index
    %c0_10 = arith.constant 0 : index
    %5 = vector.load %arg9[%c0_8, %c0_9, %c0_10] : memref<18x18x8xf32, #tpu.memory_space<vmem>>, vector<18x18x8xf32>
    %6 = vector.extract_strided_slice %5 {offsets = [0, 0, 0], sizes = [16, 16, 8], strides = [1, 1, 1]} : vector<18x18x8xf32> to vector<16x16x8xf32>
    %7 = vector.extract_strided_slice %5 {offsets = [0, 1, 0], sizes = [16, 16, 8], strides = [1, 1, 1]} : vector<18x18x8xf32> to vector<16x16x8xf32>
    %8 = vector.extract_strided_slice %5 {offsets = [0, 2, 0], sizes = [16, 16, 8], strides = [1, 1, 1]} : vector<18x18x8xf32> to vector<16x16x8xf32>
    %9 = vector.extract_strided_slice %5 {offsets = [1, 0, 0], sizes = [16, 16, 8], strides = [1, 1, 1]} : vector<18x18x8xf32> to vector<16x16x8xf32>
    %10 = vector.extract_strided_slice %5 {offsets = [1, 1, 0], sizes = [16, 16, 8], strides = [1, 1, 1]} : vector<18x18x8xf32> to vector<16x16x8xf32>
    %11 = vector.extract_strided_slice %5 {offsets = [1, 2, 0], sizes = [16, 16, 8], strides = [1, 1, 1]} : vector<18x18x8xf32> to vector<16x16x8xf32>
    %12 = vector.extract_strided_slice %5 {offsets = [2, 0, 0], sizes = [16, 16, 8], strides = [1, 1, 1]} : vector<18x18x8xf32> to vector<16x16x8xf32>
    %13 = vector.extract_strided_slice %5 {offsets = [2, 1, 0], sizes = [16, 16, 8], strides = [1, 1, 1]} : vector<18x18x8xf32> to vector<16x16x8xf32>
    %14 = vector.extract_strided_slice %5 {offsets = [2, 2, 0], sizes = [16, 16, 8], strides = [1, 1, 1]} : vector<18x18x8xf32> to vector<16x16x8xf32>
    %15 = tpu.concatenate %6, %7, %8, %9, %10, %11, %12, %13, %14 in 2 : vector<16x16x8xf32>, vector<16x16x8xf32>, vector<16x16x8xf32>, vector<16x16x8xf32>, vector<16x16x8xf32>, vector<16x16x8xf32>, vector<16x16x8xf32>, vector<16x16x8xf32>, vector<16x16x8xf32> -> vector<16x16x72xf32>
    %16 = vector.shape_cast %15 : vector<16x16x72xf32> to vector<256x72xf32>
    %c0_11 = arith.constant 0 : index
    %c0_12 = arith.constant 0 : index
    %17 = vector.load %arg3[%c0_11, %c0_12] : memref<72x32xf32, #tpu.memory_space<vmem>>, vector<72x32xf32>
    %cst_13 = arith.constant dense<0.000000e+00> : vector<256x32xf32>
    %18 = tpu.matmul %16, %17, %cst_13 {dimension_numbers = #tpu.dot_dimension_numbers<[1], [0], [0], [1], [0, 0, 1, 1], [], []>} : vector<256x72xf32>, vector<72x32xf32>, vector<256x32xf32> -> vector<256x32xf32>
    %c0_14 = arith.constant 0 : index
    %c0_15 = arith.constant 0 : index
    %19 = vector.load %arg4[%c0_14, %c0_15] : memref<1x32xf32, #tpu.memory_space<vmem>>, vector<1x32xf32>
    %20 = vector.broadcast %19 : vector<1x32xf32> to vector<256x32xf32>
    %21 = arith.addf %18, %20 : vector<256x32xf32>
    %cst_16 = arith.constant 0.000000e+00 : f32
    %22 = vector.broadcast %cst_16 : f32 to vector<256x32xf32>
    %23 = arith.cmpf ogt, %21, %22 : vector<256x32xf32>
    %cst_17 = arith.constant 0.00999999977 : f32
    %24 = vector.broadcast %cst_17 : f32 to vector<256x32xf32>
    %25 = arith.mulf %24, %21 : vector<256x32xf32>
    %26 = arith.select %23, %21, %25 : vector<256x32xi1>, vector<256x32xf32>
    %27 = tpu.transpose %26, [1, 0] : vector<256x32xf32> -> vector<32x256xf32>
    %c0_18 = arith.constant 0 : index
    %c0_19 = arith.constant 0 : index
    %28 = vector.load %arg5[%c0_18, %c0_19] : memref<256x1024xf32, #tpu.memory_space<vmem>>, vector<256x1024xf32>
    %cst_20 = arith.constant dense<0.000000e+00> : vector<32x1024xf32>
    %29 = tpu.matmul %27, %28, %cst_20 {dimension_numbers = #tpu.dot_dimension_numbers<[1], [0], [0], [1], [0, 0, 1, 1], [], []>} : vector<32x256xf32>, vector<256x1024xf32>, vector<32x1024xf32> -> vector<32x1024xf32>
    %c0_21 = arith.constant 0 : index
    %c0_22 = arith.constant 0 : index
    %c0_23 = arith.constant 0 : index
    %30 = vector.load %arg2[%c0_21, %c0_22, %c0_23] : memref<1x32x1024xf32, #tpu.memory_space<vmem>>, vector<1x32x1024xf32>
    %31 = vector.shape_cast %30 : vector<1x32x1024xf32> to vector<32x1024xf32>
    %32 = arith.addf %29, %31 : vector<32x1024xf32>
    %c0_24 = arith.constant 0 : index
    %c0_25 = arith.constant 0 : index
    %33 = vector.load %arg6[%c0_24, %c0_25] : memref<32x32xf32, #tpu.memory_space<vmem>>, vector<32x32xf32>
    %cst_26 = arith.constant dense<0.000000e+00> : vector<32x1024xf32>
    %34 = tpu.matmul %33, %32, %cst_26 {dimension_numbers = #tpu.dot_dimension_numbers<[1], [0], [0], [1], [0, 0, 1, 1], [], []>} : vector<32x32xf32>, vector<32x1024xf32>, vector<32x1024xf32> -> vector<32x1024xf32>
    %c0_27 = arith.constant 0 : index
    %c0_28 = arith.constant 0 : index
    %35 = vector.load %arg7[%c0_27, %c0_28] : memref<32x1xf32, #tpu.memory_space<vmem>>, vector<32x1xf32>
    %36 = vector.broadcast %35 : vector<32x1xf32> to vector<32x1024xf32>
    %37 = arith.addf %34, %36 : vector<32x1024xf32>
    %c0_29 = arith.constant 0 : index
    %c0_30 = arith.constant 0 : index
    %c0_31 = arith.constant 0 : index
    %38 = vector.load %arg8[%c0_29, %c0_30, %c0_31] : memref<1x32x1024xf32, #tpu.memory_space<vmem>>, vector<1x32x1024xf32>
    %39 = vector.shape_cast %38 : vector<1x32x1024xf32> to vector<32x1024xf32>
    %40 = vector.shape_cast %37 : vector<32x1024xf32> to vector<1x32x1024xf32>
    tpu.vector_store %arg8[%c0_29, %c0_30, %c0_31], %40 {strides = array<i32>} : memref<1x32x1024xf32, #tpu.memory_space<vmem>>, vector<1x32x1024xf32>,
    return
  }
  func.func @transform_0(%arg0: i32) -> (i32, i32, i32, i32) {
    %c0_i32 = arith.constant 0 : i32
    %c0_i32_0 = arith.constant 0 : i32
    %c0_i32_1 = arith.constant 0 : i32
    %c0_i32_2 = arith.constant 0 : i32
    return %arg0, %c0_i32, %c0_i32_0, %c0_i32_1 : i32, i32, i32, i32
  }
  func.func @transform_1(%arg0: i32) -> (i32, i32, i32) {
    %c0_i32 = arith.constant 0 : i32
    %c0_i32_0 = arith.constant 0 : i32
    %c0_i32_1 = arith.constant 0 : i32
    return %arg0, %c0_i32, %c0_i32_0 : i32, i32, i32
  }
  func.func @transform_2(%arg0: i32) -> (i32, i32) {
    %c0_i32 = arith.constant 0 : i32
    %c0_i32_0 = arith.constant 0 : i32
    %c0_i32_1 = arith.constant 0 : i32
    return %c0_i32, %c0_i32_0 : i32, i32
  }
  func.func @transform_3(%arg0: i32) -> (i32, i32) {
    %c0_i32 = arith.constant 0 : i32
    %c0_i32_0 = arith.constant 0 : i32
    %c0_i32_1 = arith.constant 0 : i32
    return %c0_i32, %c0_i32_0 : i32, i32
  }
  func.func @transform_4(%arg0: i32) -> (i32, i32) {
    %c0_i32 = arith.constant 0 : i32
    %c0_i32_0 = arith.constant 0 : i32
    %c0_i32_1 = arith.constant 0 : i32
    return %c0_i32, %c0_i32_0 : i32, i32
  }
  func.func @transform_5(%arg0: i32) -> (i32, i32) {
    %c0_i32 = arith.constant 0 : i32
    %c0_i32_0 = arith.constant 0 : i32
    %c0_i32_1 = arith.constant 0 : i32
    return %c0_i32, %c0_i32_0 : i32, i32
  }
  func.func @transform_6(%arg0: i32) -> (i32, i32) {
    %c0_i32 = arith.constant 0 : i32
    %c0_i32_0 = arith.constant 0 : i32
    %c0_i32_1 = arith.constant 0 : i32
    return %c0_i32, %c0_i32_0 : i32, i32
  }
  func.func @transform_7(%arg0: i32) -> (i32, i32, i32) {
    %c0_i32 = arith.constant 0 : i32
    %c0_i32_0 = arith.constant 0 : i32
    %c0_i32_1 = arith.constant 0 : i32
    return %arg0, %c0_i32, %c0_i32_0 : i32, i32, i32
  }
}

</mosaic_0001>

<bundles_post_ra>
// kernel: tpu_custom_call.1
= control target key start
LH: loop header
LB: loop body
LE: loop exit
PB: predicated region body
PF: predicated region fallthrough
CT: control target
= control target key end

     0   :  { %12 = vsyncpa [#allocation4], 0  ;;  %s5588_s0 = inlined_call_operand.vmem [shape: f32[2,16,16,8], index: 0, kind: input, shape index: {}]   ;;  %s5589_s1 = inlined_call_operand.vmem [shape: f32[2,32,1024], index: 1, kind: input, shape index: {}]   ;;  %s5590_s2 = inlined_call_operand.vmem [shape: f32[72,32], index: 2, kind: input, shape index: {}]   ;;  %s5591_s3 = inlined_call_operand.vmem [shape: f32[1,32], index: 3, kind: input, shape index: {}]   ;;  %s5592_s4 = inlined_call_operand.hbm [shape: f32[256,1024], index: 4, kind: input, shape index: {}]   ;;  %s5593_s5 = inlined_call_operand.vmem [shape: f32[32,32], index: 5, kind: input, shape index: {}]   ;;  %s5594_s6 = inlined_call_operand.vmem [shape: f32[32,1], index: 6, kind: input, shape index: {}]   ;;  %s5595_s7 = inlined_call_operand.hbm [shape: f32[2,32,1024], index: 7, kind: output, shape index: {}]  }
   0x1   :  { %13 = vsyncpa [#allocation5], 0 }
   0x2   :  { %15 = vsyncpa [#allocation5 + $0x1], 0  ;;  %s3656_s24 = smov 0   ;;  %s3658_s25 = smov 0  }
   0x3   :  { %s3660_s26 = smov 0   ;;  %s3662_s27 = smov 0  }
   0x4 LB: > { %s3677_s28 = sadd.s32 4294967295, %s3600_s27   ;;  %s3297_s29 = sadd.s32 4294967294, %s3600_s27   ;;  %s3600_s27 = sphi %s3662_s27, %s5609_s27   ;;  %s3596_s26 = sphi %s3660_s26, %s5608_s26   ;;  %s3592_s25 = sphi %s3658_s25, %s5607_s25   ;;  %s3588_s24 = sphi %s3656_s24, %s5606_s24  }
   0x5   : > { %s3681_s30 = sadd.s32 1, %s3600_s27   ;;  %s185_s8 = sadd.s32 1, %s3596_s26 }
   0x6   : > { %s182_s9 = ssub.s32 %s3600_s27, %s3681_s30  ;;  %p195_p0 = scmp.ne.s32.totalorder %s3596_s26, %s3592_s25 }
   0x7   : > { %p183_p1 = scmp.eq.s32.totalorder %s182_s9, 0  ;;  %p196_p2 = scmp.eq.s32.totalorder %s3677_s28, 1 }
   0x8   : > { %p201_p3 = scmp.ne.s32.totalorder %s3592_s25, %s3588_s24  ;;  %p202_p4 = scmp.eq.s32.totalorder %s3297_s29, 1 }
   0x9   : > { %s3692_s10 = scalar_select %p183_p1, %s3596_s26, %s185_s8  }
   0xa   : > { %p3694_p5 = por %p196_p2, %p195_p0  ;;  %p3698_p6 = por %p202_p4, %p201_p3 }
   0xb   : > { %p3298_p7 = scmp.ge.s32.totalorder %s3600_s27, 1  ;;  %p209_p8 = scmp.lt.s32.totalorder %s3600_s27, 3 }
   0xc   : > { %p3400_p9 = scmp.eq.s32.totalorder %s3677_s28, 0  ;;  %s226_s15 = sshll.u32 %s5592_s4, 4  ;;  %s227_s15 = int_to_ptr.hbm [resolvable:$true] %s226_s15 }
   0xd   : > { %p210_p10 = pnand %p3298_p7, %p209_p8  ;;  %s3602_s16 = smov [#allocation3]  }
   0xe   : > { %s228_s17 = sshll.u32 %s3602_s16, 4  ;;  %s3603_s18 = smov 1024   ;;  %s229_s17 = int_to_ptr.vmem [resolvable:$true] %s228_s17 }
   0xf   : > { %p3392_p11 = pneg %p210_p10  ;;  %s3604_s19 = smov 64  }
  0x10   : > { %266 = sbr.rel (%p210_p10) target bundleno = 1544 (0x608), region = 48 }
  0x11   : > { %p3393_p12 = pnand %p3400_p9, %p3392_p11 }
  0x13   : > { %3395 = dma.hbm_to_vmem [thread:$0]  (!%p3393_p12), %s227_s15, 32768, %s229_s17, [#allocation4], %s3603_s18, %s3603_s18, %s3604_s19  }
  0x15   : > { %3579 = dma.done.wait (%p3400_p9), [#allocation4], 32768  }
  0x16   : > { %3581 = vsyncadd (%p3400_p9), [#allocation4], 4294934528  ;;  %vm314_vm0 = vcmask 64512   ;;  %v3605_v0 = vmov 0.0   ;;  %vm537_vm1 = vcmask 1046528   ;;  %s5597_s20 = smov 8  }
  0x17   : > { %315 = vst.msk [vmem:[#allocation2] sm:$0xff] %vm314_vm0, %v3605_v0  ;;  %p304_p13 = scmp.lt.s32.totalorder %s3677_s28, 1  ;;  %vm317_vm2 = vcmask 58368   ;;  %vm714_vm3 = vcmask 1045504   ;;  %s3607_s9 = smov 16   ;;  %vm1525_vm4 = vcmask 130048  }
  0x18   : > { %316 = vst.msk [vmem:[#allocation2 + $0x8] sm:$0xff] %vm314_vm0, %v3605_v0  ;;  %s3608_s13 = smov 32   ;;  %s3609_s14 = smov 40   ;;  %vm1558_vm5 = vcmask 195584   ;;  %vm1591_vm6 = vcmask 261120   ;;  %vm1624_vm7 = vcmask 326656  }
  0x19   : > { %319 = vst.msk [vmem:[#allocation2 + $0x18] sm:$0xff] %vm314_vm0, %v3605_v0  ;;  %s3774_s21 = scalar_select %p304_p13, %s3677_s28, 1  ;;  %vm1657_vm8 = vcmask 392192   ;;  %vm1690_vm9 = vcmask 457728   ;;  %vm1723_vm10 = vcmask 523264   ;;  %vm1769_vm11 = vcmask 588800  }
  0x1a   : > { %320 = vst.msk [vmem:[#allocation2 + $0x20] sm:$0xff] %vm314_vm0, %v3605_v0  ;;  %s5599_s15 = smov 56   ;;  %s3611_s16 = smov 24  }
  0x1b   : > { %322 = vst.msk [vmem:[#allocation2 + $0x30] sm:$0xff] %vm314_vm0, %v3605_v0  ;;  %s5596_s22 = sshll.u32 %s3774_s21, 8  ;;  %s3612_s17 = smov 64  }
  0x1c   : > { %323 = vst.msk [vmem:[#allocation2 + $0x38] sm:$0xff] %vm314_vm0, %v3605_v0  ;;  %s3796_s8 = scalar_lea.vmem %s5588_s0, %s5596_s22  ;;  %s3613_s18 = smov 48  }
  0x1d   : > { %325 = vst.msk [vmem:[#allocation2 + $0x48] sm:$0xff] %vm314_vm0, %v3605_v0  ;;  %v372_v6 = vld [vmem:[%s3796_s8 + $0x10] sm:$0xff]  ;;  %v373_v7 = vld [vmem:[%s3796_s8 + $0x18] sm:$0xff]  ;;  %v370_v18 = vld [vmem:[%s3796_s8] sm:$0xff]  ;;  %s5603_s22 = smov 56   ;;  %s5604_s19 = smov 8  }
  0x1e   : > { %v3728_v1 = vld [vmem:[#allocation2] sm:$0xff]  ;;  %326 = vst.msk [vmem:[#allocation2 + $0x50] sm:$0xff] %vm314_vm0, %v3605_v0  ;;  %v371_v19 = vld [vmem:[%s3796_s8 + $0x8] sm:$0xff]  ;;  %v376_v23 = vld [vmem:[%s3796_s8 + $0x30] sm:$0xff] }
  0x1f   : > { %v3732_v2 = vld [vmem:[#allocation2 + $0x8] sm:$0xff]  ;;  %v538_v3 = vrot.slane %v3728_v1, 1  ;;  %328 = vst.msk [vmem:[#allocation2 + $0x60] sm:$0xff] %vm314_vm0, %v3605_v0  ;;  %v374_v21 = vld [vmem:[%s3796_s8 + $0x20] sm:$0xff]  ;;  %v377_v24 = vld [vmem:[%s3796_s8 + $0x38] sm:$0xff]  ;;  %v715_v55 = vrot.slane %v3728_v1, 2 }
  0x20   : > { %v539_v4 = vrot.slane %v3732_v2, 1  ;;  %329 = vst.msk [vmem:[#allocation2 + $0x68] sm:$0xff] %vm314_vm0, %v3605_v0  ;;  %v375_v22 = vld [vmem:[%s3796_s8 + $0x28] sm:$0xff]  ;;  %v378_v25 = vld [vmem:[%s3796_s8 + $0x40] sm:$0xff]  ;;  %v716_v56 = vrot.slane %v3732_v2, 2 }
  0x21   : > { %331 = vst.msk [vmem:[#allocation2 + $0x78] sm:$0xff] %vm314_vm0, %v3605_v0  ;;  %v379_v26 = vld [vmem:[%s3796_s8 + $0x48] sm:$0xff] }
  0x22   : > { %v540_v5 = vsel %vm537_vm1, %v538_v3, %v539_v4  ;;  %332 = vst.msk [vmem:[#allocation2 + $0x80] sm:$0xff] %vm314_vm0, %v3605_v0  ;;  %v717_v59 = vsel %vm714_vm3, %v715_v55, %v716_v56 }
  0x23   : > { %618 = vrot.lane.b32.xlu0 %v540_v5, %s5597_s20  ;;  %334 = vst.msk [vmem:[#allocation2 + $0x90] sm:$0xff] %vm314_vm0, %v3605_v0 }
  0x24   : > { %335 = vst.msk [vmem:[#allocation2 + $0x98] sm:$0xff] %vm314_vm0, %v3605_v0 }
  0x25   : > { %337 = vst.msk [vmem:[#allocation2 + $0xa8] sm:$0xff] %vm314_vm0, %v3605_v0 }
  0x26   : > { %338 = vst.msk [vmem:[#allocation2 + $0xb0] sm:$0xff] %vm314_vm0, %v3605_v0 }
  0x27   : > { %340 = vst.msk [vmem:[#allocation2 + $0xc0] sm:$0xff] %vm314_vm0, %v3605_v0 }
  0x28   : > { %341 = vst.msk [vmem:[#allocation2 + $0xc8] sm:$0xff] %vm314_vm0, %v3605_v0 }
  0x29   : > { %343 = vst.msk [vmem:[#allocation2 + $0xd8] sm:$0xff] %vm314_vm0, %v3605_v0 }
  0x2a   : > { %344 = vst.msk [vmem:[#allocation2 + $0xe0] sm:$0xff] %vm314_vm0, %v3605_v0 }
  0x2b   : > { %346 = vst.msk [vmem:[#allocation2 + $0xf0] sm:$0xff] %vm314_vm0, %v3605_v0 }
  0x2c   : > { %347 = vst.msk [vmem:[#allocation2 + $0xf8] sm:$0xff] %vm314_vm0, %v3605_v0 }
  0x2d   : > { %349 = vst.msk [vmem:[#allocation2 + $0x108] sm:$0xff] %vm314_vm0, %v3605_v0 }
  0x2e   : > { %350 = vst.msk [vmem:[#allocation2 + $0x110] sm:$0xff] %vm314_vm0, %v3605_v0 }
  0x2f   : > { %352 = vst.msk [vmem:[#allocation2 + $0x120] sm:$0xff] %vm314_vm0, %v3605_v0 }
  0x30   : > { %353 = vst.msk [vmem:[#allocation2 + $0x128] sm:$0xff] %vm314_vm0, %v3605_v0 }
  0x31   : > { %355 = vst.msk [vmem:[#allocation2 + $0x138] sm:$0xff] %vm314_vm0, %v3605_v0 }
  0x32   : > { %356 = vst.msk [vmem:[#allocation2 + $0x140] sm:$0xff] %vm314_vm0, %v3605_v0 }
  0x33   : > { %358 = vst.msk [vmem:[#allocation2 + $0x150] sm:$0xff] %vm314_vm0, %v3605_v0 }
  0x34   : > { %359 = vst.msk [vmem:[#allocation2 + $0x158] sm:$0xff] %vm314_vm0, %v3605_v0 }
  0x35   : > { %361 = vst.msk [vmem:[#allocation2 + $0x168] sm:$0xff] %vm314_vm0, %v3605_v0 }
  0x36   : > { %362 = vst.msk [vmem:[#allocation2 + $0x170] sm:$0xff] %vm314_vm0, %v3605_v0 }
  0x37   : > { %364 = vst.msk [vmem:[#allocation2 + $0x180] sm:$0xff] %vm314_vm0, %v3605_v0 }
  0x38   : > { %365 = vst.msk [vmem:[#allocation2 + $0x188] sm:$0xff] %vm314_vm0, %v3605_v0 }
  0x39   : > { %367 = vst.msk [vmem:[#allocation2 + $0x198] sm:$0xff] %vm314_vm0, %v3605_v0 }
  0x3a   : > { %368 = vst.msk [vmem:[#allocation2 + $0x1a0] sm:$0xff] %vm314_vm0, %v3605_v0 }
  0x3b   : > { %324 = vst.msk [vmem:[#allocation2 + $0x40] sm:$0x3] %vm317_vm2, %v3605_v0 }
  0x3c   : > { %405 = vst.msk [vmem:[#allocation2 + $0x31] sm:$0xff] %vm314_vm0, %v372_v6 }
  0x3d   : > { %406 = vst.msk [vmem:[#allocation2 + $0x39] sm:$0xff] %vm314_vm0, %v373_v7 }
  0x3e   : > { %318 = vst.msk [vmem:[#allocation2 + $0x10] sm:$0x3] %vm317_vm2, %v3605_v0 }
  0x3f   : > { %321 = vst.msk [vmem:[#allocation2 + $0x28] sm:$0x3] %vm317_vm2, %v3605_v0 }
  0x40   : > { %327 = vst.msk [vmem:[#allocation2 + $0x58] sm:$0x3] %vm317_vm2, %v3605_v0 }
  0x41   : > { %330 = vst.msk [vmem:[#allocation2 + $0x70] sm:$0x3] %vm317_vm2, %v3605_v0 }
  0x42   : > { %333 = vst.msk [vmem:[#allocation2 + $0x88] sm:$0x3] %vm317_vm2, %v3605_v0 }
  0x43   : > { %v3822_v8 = vld [vmem:[#allocation2 + $0x30] sm:$0xff]  ;;  %336 = vst.msk [vmem:[#allocation2 + $0xa0] sm:$0x3] %vm317_vm2, %v3605_v0 }
  0x44   : > { %v3826_v9 = vld [vmem:[#allocation2 + $0x38] sm:$0xff]  ;;  %v548_v10 = vrot.slane %v3822_v8, 1  ;;  %339 = vst.msk [vmem:[#allocation2 + $0xb8] sm:$0x3] %vm317_vm2, %v3605_v0  ;;  %v3839_v14 = vld [vmem:[#allocation2 + $0x40] sm:$0x3] }
  0x45   : > { %v549_v11 = vrot.slane %v3826_v9, 1  ;;  %342 = vst.msk [vmem:[#allocation2 + $0xd0] sm:$0x3] %vm317_vm2, %v3605_v0  ;;  %v3834_v12 = vld [vmem:[#allocation2 + $0x10] sm:$0x3]  ;;  %v551_v17 = vrot.slane %v3839_v14, 1 }
  0x46   : > { %345 = vst.msk [vmem:[#allocation2 + $0xe8] sm:$0x3] %vm317_vm2, %v3605_v0  ;;  %v541_v13 = vrot.slane %v3834_v12, 1  ;;  %v725_v3 = vrot.slane %v3822_v8, 2  ;;  %v718_v6 = vrot.slane %v3834_v12, 2  ;;  %v728_v12 = vrot.slane %v3839_v14, 2 }
  0x47   : > { %v3842_v15 = vsel %vm537_vm1, %v548_v10, %v549_v11  ;;  %348 = vst.msk [vmem:[#allocation2 + $0x100] sm:$0x3] %vm317_vm2, %v3605_v0  ;;  %v3866_v20 = vsel %vm537_vm1, %v549_v11, %v551_v17 }
  0x48   : > { %626 = vrot.lane.b32.xlu2 %v3842_v15, %s5597_s20  ;;  %351 = vst.msk [vmem:[#allocation2 + $0x118] sm:$0x3] %vm317_vm2, %v3605_v0  ;;  %v542_v16 = vsel %vm537_vm1, %v539_v4, %v541_v13  ;;  %v726_v4 = vrot.slane %v3826_v9, 2  ;;  %v719_v7 = vsel %vm714_vm3, %v716_v56, %v718_v6 }
  0x49   : > { %354 = vst.msk [vmem:[#allocation2 + $0x130] sm:$0x3] %vm317_vm2, %v3605_v0  ;;  %620 = vrot.lane.b32.xlu0 %v542_v16, %s5597_s20 }
  0x4a   : > { %357 = vst.msk [vmem:[#allocation2 + $0x148] sm:$0x3] %vm317_vm2, %v3605_v0  ;;  %v727_v5 = vsel %vm714_vm3, %v725_v3, %v726_v4  ;;  %v729_v13 = vsel %vm714_vm3, %v726_v4, %v728_v12 }
  0x4b   : > { %360 = vst.msk [vmem:[#allocation2 + $0x160] sm:$0x3] %vm317_vm2, %v3605_v0 }
  0x4c   : > { %363 = vst.msk [vmem:[#allocation2 + $0x178] sm:$0x3] %vm317_vm2, %v3605_v0 }
  0x4d   : > { %366 = vst.msk [vmem:[#allocation2 + $0x190] sm:$0x3] %vm317_vm2, %v3605_v0 }
  0x4e   : > { %369 = vst.msk [vmem:[#allocation2 + $0x1a8] sm:$0x3] %vm317_vm2, %v3605_v0 }
  0x4f   : > { %403 = vst.msk [vmem:[#allocation2 + $0x19] sm:$0xff] %vm314_vm0, %v370_v18 }
  0x50   : > { %404 = vst.msk [vmem:[#allocation2 + $0x21] sm:$0xff] %vm314_vm0, %v371_v19  ;;  %628 = vrot.lane.b32.xlu2 %v3866_v20, %s5597_s20 }
  0x51   : > { %407 = vst.msk [vmem:[#allocation2 + $0x49] sm:$0xff] %vm314_vm0, %v374_v21 }
  0x52   : > { %408 = vst.msk [vmem:[#allocation2 + $0x51] sm:$0xff] %vm314_vm0, %v375_v22 }
  0x53   : > { %409 = vst.msk [vmem:[#allocation2 + $0x61] sm:$0xff] %vm314_vm0, %v376_v23 }
  0x54   : > { %410 = vst.msk [vmem:[#allocation2 + $0x69] sm:$0xff] %vm314_vm0, %v377_v24 }
  0x55   : > { %411 = vst.msk [vmem:[#allocation2 + $0x79] sm:$0xff] %vm314_vm0, %v378_v25  ;;  %v1764_v25 = vld [vmem:[%s5590_s2 + $0x40] sm:$0xff] }
  0x56   : > { %v3885_v27 = vld [vmem:[#allocation2 + $0x18] sm:$0xff]  ;;  %412 = vst.msk [vmem:[#allocation2 + $0x81] sm:$0xff] %vm314_vm0, %v379_v26  ;;  %1873 = vmatpush.msra.mxu0 %v1764_v25 }
  0x57   : > { %v3888_v28 = vld [vmem:[#allocation2 + $0x20] sm:$0xff]  ;;  %v543_v29 = vrot.slane %v3885_v27, 1  ;;  %v3894_v32 = vld [vmem:[#allocation2 + $0x28] sm:$0x3]  ;;  %v720_v61 = vrot.slane %v3885_v27, 2  ;;  %v1763_v26 = vld [vmem:[%s5590_s2 + $0x38] sm:$0xff] }
  0x58   : > { %v544_v30 = vrot.slane %v3888_v28, 1  ;;  %v3892_v31 = vld [vmem:[#allocation2 + $0x48] sm:$0xff]  ;;  %v546_v41 = vrot.slane %v3894_v32, 1  ;;  %v721_v62 = vrot.slane %v3888_v28, 2  ;;  %v723_v10 = vrot.slane %v3894_v32, 2  ;;  %1874 = vmatpush.msra.mxu0 %v1763_v26 }
  0x59   : > { %v3896_v33 = vld [vmem:[#allocation2 + $0x50] sm:$0xff]  ;;  %v553_v34 = vrot.slane %v3892_v31, 1  ;;  %v3929_v51 = vld [vmem:[#allocation2 + $0x58] sm:$0x3]  ;;  %v730_v16 = vrot.slane %v3892_v31, 2 }
  0x5a   : > { %v545_v35 = vsel %vm537_vm1, %v543_v29, %v544_v30  ;;  %v554_v36 = vrot.slane %v3896_v33, 1  ;;  %v3901_v37 = vld [vmem:[#allocation2 + $0x60] sm:$0xff]  ;;  %v547_v48 = vsel %vm537_vm1, %v544_v30, %v546_v41  ;;  %v556_v53 = vrot.slane %v3929_v51, 1  ;;  %v1762_v30 = vld [vmem:[%s5590_s2 + $0x30] sm:$0xff] }
  0x5b   : > { %622 = vrot.lane.b32.xlu1 %v545_v35, %s5597_s20  ;;  %v3904_v38 = vld [vmem:[#allocation2 + $0x68] sm:$0xff]  ;;  %v558_v39 = vrot.slane %v3901_v37, 1  ;;  %v3907_v40 = vld [vmem:[#allocation2 + $0x70] sm:$0x3]  ;;  %v722_v0 = vsel %vm714_vm3, %v720_v61, %v721_v62  ;;  %v724_v11 = vsel %vm714_vm3, %v721_v62, %v723_v10  ;;  %v731_v17 = vrot.slane %v3896_v33, 2  ;;  %1875 = vmatpush.msra.mxu0 %v1762_v30  ;;  %v1760_v41 = vld [vmem:[%s5590_s2 + $0x20] sm:$0xff] }
  0x5c   : > { %v3911_v42 = vsel %vm537_vm1, %v553_v34, %v554_v36  ;;  %v559_v43 = vrot.slane %v3904_v38, 1  ;;  %v561_v47 = vrot.slane %v3907_v40, 1  ;;  %v3946_v57 = vsel %vm537_vm1, %v554_v36, %v556_v53  ;;  %v3948_v58 = vld [vmem:[#allocation2 + $0x78] sm:$0xff]  ;;  %v1761_v36 = vld [vmem:[%s5590_s2 + $0x28] sm:$0xff]  ;;  %v1756_v53 = vld [vmem:[%s5590_s2] sm:$0xff] }
  0x5d   : > { %630 = vrot.lane.b32.xlu0 %v3911_v42, %s5597_s20  ;;  %v3916_v44 = vld [vmem:[#allocation2 + $0x80] sm:$0xff]  ;;  %v3918_v45 = vld [vmem:[#allocation2 + $0x88] sm:$0x3]  ;;  %v563_v60 = vrot.slane %v3948_v58, 1  ;;  %v3998_v18 = vsel %vm714_vm3, %v730_v16, %v731_v17  ;;  %v733_v19 = vrot.slane %v3929_v51, 2  ;;  %v735_v32 = vrot.slane %v3901_v37, 2  ;;  %1876 = vmatpush.msra.mxu0 %v1761_v36 }
  0x5e   : > { %v3921_v46 = vsel %vm537_vm1, %v558_v39, %v559_v43  ;;  %v564_v49 = vrot.slane %v3916_v44, 1  ;;  %v566_v50 = vrot.slane %v3918_v45, 1  ;;  %v3932_v52 = vsel %vm537_vm1, %v559_v43, %v561_v47  ;;  %v1759_v47 = vld [vmem:[%s5590_s2 + $0x18] sm:$0xff] }
  0x5f   : > { %634 = vrot.lane.b32.xlu2 %v3921_v46, %s5597_s20  ;;  %v736_v34 = vrot.slane %v3904_v38, 2  ;;  %v738_v43 = vrot.slane %v3907_v40, 2  ;;  %1877 = vmatpush.msra.mxu0 %v1760_v41  ;;  %v1757_v40 = vld [vmem:[%s5590_s2 + $0x8] sm:$0xff] }
  0x60   : > { %v3937_v54 = vsel %vm537_vm1, %v564_v49, %v566_v50  ;;  %v3959_v63 = vsel %vm537_vm1, %v563_v60, %v564_v49  ;;  %v1758_v49 = vld [vmem:[%s5590_s2 + $0x10] sm:$0xff] }
  0x61   : > { %1878 = vmatpush.msra.mxu0 %v1759_v47  ;;  %v4088_v50 = vsel %vm714_vm3, %v736_v34, %v738_v43 }
  0x63   : > { %624 = vrot.lane.b32.xlu1 %v547_v48, %s5597_s20  ;;  %1879 = vmatpush.msra.mxu0 %v1758_v49 }
  0x65   : > { %636 = vrot.lane.b32.xlu0 %v3932_v52, %s5597_s20  ;;  %1880 = vmatpush.msra.mxu0 %v1757_v40 }
  0x67   : > { %640 = vrot.lane.b32.xlu2 %v3937_v54, %s5597_s20  ;;  %1881 = vmatpush.msra.mxu0 %v1756_v53 }
  0x6b   : > { %632 = vrot.lane.b32.xlu1 %v3946_v57, %s5597_s20 }
  0x6d   : > { %795 = vrot.lane.b32.xlu0 %v717_v59, %s3607_s9 }
  0x6f   : > { %995 = vrot.lane.b32.xlu2 %v545_v35, %s3608_s13 }
  0x73   : > { %638 = vrot.lane.b32.xlu1 %v3959_v63, %s5597_s20 }
  0x75   : > { %1096 = vrot.lane.b32.xlu0 %v722_v0, %s3609_s14 }
  0x77   : > { %1296 = vrot.lane.b32.xlu2 %v3842_v15, %s5599_s15 }
  0x7b   : > { %893 = vrot.lane.b32.xlu1 %v3885_v27, %s3611_s16 }
  0x7d   : > { %1397 = vrot.lane.b32.xlu0 %v727_v5, %s3612_s17 }
  0x7f   : > { %895 = vrot.lane.b32.xlu2 %v3888_v28, %s3611_s16 }
  0x83   : > { %1194 = vrot.lane.b32.xlu1 %v3822_v8, %s3613_s18 }
  0x85   : > { %997 = vrot.lane.b32.xlu0 %v547_v48, %s3608_s13 }
  0x87   : > { %1196 = vrot.lane.b32.xlu2 %v3826_v9, %s3613_s18 }
  0x8b   : > { %797 = vrot.lane.b32.xlu1 %v719_v7, %s3607_s9 }
  0x8d   : > { %1298 = vrot.lane.b32.xlu0 %v3866_v20, %s5599_s15 }
  0x8f   : > { %799 = vrot.lane.b32.xlu2 %v722_v0, %s3607_s9  ;;  %v741_v0 = vrot.slane %v3916_v44, 2 }
  0x93   : > { %1098 = vrot.lane.b32.xlu1 %v724_v11, %s3609_s14 }
  0x95   : > { %897 = vrot.lane.b32.xlu0 %v3822_v8, %s3611_s16  ;;  %v4032_v22 = vpop.permute.xlu0 %618 }
  0x96   : > { %v1493_v6 = vsel %vm314_vm0, %v3728_v1, %v4032_v22 }
  0x97   : > { %1100 = vrot.lane.b32.xlu2 %v727_v5, %s3609_s14 }
  0x9b   : > { %1399 = vrot.lane.b32.xlu1 %v729_v13, %s3612_s17 }
  0x9d   : > { %1198 = vrot.lane.b32.xlu0 %v3892_v31, %s3613_s18 }
  0x9f   : > { %1401 = vrot.lane.b32.xlu2 %v3998_v18, %s3612_s17 }
  0xa2   : > { %v4007_v14 = vpop.permute.xlu2 %626 }
  0xa3   : > { %999 = vrot.lane.b32.xlu1 %v3842_v15, %s3608_s13  ;;  %v4020_v15 = vsel %vm714_vm3, %v731_v17, %v733_v19 }
  0xa5   : > { %801 = vrot.lane.b32.xlu0 %v724_v11, %s3607_s9 }
  0xa7   : > { %1001 = vrot.lane.b32.xlu2 %v3866_v20, %s3608_s13 }
  0xaa   : > { %v4017_v21 = vpop.permute.xlu2 %628 }
  0xab   : > { %1300 = vrot.lane.b32.xlu1 %v3911_v42, %s5599_s15 }
  0xad   : > { %1102 = vrot.lane.b32.xlu0 %v729_v13, %s3609_s14 }
  0xaf   : > { %1302 = vrot.lane.b32.xlu2 %v3946_v57, %s5599_s15 }
  0xb3   : > { %899 = vrot.lane.b32.xlu1 %v3826_v9, %s3611_s16 }
  0xb5   : > { %1403 = vrot.lane.b32.xlu0 %v4020_v15, %s3612_s17 }
  0xb7   : > { %901 = vrot.lane.b32.xlu2 %v3892_v31, %s3611_s16 }
  0xb9   : > { %v4028_v20 = vpop.permute.xlu2 %634 }
  0xbb   : > { %1200 = vrot.lane.b32.xlu1 %v3896_v33, %s3613_s18  ;;  %v4043_v24 = vpop.permute.xlu0 %620 }
  0xbd   : > { %1003 = vrot.lane.b32.xlu0 %v3911_v42, %s3608_s13  ;;  %v4076_v42 = vsel %vm714_vm3, %v735_v32, %v736_v34 }
  0xbf   : > { %1202 = vrot.lane.b32.xlu2 %v3901_v37, %s3613_s18 }
  0xc1   : > { %v4038_v23 = vpop.permute.xlu2 %640 }
  0xc3   : > { %803 = vrot.lane.b32.xlu1 %v727_v5, %s3607_s9  ;;  %v380_v5 = vld [vmem:[%s3796_s8 + $0x50] sm:$0xff] }
  0xc4   : > { %413 = vst.msk [vmem:[#allocation2 + $0x91] sm:$0xff] %vm314_vm0, %v380_v5 }
  0xc5   : > { %1304 = vrot.lane.b32.xlu0 %v3921_v46, %s5599_s15 }
  0xc7   : > { %805 = vrot.lane.b32.xlu2 %v729_v13, %s3607_s9  ;;  %v381_v13 = vld [vmem:[%s3796_s8 + $0x58] sm:$0xff] }
  0xc8   : > { %414 = vst.msk [vmem:[#allocation2 + $0x99] sm:$0xff] %vm314_vm0, %v381_v13 }
  0xc9   : > { %v4052_v29 = vpop.permute.xlu2 %995 }
  0xcb   : > { %1104 = vrot.lane.b32.xlu1 %v3998_v18, %s3609_s14 }
  0xcd   : > { %v4061_v35 = vpop.permute.xlu1 %622  ;;  %903 = vrot.lane.b32.xlu0 %v3896_v33, %s3611_s16 }
  0xcf   : > { %v4068_v39 = vpop.permute.xlu0 %630  ;;  %1106 = vrot.lane.b32.xlu2 %v4020_v15, %s3609_s14 }
  0xd1   : > { %v1297_v48 = vpop.permute.xlu2 %1296 }
  0xd3   : > { %1405 = vrot.lane.b32.xlu1 %v4076_v42, %s3612_s17 }
  0xd5   : > { %v4090_v51 = vpop.permute.xlu1 %624  ;;  %1204 = vrot.lane.b32.xlu0 %v3904_v38, %s3613_s18 }
  0xd7   : > { %v4100_v55 = vpop.permute.xlu0 %636  ;;  %1407 = vrot.lane.b32.xlu2 %v4088_v50, %s3612_s17 }
  0xd9   : > { %v896_v56 = vpop.permute.xlu2 %895 }
  0xdb   : > { %1005 = vrot.lane.b32.xlu1 %v3946_v57, %s3608_s13  ;;  %v740_v57 = vrot.slane %v3948_v58, 2 }
  0xdd   : > { %v4106_v59 = vpop.permute.xlu1 %632  ;;  %807 = vrot.lane.b32.xlu0 %v3998_v18, %s3607_s9  ;;  %v4127_v4 = vsel %vm714_vm3, %v740_v57, %v741_v0 }
  0xdf   : > { %v796_v60 = vpop.permute.xlu0 %795  ;;  %1007 = vrot.lane.b32.xlu2 %v3921_v46, %s3608_s13 }
  0xe0   : > { %v1526_v10 = vsel %vm1525_vm4, %v1493_v6, %v796_v60  ;;  %v383_v6 = vld [vmem:[%s3796_s8 + $0x68] sm:$0xff] }
  0xe1   : > { %v4112_v61 = vpop.permute.xlu2 %1196  ;;  %416 = vst.msk [vmem:[#allocation2 + $0xb1] sm:$0xff] %vm314_vm0, %v383_v6 }
  0xe3   : > { %1306 = vrot.lane.b32.xlu1 %v3932_v52, %s5603_s22 }
  0xe5   : > { %v4116_v62 = vpop.permute.xlu1 %638  ;;  %1108 = vrot.lane.b32.xlu0 %v4076_v42, %s3609_s14 }
  0xe7   : > { %v1097_v3 = vpop.permute.xlu0 %1096  ;;  %1308 = vrot.lane.b32.xlu2 %v3959_v63, %s5603_s22 }
  0xe9   : > { %v4124_v46 = vpop.permute.xlu2 %799 }
  0xeb   : > { %905 = vrot.lane.b32.xlu1 %v3901_v37, %s3611_s16 }
  0xed   : > { %v894_v7 = vpop.permute.xlu1 %893  ;;  %1409 = vrot.lane.b32.xlu0 %v4127_v4, %s3612_s17 }
  0xee   : > { %v1559_v11 = vsel %vm1558_vm5, %v1526_v10, %v894_v7  ;;  %v1495_v10 = vsel %vm314_vm0, %v3885_v27, %v4061_v35 }
  0xef   : > { %v1398_v12 = vpop.permute.xlu0 %1397  ;;  %907 = vrot.lane.b32.xlu2 %v3904_v38, %s3611_s16  ;;  %v1592_v1 = vsel %vm1591_vm6, %v1559_v11, %v4052_v29  ;;  %v1528_v13 = vsel %vm1525_vm4, %v1495_v10, %v4124_v46 }
  0xf0   : > { %v1625_v17 = vsel %vm1624_vm7, %v1592_v1, %v1097_v3 }
  0xf1   : > { %v4144_v16 = vpop.permute.xlu2 %1100 }
  0xf3   : > { %1206 = vrot.lane.b32.xlu1 %v3948_v58, %s3613_s18 }
  0xf5   : > { %v1195_v18 = vpop.permute.xlu1 %1194  ;;  %1009 = vrot.lane.b32.xlu0 %v3932_v52, %s3608_s13  ;;  %v1494_v52 = vsel %vm314_vm0, %v3732_v2, %v4043_v24  ;;  %v4179_v2 = vld [vmem:[#allocation2 + $0x98] sm:$0xff] }
  0xf6   : > { %v1658_v19 = vsel %vm1657_vm8, %v1625_v17, %v1195_v18  ;;  %v746_v40 = vrot.slane %v4179_v2, 2  ;;  %v455_v17 = vld [vmem:[#allocation2 + $0xa0] sm:$0x3] }
  0xf7   : > { %v1691_v22 = vsel %vm1690_vm9, %v1658_v19, %v1297_v48  ;;  %v998_v25 = vpop.permute.xlu0 %997  ;;  %1208 = vrot.lane.b32.xlu2 %v3916_v44, %s3613_s18  ;;  %v4185_v48 = vld [vmem:[#allocation2 + $0x90] sm:$0xff]  ;;  %v571_v35 = vrot.slane %v455_v17, 1 }
  0xf8   : > { %v1724_v26 = vsel %vm1723_vm10, %v1691_v22, %v1398_v12  ;;  %v745_v49 = vrot.slane %v4185_v48, 2  ;;  %v568_v11 = vrot.slane %v4185_v48, 1  ;;  %v569_v12 = vrot.slane %v4179_v2, 1 }
  0xf9   : > { %3308 = vmatmul.msk.f32.vlgmr.msra.gmra.mxu0 %vm1769_vm11, %v1724_v26  ;;  %v4159_v29 = vpop.permute.xlu2 %1401 }
  0xfa   : > { %v4199_v60 = vsel %vm714_vm3, %v745_v49, %v746_v40  ;;  %v4230_v27 = vsel %vm537_vm1, %v568_v11, %v569_v12 }
  0xfb   : > { %809 = vrot.lane.b32.xlu1 %v4020_v15, %s3607_s9  ;;  %v743_v15 = vrot.slane %v3918_v45, 2 }
  0xfd   : > { %v798_v30 = vpop.permute.xlu1 %797  ;;  %1310 = vrot.lane.b32.xlu0 %v3937_v54, %s5603_s22  ;;  %v4188_v45 = vsel %vm714_vm3, %v741_v0, %v743_v15 }
  0xfe   : > { %v1527_v34 = vsel %vm1525_vm4, %v1494_v52, %v798_v30  ;;  %v748_v30 = vrot.slane %v455_v17, 2  ;;  %v385_v17 = vld [vmem:[%s3796_s8 + $0x78] sm:$0xff] }
  0xff   : > { %v1299_v32 = vpop.permute.xlu0 %1298  ;;  %811 = vrot.lane.b32.xlu2 %v4076_v42, %s3607_s9  ;;  %v1560_v41 = vsel %vm1558_vm5, %v1527_v34, %v896_v56  ;;  %418 = vst.msk [vmem:[#allocation2 + $0xc9] sm:$0xff] %vm314_vm0, %v385_v17 }
 0x100   : > { %v1593_v24 = vsel %vm1591_vm6, %v1560_v41, %v998_v25  ;;  %v4253_v34 = vsel %vm714_vm3, %v746_v40, %v748_v30  ;;  %v1496_v41 = vsel %vm314_vm0, %v3888_v28, %v4090_v51 }
 0x101   : > { %v4171_v36 = vpop.permute.xlu2 %1001 }
 0x103   : > { %1110 = vrot.lane.b32.xlu1 %v4088_v50, %s3609_s14 }
 0x105   : > { %v1099_v43 = vpop.permute.xlu1 %1098  ;;  %909 = vrot.lane.b32.xlu0 %v3948_v58, %s3611_s16 }
 0x106   : > { %v1626_v42 = vsel %vm1624_vm7, %v1593_v24, %v1099_v43 }
 0x107   : > { %v898_v47 = vpop.permute.xlu0 %897  ;;  %1112 = vrot.lane.b32.xlu2 %v4127_v4, %s3609_s14  ;;  %v1659_v56 = vsel %vm1657_vm8, %v1626_v42, %v4112_v61  ;;  %v382_v61 = vld [vmem:[%s3796_s8 + $0x60] sm:$0xff] }
 0x108   : > { %v1692_v57 = vsel %vm1690_vm9, %v1659_v56, %v1299_v32  ;;  %415 = vst.msk [vmem:[#allocation2 + $0xa9] sm:$0xff] %vm314_vm0, %v382_v61  ;;  %v1561_v18 = vsel %vm1558_vm5, %v1528_v13, %v898_v47 }
 0x109   : > { %v4192_v53 = vpop.permute.xlu2 %1302 }
 0x10b   : > { %1411 = vrot.lane.b32.xlu1 %v4188_v45, %s3612_s17 }
 0x10d   : > { %v1400_v3 = vpop.permute.xlu1 %1399  ;;  %1210 = vrot.lane.b32.xlu0 %v4185_v48, %s3613_s18 }
 0x10e   : > { %v1725_v0 = vsel %vm1723_vm10, %v1692_v57, %v1400_v3 }
 0x10f   : > { %3309 = vmatmul.msk.f32.gmra.mxu0 %vm1769_vm11, %v1725_v0  ;;  %v1199_v5 = vpop.permute.xlu0 %1198  ;;  %1413 = vrot.lane.b32.xlu2 %v4199_v60, %s3612_s17  ;;  %v4272_v28 = vld [vmem:[#allocation2 + $0xa8] sm:$0xff]  ;;  %v4274_v51 = vld [vmem:[#allocation2 + $0xb0] sm:$0xff] }
 0x110   : > { %v573_v57 = vrot.slane %v4272_v28, 1  ;;  %v574_v3 = vrot.slane %v4274_v51, 1 }
 0x111   : > { %v4210_v7 = vpop.permute.xlu2 %901 }
 0x112   : > { %v4289_v6 = vsel %vm537_vm1, %v573_v57, %v574_v3 }
 0x113   : > { %1011 = vrot.lane.b32.xlu1 %v3959_v63, %s3608_s13 }
 0x115   : > { %v1000_v1 = vpop.permute.xlu1 %999  ;;  %813 = vrot.lane.b32.xlu0 %v4088_v50, %s3607_s9  ;;  %v4239_v50 = vsel %vm537_vm1, %v569_v12, %v571_v35 }
 0x116   : > { %v1594_v63 = vsel %vm1591_vm6, %v1561_v18, %v1000_v1  ;;  %v384_v1 = vld [vmem:[%s3796_s8 + $0x70] sm:$0xff] }
 0x117   : > { %v802_v19 = vpop.permute.xlu0 %801  ;;  %1013 = vrot.lane.b32.xlu2 %v3937_v54, %s3608_s13  ;;  %v1627_v46 = vsel %vm1624_vm7, %v1594_v63, %v4144_v16  ;;  %417 = vst.msk [vmem:[#allocation2 + $0xc1] sm:$0xff] %vm314_vm0, %v384_v1 }
 0x118   : > { %v1660_v25 = vsel %vm1657_vm8, %v1627_v46, %v1199_v5 }
 0x119   : > { %v4232_v22 = vpop.permute.xlu2 %1202 }
 0x11b   : > { %1312 = vrot.lane.b32.xlu1 %v4230_v27, %s5603_s22 }
 0x11d   : > { %v1301_v26 = vpop.permute.xlu1 %1300  ;;  %1114 = vrot.lane.b32.xlu0 %v4188_v45, %s3609_s14 }
 0x11e   : > { %v1693_v54 = vsel %vm1690_vm9, %v1660_v25, %v1301_v26  ;;  %v4360_v57 = vld [vmem:[#allocation2 + $0xc8] sm:$0xff] }
 0x11f   : > { %v1726_v52 = vsel %vm1723_vm10, %v1693_v54, %v4159_v29  ;;  %v1103_v32 = vpop.permute.xlu0 %1102  ;;  %1314 = vrot.lane.b32.xlu2 %v4239_v50, %s5603_s22  ;;  %v1529_v29 = vsel %vm1525_vm4, %v1496_v41, %v802_v19 }
 0x120   : > { %3310 = vmatmul.msk.f32.gmra.mxu0 %vm1769_vm11, %v1726_v52  ;;  %v458_v52 = vld [vmem:[#allocation2 + $0xb8] sm:$0x3] }
 0x121   : > { %v4250_v16 = vpop.permute.xlu2 %805  ;;  %v753_v41 = vrot.slane %v458_v52, 2 }
 0x123   : > { %911 = vrot.lane.b32.xlu1 %v3916_v44, %s3611_s16 }
 0x125   : > { %v900_v15 = vpop.permute.xlu1 %899  ;;  %1415 = vrot.lane.b32.xlu0 %v4253_v34, %s3612_s17 }
 0x126   : > { %v1562_v43 = vsel %vm1558_vm5, %v1529_v29, %v900_v15  ;;  %v1498_v15 = vsel %vm314_vm0, %v3826_v9, %v4017_v21  ;;  %v576_v29 = vrot.slane %v458_v52, 1 }
 0x127   : > { %v1404_v24 = vpop.permute.xlu0 %1403  ;;  %913 = vrot.lane.b32.xlu2 %v4185_v48, %s3611_s16  ;;  %v1595_v47 = vsel %vm1591_vm6, %v1562_v43, %v4171_v36  ;;  %v1531_v43 = vsel %vm1525_vm4, %v1498_v15, %v4250_v16  ;;  %v4358_v16 = vld [vmem:[#allocation2 + $0xc0] sm:$0xff] }
 0x128   : > { %v1628_v49 = vsel %vm1624_vm7, %v1595_v47, %v1103_v32 }
 0x129   : > { %v4266_v42 = vpop.permute.xlu2 %1106 }
 0x12b   : > { %1212 = vrot.lane.b32.xlu1 %v4179_v2, %s3613_s18 }
 0x12d   : > { %v1201_v40 = vpop.permute.xlu1 %1200  ;;  %1015 = vrot.lane.b32.xlu0 %v4230_v27, %s3608_s13 }
 0x12e   : > { %v1661_v56 = vsel %vm1657_vm8, %v1628_v49, %v1201_v40 }
 0x12f   : > { %v1694_v36 = vsel %vm1690_vm9, %v1661_v56, %v4192_v53  ;;  %v1004_v0 = vpop.permute.xlu0 %1003  ;;  %1214 = vrot.lane.b32.xlu2 %v4272_v28, %s3613_s18  ;;  %v1497_v53 = vsel %vm314_vm0, %v3822_v8, %v4007_v14  ;;  %v750_v8 = vrot.slane %v4272_v28, 2  ;;  %v751_v14 = vrot.slane %v4274_v51, 2 }
 0x130   : > { %v1727_v5 = vsel %vm1723_vm10, %v1694_v36, %v1404_v24  ;;  %v4350_v56 = vsel %vm537_vm1, %v574_v3, %v576_v29 }
 0x131   : > { %3311 = vmatmul.msk.f32.gmra.mxu0 %vm1769_vm11, %v1727_v5  ;;  %v1408_v61 = vpop.permute.xlu2 %1407 }
 0x133   : > { %815 = vrot.lane.b32.xlu1 %v4127_v4, %s3607_s9 }
 0x135   : > { %v804_v10 = vpop.permute.xlu1 %803  ;;  %1316 = vrot.lane.b32.xlu0 %v4289_v6, %s5603_s22 }
 0x136   : > { %v1530_v12 = vsel %vm1525_vm4, %v1497_v53, %v804_v10 }
 0x137   : > { %v1305_v11 = vpop.permute.xlu0 %1304  ;;  %817 = vrot.lane.b32.xlu2 %v4188_v45, %s3607_s9  ;;  %v1563_v4 = vsel %vm1558_vm5, %v1530_v12, %v4210_v7  ;;  %v4320_v7 = vsel %vm714_vm3, %v750_v8, %v751_v14  ;;  %v1499_v12 = vsel %vm314_vm0, %v3892_v31, %v4068_v39  ;;  %v755_v31 = vrot.slane %v4358_v16, 2 }
 0x138   : > { %v1596_v18 = vsel %vm1591_vm6, %v1563_v4, %v1004_v0  ;;  %v579_v0 = vrot.slane %v4360_v57, 1  ;;  %v756_v39 = vrot.slane %v4360_v57, 2 }
 0x139   : > { %v4301_v13 = vpop.permute.xlu2 %1007 }
 0x13b   : > { %1116 = vrot.lane.b32.xlu1 %v4199_v60, %s3609_s14 }
 0x13d   : > { %v1105_v45 = vpop.permute.xlu1 %1104  ;;  %915 = vrot.lane.b32.xlu0 %v4179_v2, %s3611_s16 }
 0x13e   : > { %v1629_v63 = vsel %vm1624_vm7, %v1596_v18, %v1105_v45 }
 0x13f   : > { %v904_v19 = vpop.permute.xlu0 %903  ;;  %1118 = vrot.lane.b32.xlu2 %v4253_v34, %s3609_s14  ;;  %v1662_v46 = vsel %vm1657_vm8, %v1629_v63, %v4232_v22  ;;  %v4336_v22 = vsel %vm714_vm3, %v751_v14, %v753_v41  ;;  %v386_v14 = vld [vmem:[%s3796_s8 + $0x80] sm:$0xff] }
 0x140   : > { %v1695_v25 = vsel %vm1690_vm9, %v1662_v46, %v1305_v11  ;;  %v1564_v47 = vsel %vm1558_vm5, %v1531_v43, %v904_v19  ;;  %419 = vst.msk [vmem:[#allocation2 + $0xd9] sm:$0xff] %vm314_vm0, %v386_v14  ;;  %v387_v46 = vld [vmem:[%s3796_s8 + $0x88] sm:$0xff] }
 0x141   : > { %v1309_v35 = vpop.permute.xlu2 %1308  ;;  %420 = vst.msk [vmem:[#allocation2 + $0xe1] sm:$0xff] %vm314_vm0, %v387_v46 }
 0x143   : > { %1417 = vrot.lane.b32.xlu1 %v4320_v7, %s3612_s17 }
 0x145   : > { %v1406_v26 = vpop.permute.xlu1 %1405  ;;  %1216 = vrot.lane.b32.xlu0 %v4274_v51, %s3613_s18 }
 0x146   : > { %v1728_v54 = vsel %vm1723_vm10, %v1695_v25, %v1406_v26  ;;  %v4408_v26 = vsel %vm714_vm3, %v755_v31, %v756_v39 }
 0x147   : > { %3312 = vmatmul.msk.f32.gmra.mxu0 %vm1769_vm11, %v1728_v54  ;;  %v1205_v30 = vpop.permute.xlu0 %1204  ;;  %1419 = vrot.lane.b32.xlu2 %v4336_v22, %s3612_s17 }
 0x148   : > { %v464_v46 = vld [vmem:[#allocation2 + $0xe8] sm:$0x3] }
 0x149   : > { %v4331_v32 = vpop.permute.xlu2 %907 }
 0x14b   : > { %1017 = vrot.lane.b32.xlu1 %v4239_v50, %s3608_s13 }
 0x14d   : > { %v1006_v24 = vpop.permute.xlu1 %1005  ;;  %642 = vrot.lane.b32.xlu0 %v4230_v27, %s5604_s19 }
 0x14e   : > { %v1597_v49 = vsel %vm1591_vm6, %v1564_v47, %v1006_v24 }
 0x14f   : > { %v808_v40 = vpop.permute.xlu0 %807  ;;  %v1630_v21 = vsel %vm1624_vm7, %v1597_v49, %v4266_v42  ;;  %917 = vrot.lane.b32.xlu2 %v4272_v28, %s3611_s16  ;;  %v578_v42 = vrot.slane %v4358_v16, 1 }
 0x150   : > { %v1663_v27 = vsel %vm1657_vm8, %v1630_v21, %v1205_v30  ;;  %v1532_v1 = vsel %vm1525_vm4, %v1499_v12, %v808_v40  ;;  %v1500_v30 = vsel %vm314_vm0, %v3896_v33, %v4106_v59 }
 0x151   : > { %v4352_v9 = vpop.permute.xlu2 %1208  ;;  %v4375_v11 = vsel %vm537_vm1, %v578_v42, %v579_v0 }
 0x153   : > { %1318 = vrot.lane.b32.xlu1 %v4350_v56, %s5603_s22 }
 0x155   : > { %v1307_v36 = vpop.permute.xlu1 %1306  ;;  %1019 = vrot.lane.b32.xlu0 %v4289_v6, %s3608_s13 }
 0x156   : > { %v1696_v3 = vsel %vm1690_vm9, %v1663_v27, %v1307_v36 }
 0x157   : > { %v1729_v5 = vsel %vm1723_vm10, %v1696_v3, %v1408_v61  ;;  %v1109_v10 = vpop.permute.xlu0 %1108  ;;  %1218 = vrot.lane.b32.xlu2 %v4358_v16, %s3613_s18 }
 0x158   : > { %3313 = vmatmul.msk.f32.gmra.mxu0 %vm1769_vm11, %v1729_v5 }
 0x159   : > { %v4372_v53 = vpop.permute.xlu2 %811 }
 0x15b   : > { %819 = vrot.lane.b32.xlu1 %v4199_v60, %s3607_s9 }
 0x15d   : > { %v906_v61 = vpop.permute.xlu1 %905  ;;  %1320 = vrot.lane.b32.xlu0 %v4375_v11, %s5603_s22 }
 0x15e   : > { %v1565_v17 = vsel %vm1558_vm5, %v1532_v1, %v906_v61 }
 0x15f   : > { %v1410_v4 = vpop.permute.xlu0 %1409  ;;  %v1598_v60 = vsel %vm1591_vm6, %v1565_v17, %v4301_v13  ;;  %644 = vrot.lane.b32.xlu2 %v4239_v50, %s5604_s19 }
 0x160   : > { %v1631_v45 = vsel %vm1624_vm7, %v1598_v60, %v1109_v10 }
 0x161   : > { %v4388_v8 = vpop.permute.xlu2 %1112 }
 0x163   : > { %1120 = vrot.lane.b32.xlu1 %v4320_v7, %s3609_s14 }
 0x165   : > { %v1207_v18 = vpop.permute.xlu1 %1206  ;;  %821 = vrot.lane.b32.xlu0 %v4253_v34, %s3607_s9  ;;  %v461_v34 = vld [vmem:[#allocation2 + $0xd0] sm:$0x3] }
 0x166   : > { %v1664_v13 = vsel %vm1657_vm8, %v1631_v45, %v1207_v18  ;;  %v758_v54 = vrot.slane %v461_v34, 2  ;;  %v581_v29 = vrot.slane %v461_v34, 1 }
 0x167   : > { %v1697_v63 = vsel %vm1690_vm9, %v1664_v13, %v1309_v35  ;;  %v1010_v19 = vpop.permute.xlu0 %1009  ;;  %1021 = vrot.lane.b32.xlu2 %v4350_v56, %s3608_s13 }
 0x168   : > { %v1730_v25 = vsel %vm1723_vm10, %v1697_v63, %v1410_v4  ;;  %v4425_v43 = vsel %vm714_vm3, %v756_v39, %v758_v54  ;;  %v4432_v47 = vsel %vm537_vm1, %v579_v0, %v581_v29  ;;  %v388_v63 = vld [vmem:[%s3796_s8 + $0x90] sm:$0xff] }
 0x169   : > { %3314 = vmatmul.msk.f32.gmra.mxu0 %vm1769_vm11, %v1730_v25  ;;  %v1414_v50 = vpop.permute.xlu2 %1413  ;;  %421 = vst.msk [vmem:[#allocation2 + $0xf1] sm:$0xff] %vm314_vm0, %v388_v63 }
 0x16b   : > { %1421 = vrot.lane.b32.xlu1 %v4408_v26, %s3612_s17 }
 0x16d   : > { %v810_v35 = vpop.permute.xlu1 %809  ;;  %1122 = vrot.lane.b32.xlu0 %v4336_v22, %s3609_s14 }
 0x16e   : > { %v1533_v41 = vsel %vm1525_vm4, %v1500_v30, %v810_v35  ;;  %v586_v35 = vrot.slane %v464_v46, 1 }
 0x16f   : > { %v1311_v52 = vpop.permute.xlu0 %1310  ;;  %v1566_v24 = vsel %vm1558_vm5, %v1533_v41, %v4331_v32  ;;  %1322 = vrot.lane.b32.xlu2 %v4432_v47, %s5603_s22 }
 0x170   : > { %v1599_v59 = vsel %vm1591_vm6, %v1566_v24, %v1010_v19  ;;  %v389_v19 = vld [vmem:[%s3796_s8 + $0x98] sm:$0xff] }
 0x171   : > { %v4422_v15 = vpop.permute.xlu2 %1013  ;;  %422 = vst.msk [vmem:[#allocation2 + $0xf9] sm:$0xff] %vm314_vm0, %v389_v19 }
 0x173   : > { %919 = vrot.lane.b32.xlu1 %v4274_v51, %s3611_s16 }
 0x175   : > { %v1111_v33 = vpop.permute.xlu1 %1110  ;;  %1423 = vrot.lane.b32.xlu0 %v4425_v43, %s3612_s17 }
 0x176   : > { %v1632_v49 = vsel %vm1624_vm7, %v1599_v59, %v1111_v33 }
 0x177   : > { %v910_v40 = vpop.permute.xlu0 %909  ;;  %v1665_v32 = vsel %vm1657_vm8, %v1632_v49, %v4352_v9  ;;  %823 = vrot.lane.b32.xlu2 %v4320_v7, %s3607_s9  ;;  %v4455_v9 = vld [vmem:[#allocation2 + $0xd8] sm:$0xff]  ;;  %v1501_v7 = vsel %vm314_vm0, %v3901_v37, %v4028_v20 }
 0x178   : > { %v1698_v27 = vsel %vm1690_vm9, %v1665_v32, %v1311_v52  ;;  %v1534_v5 = vsel %vm1525_vm4, %v1501_v7, %v4372_v53  ;;  %v760_v37 = vrot.slane %v4455_v9, 2  ;;  %v583_v4 = vrot.slane %v4455_v9, 1 }
 0x179   : > { %v4440_v21 = vpop.permute.xlu2 %1314  ;;  %v1567_v12 = vsel %vm1558_vm5, %v1534_v5, %v910_v40 }
 0x17b   : > { %1220 = vrot.lane.b32.xlu1 %v4360_v57, %s3613_s18 }
 0x17d   : > { %v1412_v36 = vpop.permute.xlu1 %1411  ;;  %921 = vrot.lane.b32.xlu0 %v4358_v16, %s3611_s16 }
 0x17e   : > { %v1731_v3 = vsel %vm1723_vm10, %v1698_v27, %v1412_v36 }
 0x17f   : > { %3315 = vmatmul.msk.f32.gmra.mxu0 %vm1769_vm11, %v1731_v3  ;;  %v1211_v42 = vpop.permute.xlu0 %1210  ;;  %1124 = vrot.lane.b32.xlu2 %v4408_v26, %s3609_s14 }
 0x181   : > { %v4453_v0 = vpop.permute.xlu2 %913 }
 0x183   : > { %646 = vrot.lane.b32.xlu1 %v4289_v6, %s5604_s19  ;;  %v4470_v6 = vld [vmem:[#allocation2 + $0xe0] sm:$0xff] }
 0x184   : > { %v761_v17 = vrot.slane %v4470_v6, 2  ;;  %v584_v60 = vrot.slane %v4470_v6, 1 }
 0x185   : > { %v1012_v10 = vpop.permute.xlu1 %1011  ;;  %1222 = vrot.lane.b32.xlu0 %v4455_v9, %s3613_s18 }
 0x186   : > { %v1600_v61 = vsel %vm1591_vm6, %v1567_v12, %v1012_v10  ;;  %v4479_v53 = vsel %vm714_vm3, %v760_v37, %v761_v17  ;;  %v4494_v13 = vsel %vm537_vm1, %v583_v4, %v584_v60  ;;  %v4514_v41 = vsel %vm537_vm1, %v584_v60, %v586_v35 }
 0x187   : > { %v814_v1 = vpop.permute.xlu0 %813  ;;  %v1633_v20 = vsel %vm1624_vm7, %v1600_v61, %v4388_v8  ;;  %1425 = vrot.lane.b32.xlu2 %v4479_v53, %s3612_s17 }
 0x188   : > { %v1666_v39 = vsel %vm1657_vm8, %v1633_v20, %v1211_v42 }
 0x189   : > { %v4483_v31 = vpop.permute.xlu2 %1214 }
 0x18b   : > { %1023 = vrot.lane.b32.xlu1 %v4375_v11, %s3608_s13 }
 0x18d   : > { %v1313_v14 = vpop.permute.xlu1 %1312  ;;  %648 = vrot.lane.b32.xlu0 %v4350_v56, %s5604_s19  ;;  %v1502_v56 = vsel %vm314_vm0, %v3904_v38, %v4100_v55 }
 0x18e   : > { %v1699_v8 = vsel %vm1690_vm9, %v1666_v39, %v1313_v14  ;;  %v390_v14 = vld [vmem:[%s3796_s8 + $0xa0] sm:$0xff] }
 0x18f   : > { %v1732_v45 = vsel %vm1723_vm10, %v1699_v8, %v1414_v50  ;;  %v1115_v18 = vpop.permute.xlu0 %1114  ;;  %923 = vrot.lane.b32.xlu2 %v4360_v57, %s3611_s16  ;;  %v1535_v50 = vsel %vm1525_vm4, %v1502_v56, %v814_v1  ;;  %v391_v8 = vld [vmem:[%s3796_s8 + $0xa8] sm:$0xff]  ;;  %423 = vst.msk [vmem:[#allocation2 + $0x109] sm:$0xff] %vm314_vm0, %v390_v14  ;;  %v393_v14 = vld [vmem:[%s3796_s8 + $0xb8] sm:$0xff] }
 0x190   : > { %3316 = vmatmul.msk.f32.gmra.mxu0 %vm1769_vm11, %v1732_v45  ;;  %424 = vst.msk [vmem:[#allocation2 + $0x111] sm:$0xff] %vm314_vm0, %v391_v8  ;;  %v1504_v45 = vsel %vm314_vm0, %v3916_v44, %v4038_v23 }
 0x191   : > { %v818_v34 = vpop.permute.xlu2 %817  ;;  %426 = vst.msk [vmem:[#allocation2 + $0x129] sm:$0xff] %vm314_vm0, %v393_v14 }
 0x193   : > { %1324 = vrot.lane.b32.xlu1 %v4494_v13, %s5603_s22 }
 0x195   : > { %v912_v25 = vpop.permute.xlu1 %911  ;;  %1025 = vrot.lane.b32.xlu0 %v4432_v47, %s3608_s13 }
 0x196   : > { %v1568_v54 = vsel %vm1558_vm5, %v1535_v50, %v912_v25 }
 0x197   : > { %v1416_v30 = vpop.permute.xlu0 %1415  ;;  %v1601_v52 = vsel %vm1591_vm6, %v1568_v54, %v4422_v15  ;;  %1224 = vrot.lane.b32.xlu2 %v4470_v6, %s3613_s18 }
 0x198   : > { %v1634_v38 = vsel %vm1624_vm7, %v1601_v52, %v1115_v18  ;;  %v1537_v18 = vsel %vm1525_vm4, %v1504_v45, %v818_v34 }
 0x199   : > { %v1119_v24 = vpop.permute.xlu2 %1118 }
 0x19b   : > { %825 = vrot.lane.b32.xlu1 %v4336_v22, %s3607_s9  ;;  %v763_v22 = vrot.slane %v464_v46, 2 }
 0x19d   : > { %v1213_v55 = vpop.permute.xlu1 %1212  ;;  %1326 = vrot.lane.b32.xlu0 %v4514_v41, %s5603_s22  ;;  %v4539_v36 = vsel %vm714_vm3, %v761_v17, %v763_v22 }
 0x19e   : > { %v1667_v29 = vsel %vm1657_vm8, %v1634_v38, %v1213_v55 }
 0x19f   : > { %v1700_v15 = vsel %vm1690_vm9, %v1667_v29, %v4440_v21  ;;  %v1016_v33 = vpop.permute.xlu0 %1015  ;;  %650 = vrot.lane.b32.xlu2 %v4375_v11, %s5604_s19  ;;  %v1503_v21 = vsel %vm314_vm0, %v3948_v58, %v4116_v62  ;;  %v4545_v11 = vld [vmem:[#allocation2 + $0xf0] sm:$0xff] }
 0x1a0   : > { %v1733_v59 = vsel %vm1723_vm10, %v1700_v15, %v1416_v30  ;;  %v765_v42 = vrot.slane %v4545_v11, 2  ;;  %v588_v61 = vrot.slane %v4545_v11, 1  ;;  %v467_v30 = vld [vmem:[#allocation2 + $0x100] sm:$0x3] }
 0x1a1   : > { %3317 = vmatmul.msk.f32.gmra.mxu0 %vm1769_vm11, %v1733_v59  ;;  %v1420_v40 = vpop.permute.xlu2 %1419  ;;  %v768_v52 = vrot.slane %v467_v30, 2  ;;  %v591_v38 = vrot.slane %v467_v30, 1 }
 0x1a3   : > { %1126 = vrot.lane.b32.xlu1 %v4425_v43, %s3609_s14 }
 0x1a5   : > { %v816_v49 = vpop.permute.xlu1 %815  ;;  %827 = vrot.lane.b32.xlu0 %v4408_v26, %s3607_s9  ;;  %v4547_v26 = vld [vmem:[#allocation2 + $0xf8] sm:$0xff] }
 0x1a6   : > { %v1536_v27 = vsel %vm1525_vm4, %v1503_v21, %v816_v49  ;;  %v589_v12 = vrot.slane %v4547_v26, 1  ;;  %v4621_v49 = vld [vmem:[#allocation2 + $0x108] sm:$0xff] }
 0x1a7   : > { %v1317_v32 = vpop.permute.xlu0 %1316  ;;  %v1569_v3 = vsel %vm1558_vm5, %v1536_v27, %v4453_v0  ;;  %1027 = vrot.lane.b32.xlu2 %v4494_v13, %s3608_s13  ;;  %v766_v0 = vrot.slane %v4547_v26, 2  ;;  %v593_v21 = vrot.slane %v4621_v49, 1 }
 0x1a8   : > { %v1602_v62 = vsel %vm1591_vm6, %v1569_v3, %v1016_v33  ;;  %v4567_v37 = vsel %vm537_vm1, %v588_v61, %v589_v12  ;;  %v4616_v59 = vsel %vm537_vm1, %v589_v12, %v591_v38 }
 0x1a9   : > { %v918_v7 = vpop.permute.xlu2 %917  ;;  %v4562_v17 = vsel %vm714_vm3, %v765_v42, %v766_v0 }
 0x1ab   : > { %1427 = vrot.lane.b32.xlu1 %v4539_v36, %s3612_s17 }
 0x1ad   : > { %v1117_v58 = vpop.permute.xlu1 %1116  ;;  %1128 = vrot.lane.b32.xlu0 %v4479_v53, %s3609_s14 }
 0x1ae   : > { %v1635_v5 = vsel %vm1624_vm7, %v1602_v62, %v1117_v58 }
 0x1af   : > { %v916_v10 = vpop.permute.xlu0 %915  ;;  %v1668_v1 = vsel %vm1657_vm8, %v1635_v5, %v4483_v31  ;;  %1328 = vrot.lane.b32.xlu2 %v4567_v37, %s5603_s22 }
 0x1b0   : > { %v1701_v20 = vsel %vm1690_vm9, %v1668_v1, %v1317_v32  ;;  %v1570_v19 = vsel %vm1558_vm5, %v1537_v18, %v916_v10 }
 0x1b1   : > { %v1219_v31 = vpop.permute.xlu2 %1218 }
 0x1b3   : > { %925 = vrot.lane.b32.xlu1 %v4455_v9, %s3611_s16 }
 0x1b5   : > { %v1418_v4 = vpop.permute.xlu1 %1417  ;;  %1429 = vrot.lane.b32.xlu0 %v4562_v17, %s3612_s17 }
 0x1b6   : > { %v1734_v60 = vsel %vm1723_vm10, %v1701_v20, %v1418_v4  ;;  %v392_v20 = vld [vmem:[%s3796_s8 + $0xb0] sm:$0xff] }
 0x1b7   : > { %3318 = vmatmul.msk.f32.gmra.mxu0 %vm1769_vm11, %v1734_v60  ;;  %v1217_v39 = vpop.permute.xlu0 %1216  ;;  %829 = vrot.lane.b32.xlu2 %v4425_v43, %s3607_s9  ;;  %425 = vst.msk [vmem:[#allocation2 + $0x121] sm:$0xff] %vm314_vm0, %v392_v20  ;;  %v395_v20 = vld [vmem:[%s3796_s8 + $0xc8] sm:$0xff] }
 0x1b8   : > { %428 = vst.msk [vmem:[#allocation2 + $0x141] sm:$0xff] %vm314_vm0, %v395_v20 }
 0x1b9   : > { %v645_v46 = vpop.permute.xlu2 %644 }
 0x1ba   : > { %v1506_v61 = vsel %vm314_vm0, %v4179_v2, %v645_v46 }
 0x1bb   : > { %1226 = vrot.lane.b32.xlu1 %v4545_v11, %s3613_s18 }
 0x1bd   : > { %v1018_v63 = vpop.permute.xlu1 %1017  ;;  %927 = vrot.lane.b32.xlu0 %v4470_v6, %s3611_s16 }
 0x1be   : > { %v1603_v56 = vsel %vm1591_vm6, %v1570_v19, %v1018_v63 }
 0x1bf   : > { %v643_v25 = vpop.permute.xlu0 %642  ;;  %v1636_v50 = vsel %vm1624_vm7, %v1603_v56, %v1119_v24  ;;  %1130 = vrot.lane.b32.xlu2 %v4539_v36, %s3609_s14 }
 0x1c0   : > { %v1669_v44 = vsel %vm1657_vm8, %v1636_v50, %v1217_v39  ;;  %v1505_v24 = vsel %vm314_vm0, %v4185_v48, %v643_v25 }
 0x1c1   : > { %v1022_v34 = vpop.permute.xlu2 %1021 }
 0x1c3   : > { %652 = vrot.lane.b32.xlu1 %v4432_v47, %s5604_s19  ;;  %v4606_v47 = vsel %vm714_vm3, %v766_v0, %v768_v52 }
 0x1c5   : > { %v1319_v23 = vpop.permute.xlu1 %1318  ;;  %1228 = vrot.lane.b32.xlu0 %v4547_v26, %s3613_s18 }
 0x1c6   : > { %v1702_v43 = vsel %vm1690_vm9, %v1669_v44, %v1319_v23 }
 0x1c7   : > { %v1735_v35 = vsel %vm1723_vm10, %v1702_v43, %v1420_v40  ;;  %v1020_v54 = vpop.permute.xlu0 %1019  ;;  %1431 = vrot.lane.b32.xlu2 %v4606_v47, %s3612_s17  ;;  %v4623_v40 = vld [vmem:[#allocation2 + $0x110] sm:$0xff] }
 0x1c8   : > { %3319 = vmatmul.msk.f32.gmra.mxu0 %vm1769_vm11, %v1735_v35  ;;  %v594_v32 = vrot.slane %v4623_v40, 1  ;;  %v771_v1 = vrot.slane %v4623_v40, 2 }
 0x1c9   : > { %v1323_v29 = vpop.permute.xlu2 %1322 }
 0x1ca   : > { %v4635_v42 = vsel %vm537_vm1, %v593_v21, %v594_v32 }
 0x1cb   : > { %1029 = vrot.lane.b32.xlu1 %v4514_v41, %s3608_s13 }
 0x1cd   : > { %v820_v55 = vpop.permute.xlu1 %819  ;;  %654 = vrot.lane.b32.xlu0 %v4494_v13, %s5604_s19 }
 0x1ce   : > { %v1538_v33 = vsel %vm1525_vm4, %v1505_v24, %v820_v55 }
 0x1cf   : > { %v1321_v15 = vpop.permute.xlu0 %1320  ;;  %v1571_v22 = vsel %vm1558_vm5, %v1538_v33, %v918_v7  ;;  %929 = vrot.lane.b32.xlu2 %v4545_v11, %s3611_s16  ;;  %v4701_v33 = vld [vmem:[#allocation2 + $0x120] sm:$0xff] }
 0x1d0   : > { %v1604_v48 = vsel %vm1591_vm6, %v1571_v22, %v1020_v54 }
 0x1d1   : > { %v824_v27 = vpop.permute.xlu2 %823 }
 0x1d3   : > { %1330 = vrot.lane.b32.xlu1 %v4616_v59, %s5603_s22 }
 0x1d5   : > { %v1121_v13 = vpop.permute.xlu1 %1120  ;;  %1031 = vrot.lane.b32.xlu0 %v4567_v37, %s3608_s13 }
 0x1d6   : > { %v1637_v3 = vsel %vm1624_vm7, %v1604_v48, %v1121_v13 }
 0x1d7   : > { %v822_v58 = vpop.permute.xlu0 %821  ;;  %v1670_v62 = vsel %vm1657_vm8, %v1637_v3, %v1219_v31  ;;  %1230 = vrot.lane.b32.xlu2 %v4621_v49, %s3613_s18  ;;  %v775_v3 = vrot.slane %v4701_v33, 2 }
 0x1d8   : > { %v1703_v0 = vsel %vm1690_vm9, %v1670_v62, %v1321_v15  ;;  %v1539_v60 = vsel %vm1525_vm4, %v1506_v61, %v822_v58  ;;  %v598_v62 = vrot.slane %v4701_v33, 1 }
 0x1d9   : > { %v1125_v10 = vpop.permute.xlu2 %1124 }
 0x1db   : > { %831 = vrot.lane.b32.xlu1 %v4479_v53, %s3607_s9  ;;  %v770_v53 = vrot.slane %v4621_v49, 2 }
 0x1dd   : > { %v1422_v7 = vpop.permute.xlu1 %1421  ;;  %1332 = vrot.lane.b32.xlu0 %v4635_v42, %s5603_s22  ;;  %v4662_v8 = vsel %vm714_vm3, %v770_v53, %v771_v1 }
 0x1de   : > { %v1736_v5 = vsel %vm1723_vm10, %v1703_v0, %v1422_v7 }
 0x1df   : > { %3320 = vmatmul.msk.f32.gmra.mxu0 %vm1769_vm11, %v1736_v5  ;;  %v1123_v12 = vpop.permute.xlu0 %1122  ;;  %656 = vrot.lane.b32.xlu2 %v4514_v41, %s5604_s19 }
 0x1e1   : > { %v1426_v2 = vpop.permute.xlu2 %1425 }
 0x1e3   : > { %1132 = vrot.lane.b32.xlu1 %v4562_v17, %s3609_s14 }
 0x1e5   : > { %v920_v4 = vpop.permute.xlu1 %919  ;;  %833 = vrot.lane.b32.xlu0 %v4539_v36, %s3607_s9  ;;  %v470_v36 = vld [vmem:[#allocation2 + $0x118] sm:$0x3] }
 0x1e6   : > { %v1572_v31 = vsel %vm1558_vm5, %v1539_v60, %v920_v4  ;;  %v773_v19 = vrot.slane %v470_v36, 2  ;;  %v596_v44 = vrot.slane %v470_v36, 1 }
 0x1e7   : > { %v1424_v39 = vpop.permute.xlu0 %1423  ;;  %v1605_v41 = vsel %vm1591_vm6, %v1572_v31, %v1022_v34  ;;  %1033 = vrot.lane.b32.xlu2 %v4616_v59, %s3608_s13 }
 0x1e8   : > { %v1638_v45 = vsel %vm1624_vm7, %v1605_v41, %v1123_v12  ;;  %v4678_v23 = vsel %vm714_vm3, %v771_v1, %v773_v19  ;;  %v4683_v43 = vsel %vm537_vm1, %v594_v32, %v596_v44  ;;  %v394_v1 = vld [vmem:[%s3796_s8 + $0xc0] sm:$0xff] }
 0x1e9   : > { %v924_v46 = vpop.permute.xlu2 %923  ;;  %427 = vst.msk [vmem:[#allocation2 + $0x139] sm:$0xff] %vm314_vm0, %v394_v1 }
 0x1eb   : > { %1433 = vrot.lane.b32.xlu1 %v4662_v8, %s3612_s17 }
 0x1ed   : > { %v1221_v18 = vpop.permute.xlu1 %1220  ;;  %1134 = vrot.lane.b32.xlu0 %v4606_v47, %s3609_s14 }
 0x1ee   : > { %v1671_v63 = vsel %vm1657_vm8, %v1638_v45, %v1221_v18 }
 0x1ef   : > { %v1704_v56 = vsel %vm1690_vm9, %v1671_v63, %v1323_v29  ;;  %v922_v25 = vpop.permute.xlu0 %921  ;;  %1334 = vrot.lane.b32.xlu2 %v4683_v43, %s5603_s22 }
 0x1f0   : > { %v1737_v50 = vsel %vm1723_vm10, %v1704_v56, %v1424_v39 }
 0x1f1   : > { %3321 = vmatmul.msk.f32.gmra.mxu0 %vm1769_vm11, %v1737_v50  ;;  %v1225_v35 = vpop.permute.xlu2 %1224 }
 0x1f3   : > { %931 = vrot.lane.b32.xlu1 %v4547_v26, %s3611_s16 }
 0x1f5   : > { %v647_v34 = vpop.permute.xlu1 %646  ;;  %1435 = vrot.lane.b32.xlu0 %v4678_v23, %s3612_s17 }
 0x1f6   : > { %v1507_v30 = vsel %vm314_vm0, %v4272_v28, %v647_v34 }
 0x1f7   : > { %v1223_v54 = vpop.permute.xlu0 %1222  ;;  %v1540_v52 = vsel %vm1525_vm4, %v1507_v30, %v824_v27  ;;  %835 = vrot.lane.b32.xlu2 %v4562_v17, %s3607_s9  ;;  %v4712_v27 = vld [vmem:[#allocation2 + $0x128] sm:$0xff]  ;;  %v4776_v30 = vld [vmem:[#allocation2 + $0x138] sm:$0xff] }
 0x1f8   : > { %v1573_v55 = vsel %vm1558_vm5, %v1540_v52, %v922_v25  ;;  %v599_v0 = vrot.slane %v4712_v27, 1 }
 0x1f9   : > { %v651_v29 = vpop.permute.xlu2 %650 }
 0x1fa   : > { %v4732_v53 = vsel %vm537_vm1, %v598_v62, %v599_v0  ;;  %v1509_v56 = vsel %vm314_vm0, %v4358_v16, %v651_v29 }
 0x1fb   : > { %1232 = vrot.lane.b32.xlu1 %v4623_v40, %s3613_s18 }
 0x1fd   : > { %v1024_v38 = vpop.permute.xlu1 %1023  ;;  %933 = vrot.lane.b32.xlu0 %v4621_v49, %s3611_s16 }
 0x1fe   : > { %v1606_v24 = vsel %vm1591_vm6, %v1573_v55, %v1024_v38  ;;  %v780_v55 = vrot.slane %v4776_v30, 2 }
 0x1ff   : > { %v649_v15 = vpop.permute.xlu0 %648  ;;  %v1639_v28 = vsel %vm1624_vm7, %v1606_v24, %v1125_v10  ;;  %1136 = vrot.lane.b32.xlu2 %v4662_v8, %s3609_s14 }
 0x200   : > { %v1672_v17 = vsel %vm1657_vm8, %v1639_v28, %v1223_v54  ;;  %v1508_v10 = vsel %vm314_vm0, %v4274_v51, %v649_v15 }
 0x201   : > { %v1028_v48 = vpop.permute.xlu2 %1027 }
 0x203   : > { %658 = vrot.lane.b32.xlu1 %v4567_v37, %s5604_s19  ;;  %v776_v37 = vrot.slane %v4712_v27, 2 }
 0x205   : > { %v1325_v22 = vpop.permute.xlu1 %1324  ;;  %1234 = vrot.lane.b32.xlu0 %v4701_v33, %s3613_s18  ;;  %v4720_v58 = vsel %vm714_vm3, %v775_v3, %v776_v37 }
 0x206   : > { %v1705_v13 = vsel %vm1690_vm9, %v1672_v17, %v1325_v22 }
 0x207   : > { %v1738_v21 = vsel %vm1723_vm10, %v1705_v13, %v1426_v2  ;;  %v1026_v32 = vpop.permute.xlu0 %1025  ;;  %1437 = vrot.lane.b32.xlu2 %v4720_v58, %s3612_s17  ;;  %v603_v13 = vrot.slane %v4776_v30, 1 }
 0x208   : > { %3322 = vmatmul.msk.f32.gmra.mxu0 %vm1769_vm11, %v1738_v21 }
 0x209   : > { %v1329_v5 = vpop.permute.xlu2 %1328 }
 0x20b   : > { %1035 = vrot.lane.b32.xlu1 %v4635_v42, %s3608_s13 }
 0x20d   : > { %v826_v7 = vpop.permute.xlu1 %825  ;;  %660 = vrot.lane.b32.xlu0 %v4616_v59, %s5604_s19  ;;  %v473_v59 = vld [vmem:[#allocation2 + $0x130] sm:$0x3] }
 0x20e   : > { %v1541_v61 = vsel %vm1525_vm4, %v1508_v10, %v826_v7  ;;  %v601_v2 = vrot.slane %v473_v59, 1  ;;  %v397_v7 = vld [vmem:[%s3796_s8 + $0xd8] sm:$0xff] }
 0x20f   : > { %v1327_v12 = vpop.permute.xlu0 %1326  ;;  %v1574_v4 = vsel %vm1558_vm5, %v1541_v61, %v924_v46  ;;  %935 = vrot.lane.b32.xlu2 %v4623_v40, %s3611_s16  ;;  %430 = vst.msk [vmem:[#allocation2 + $0x159] sm:$0xff] %vm314_vm0, %v397_v7 }
 0x210   : > { %v1607_v60 = vsel %vm1591_vm6, %v1574_v4, %v1026_v32  ;;  %v4749_v36 = vsel %vm537_vm1, %v599_v0, %v601_v2  ;;  %v396_v0 = vld [vmem:[%s3796_s8 + $0xd0] sm:$0xff] }
 0x211   : > { %v830_v31 = vpop.permute.xlu2 %829  ;;  %429 = vst.msk [vmem:[#allocation2 + $0x151] sm:$0xff] %vm314_vm0, %v396_v0 }
 0x213   : > { %1336 = vrot.lane.b32.xlu1 %v4732_v53, %s5603_s22 }
 0x215   : > { %v1127_v51 = vpop.permute.xlu1 %1126  ;;  %1037 = vrot.lane.b32.xlu0 %v4683_v43, %s3608_s13 }
 0x216   : > { %v1640_v39 = vsel %vm1624_vm7, %v1607_v60, %v1127_v51 }
 0x217   : > { %v828_v14 = vpop.permute.xlu0 %827  ;;  %v1673_v41 = vsel %vm1657_vm8, %v1640_v39, %v1225_v35  ;;  %1236 = vrot.lane.b32.xlu2 %v4712_v27, %s3613_s18 }
 0x218   : > { %v1706_v45 = vsel %vm1690_vm9, %v1673_v41, %v1327_v12  ;;  %v1542_v50 = vsel %vm1525_vm4, %v1509_v56, %v828_v14 }
 0x219   : > { %v1131_v19 = vpop.permute.xlu2 %1130 }
 0x21b   : > { %837 = vrot.lane.b32.xlu1 %v4606_v47, %s3607_s9  ;;  %v778_v47 = vrot.slane %v473_v59, 2 }
 0x21d   : > { %v1428_v18 = vpop.permute.xlu1 %1427  ;;  %1338 = vrot.lane.b32.xlu0 %v4749_v36, %s5603_s22  ;;  %v4771_v54 = vsel %vm714_vm3, %v776_v37, %v778_v47  ;;  %v4849_v47 = vld [vmem:[#allocation2 + $0x150] sm:$0xff] }
 0x21e   : > { %v1739_v63 = vsel %vm1723_vm10, %v1706_v45, %v1428_v18 }
 0x21f   : > { %3323 = vmatmul.msk.f32.gmra.mxu0 %vm1769_vm11, %v1739_v63  ;;  %v1129_v46 = vpop.permute.xlu0 %1128  ;;  %662 = vrot.lane.b32.xlu2 %v4635_v42, %s5604_s19  ;;  %v4778_v42 = vld [vmem:[#allocation2 + $0x140] sm:$0xff] }
 0x220   : > { %v781_v29 = vrot.slane %v4778_v42, 2  ;;  %v604_v22 = vrot.slane %v4778_v42, 1 }
 0x221   : > { %v1432_v44 = vpop.permute.xlu2 %1431 }
 0x222   : > { %v4799_v21 = vsel %vm537_vm1, %v603_v13, %v604_v22 }
 0x223   : > { %1138 = vrot.lane.b32.xlu1 %v4678_v23, %s3609_s14 }
 0x225   : > { %v926_v25 = vpop.permute.xlu1 %925  ;;  %839 = vrot.lane.b32.xlu0 %v4662_v8, %s3607_s9 }
 0x226   : > { %v1575_v34 = vsel %vm1558_vm5, %v1542_v50, %v926_v25  ;;  %v4851_v25 = vld [vmem:[#allocation2 + $0x158] sm:$0xff]  ;;  %v608_v50 = vrot.slane %v4849_v47, 1 }
 0x227   : > { %v1430_v35 = vpop.permute.xlu0 %1429  ;;  %v1608_v16 = vsel %vm1591_vm6, %v1575_v34, %v1028_v48  ;;  %1039 = vrot.lane.b32.xlu2 %v4732_v53, %s3608_s13  ;;  %v4794_v48 = vsel %vm714_vm3, %v780_v55, %v781_v29 }
 0x228   : > { %v1641_v8 = vsel %vm1624_vm7, %v1608_v16, %v1129_v46 }
 0x229   : > { %v930_v24 = vpop.permute.xlu2 %929 }
 0x22b   : > { %1439 = vrot.lane.b32.xlu1 %v4771_v54, %s3612_s17 }
 0x22d   : > { %v1227_v52 = vpop.permute.xlu1 %1226  ;;  %1140 = vrot.lane.b32.xlu0 %v4720_v58, %s3609_s14 }
 0x22e   : > { %v1674_v38 = vsel %vm1657_vm8, %v1641_v8, %v1227_v52 }
 0x22f   : > { %v1707_v15 = vsel %vm1690_vm9, %v1674_v38, %v1329_v5  ;;  %v928_v28 = vpop.permute.xlu0 %927  ;;  %1340 = vrot.lane.b32.xlu2 %v4799_v21, %s5603_s22 }
 0x230   : > { %v1740_v17 = vsel %vm1723_vm10, %v1707_v15, %v1430_v35 }
 0x231   : > { %3324 = vmatmul.msk.f32.gmra.mxu0 %vm1769_vm11, %v1740_v17  ;;  %v1231_v37 = vpop.permute.xlu2 %1230  ;;  %v786_v17 = vrot.slane %v4851_v25, 2 }
 0x233   : > { %937 = vrot.lane.b32.xlu1 %v4701_v33, %s3611_s16 }
 0x235   : > { %v653_v32 = vpop.permute.xlu1 %652  ;;  %1441 = vrot.lane.b32.xlu0 %v4794_v48, %s3612_s17 }
 0x236   : > { %v1510_v62 = vsel %vm314_vm0, %v4360_v57, %v653_v32 }
 0x237   : > { %v1229_v3 = vpop.permute.xlu0 %1228  ;;  %v1543_v5 = vsel %vm1525_vm4, %v1510_v62, %v830_v31  ;;  %841 = vrot.lane.b32.xlu2 %v4678_v23, %s3607_s9  ;;  %v476_v31 = vld [vmem:[#allocation2 + $0x148] sm:$0x3] }
 0x238   : > { %v1576_v57 = vsel %vm1558_vm5, %v1543_v5, %v928_v28  ;;  %v783_v39 = vrot.slane %v476_v31, 2  ;;  %v606_v14 = vrot.slane %v476_v31, 1  ;;  %v399_v62 = vld [vmem:[%s3796_s8 + $0xe8] sm:$0xff] }
 0x239   : > { %v657_v12 = vpop.permute.xlu2 %656  ;;  %432 = vst.msk [vmem:[#allocation2 + $0x171] sm:$0xff] %vm314_vm0, %v399_v62 }
 0x23a   : > { %v4844_v46 = vsel %vm537_vm1, %v604_v22, %v606_v14  ;;  %v1512_v28 = vsel %vm314_vm0, %v4470_v6, %v657_v12  ;;  %v398_v22 = vld [vmem:[%s3796_s8 + $0xe0] sm:$0xff] }
 0x23b   : > { %1238 = vrot.lane.b32.xlu1 %v4776_v30, %s3613_s18  ;;  %431 = vst.msk [vmem:[#allocation2 + $0x169] sm:$0xff] %vm314_vm0, %v398_v22  ;;  %v401_v22 = vld [vmem:[%s3796_s8 + $0xf8] sm:$0xff] }
 0x23c   : > { %434 = vst.msk [vmem:[#allocation2 + $0x189] sm:$0xff] %vm314_vm0, %v401_v22 }
 0x23d   : > { %v1030_v10 = vpop.permute.xlu1 %1029  ;;  %939 = vrot.lane.b32.xlu0 %v4712_v27, %s3611_s16 }
 0x23e   : > { %v1609_v61 = vsel %vm1591_vm6, %v1576_v57, %v1030_v10 }
 0x23f   : > { %v655_v1 = vpop.permute.xlu0 %654  ;;  %v1642_v20 = vsel %vm1624_vm7, %v1609_v61, %v1131_v19  ;;  %1142 = vrot.lane.b32.xlu2 %v4771_v54, %s3609_s14 }
 0x240   : > { %v1675_v23 = vsel %vm1657_vm8, %v1642_v20, %v1229_v3  ;;  %v1511_v18 = vsel %vm314_vm0, %v4455_v9, %v655_v1 }
 0x241   : > { %v1034_v51 = vpop.permute.xlu2 %1033 }
 0x243   : > { %664 = vrot.lane.b32.xlu1 %v4683_v43, %s5604_s19  ;;  %v4834_v43 = vsel %vm714_vm3, %v781_v29, %v783_v39 }
 0x245   : > { %v1331_v4 = vpop.permute.xlu1 %1330  ;;  %1240 = vrot.lane.b32.xlu0 %v4778_v42, %s3613_s18 }
 0x246   : > { %v1708_v59 = vsel %vm1690_vm9, %v1675_v23, %v1331_v4 }
 0x247   : > { %v1741_v60 = vsel %vm1723_vm10, %v1708_v59, %v1432_v44  ;;  %v1032_v2 = vpop.permute.xlu0 %1031  ;;  %1443 = vrot.lane.b32.xlu2 %v4834_v43, %s3612_s17  ;;  %v609_v44 = vrot.slane %v4851_v25, 1 }
 0x248   : > { %3325 = vmatmul.msk.f32.gmra.mxu0 %vm1769_vm11, %v1741_v60 }
 0x249   : > { %v1335_v45 = vpop.permute.xlu2 %1334  ;;  %v4863_v52 = vsel %vm537_vm1, %v608_v50, %v609_v44 }
 0x24b   : > { %1041 = vrot.lane.b32.xlu1 %v4749_v36, %s3608_s13 }
 0x24d   : > { %v832_v41 = vpop.permute.xlu1 %831  ;;  %666 = vrot.lane.b32.xlu0 %v4732_v53, %s5604_s19 }
 0x24e   : > { %v1544_v19 = vsel %vm1525_vm4, %v1511_v18, %v832_v41 }
 0x24f   : > { %v1333_v63 = vpop.permute.xlu0 %1332  ;;  %v1577_v56 = vsel %vm1558_vm5, %v1544_v19, %v930_v24  ;;  %941 = vrot.lane.b32.xlu2 %v4776_v30, %s3611_s16  ;;  %v4929_v19 = vld [vmem:[#allocation2 + $0x168] sm:$0xff] }
 0x250   : > { %v1610_v9 = vsel %vm1591_vm6, %v1577_v56, %v1032_v2 }
 0x251   : > { %v836_v34 = vpop.permute.xlu2 %835 }
 0x253   : > { %1342 = vrot.lane.b32.xlu1 %v4844_v46, %s5603_s22 }
 0x255   : > { %v1133_v53 = vpop.permute.xlu1 %1132  ;;  %1043 = vrot.lane.b32.xlu0 %v4799_v21, %s3608_s13 }
 0x256   : > { %v1643_v35 = vsel %vm1624_vm7, %v1610_v9, %v1133_v53 }
 0x257   : > { %v834_v16 = vpop.permute.xlu0 %833  ;;  %v1676_v8 = vsel %vm1657_vm8, %v1643_v35, %v1231_v37  ;;  %1242 = vrot.lane.b32.xlu2 %v4849_v47, %s3613_s18  ;;  %v790_v35 = vrot.slane %v4929_v19, 2 }
 0x258   : > { %v1709_v38 = vsel %vm1690_vm9, %v1676_v8, %v1333_v63  ;;  %v1545_v32 = vsel %vm1525_vm4, %v1512_v28, %v834_v16  ;;  %v613_v8 = vrot.slane %v4929_v19, 1 }
 0x259   : > { %v1137_v24 = vpop.permute.xlu2 %1136 }
 0x25b   : > { %843 = vrot.lane.b32.xlu1 %v4720_v58, %s3607_s9  ;;  %v785_v58 = vrot.slane %v4849_v47, 2 }
 0x25d   : > { %v1434_v55 = vpop.permute.xlu1 %1433  ;;  %1344 = vrot.lane.b32.xlu0 %v4863_v52, %s5603_s22  ;;  %v4890_v0 = vsel %vm714_vm3, %v785_v58, %v786_v17 }
 0x25e   : > { %v1742_v29 = vsel %vm1723_vm10, %v1709_v38, %v1434_v55 }
 0x25f   : > { %3326 = vmatmul.msk.f32.gmra.mxu0 %vm1769_vm11, %v1742_v29  ;;  %v1135_v15 = vpop.permute.xlu0 %1134  ;;  %668 = vrot.lane.b32.xlu2 %v4749_v36, %s5604_s19 }
 0x261   : > { %v1438_v6 = vpop.permute.xlu2 %1437 }
 0x263   : > { %1144 = vrot.lane.b32.xlu1 %v4794_v48, %s3609_s14 }
 0x265   : > { %v932_v13 = vpop.permute.xlu1 %931  ;;  %845 = vrot.lane.b32.xlu0 %v4771_v54, %s3607_s9  ;;  %v479_v54 = vld [vmem:[#allocation2 + $0x160] sm:$0x3] }
 0x266   : > { %v1578_v37 = vsel %vm1558_vm5, %v1545_v32, %v932_v13  ;;  %v788_v57 = vrot.slane %v479_v54, 2  ;;  %v611_v23 = vrot.slane %v479_v54, 1 }
 0x267   : > { %v1436_v3 = vpop.permute.xlu0 %1435  ;;  %v1611_v36 = vsel %vm1591_vm6, %v1578_v37, %v1034_v51  ;;  %1045 = vrot.lane.b32.xlu2 %v4844_v46, %s3608_s13 }
 0x268   : > { %v1644_v7 = vsel %vm1624_vm7, %v1611_v36, %v1135_v15  ;;  %v4906_v4 = vsel %vm714_vm3, %v786_v17, %v788_v57  ;;  %v4911_v59 = vsel %vm537_vm1, %v609_v44, %v611_v23  ;;  %v400_v17 = vld [vmem:[%s3796_s8 + $0xf0] sm:$0xff] }
 0x269   : > { %v936_v12 = vpop.permute.xlu2 %935  ;;  %433 = vst.msk [vmem:[#allocation2 + $0x181] sm:$0xff] %vm314_vm0, %v400_v17 }
 0x26b   : > { %1445 = vrot.lane.b32.xlu1 %v4890_v0, %s3612_s17 }
 0x26d   : > { %v1233_v5 = vpop.permute.xlu1 %1232  ;;  %1146 = vrot.lane.b32.xlu0 %v4834_v43, %s3609_s14 }
 0x26e   : > { %v1677_v10 = vsel %vm1657_vm8, %v1644_v7, %v1233_v5 }
 0x26f   : > { %v1710_v61 = vsel %vm1690_vm9, %v1677_v10, %v1335_v45  ;;  %v934_v1 = vpop.permute.xlu0 %933  ;;  %1346 = vrot.lane.b32.xlu2 %v4911_v59, %s5603_s22 }
 0x270   : > { %v1743_v20 = vsel %vm1723_vm10, %v1710_v61, %v1436_v3  ;;  %v4988_v61 = vpop.f32.mrf.mxu0 }
 0x271   : > { %3327 = vmatmul.msk.f32.gmra.mxu0 %vm1769_vm11, %v1743_v20  ;;  %v1237_v60 = vpop.permute.xlu2 %1236 }
 0x273   : > { %943 = vrot.lane.b32.xlu1 %v4778_v42, %s3611_s16 }
 0x275   : > { %v659_v51 = vpop.permute.xlu1 %658  ;;  %1447 = vrot.lane.b32.xlu0 %v4906_v4, %s3612_s17 }
 0x276   : > { %v1513_v31 = vsel %vm314_vm0, %v4545_v11, %v659_v51 }
 0x277   : > { %v1235_v2 = vpop.permute.xlu0 %1234  ;;  %v1546_v39 = vsel %vm1525_vm4, %v1513_v31, %v836_v34  ;;  %847 = vrot.lane.b32.xlu2 %v4794_v48, %s3607_s9  ;;  %v4940_v34 = vld [vmem:[#allocation2 + $0x170] sm:$0xff] }
 0x278   : > { %v1579_v41 = vsel %vm1558_vm5, %v1546_v39, %v934_v1  ;;  %v614_v38 = vrot.slane %v4940_v34, 1  ;;  %v5000_v31 = vpop.f32.mrf.mxu0 }
 0x279   : > { %v663_v45 = vpop.permute.xlu2 %662 }
 0x27a   : > { %v4960_v58 = vsel %vm537_vm1, %v613_v8, %v614_v38 }
 0x27b   : > { %1244 = vrot.lane.b32.xlu1 %v4851_v25, %s3613_s18 }
 0x27d   : > { %v1036_v14 = vpop.permute.xlu1 %1035  ;;  %945 = vrot.lane.b32.xlu0 %v4849_v47, %s3611_s16 }
 0x27e   : > { %v1612_v18 = vsel %vm1591_vm6, %v1579_v41, %v1036_v14  ;;  %v5010_v14 = vld [vmem:[#allocation2 + $0x188] sm:$0xff] }
 0x27f   : > { %v661_v63 = vpop.permute.xlu0 %660  ;;  %v1645_v11 = vsel %vm1624_vm7, %v1612_v18, %v1137_v24  ;;  %1148 = vrot.lane.b32.xlu2 %v4890_v0, %s3609_s14 }
 0x280   : > { %v1678_v48 = vsel %vm1657_vm8, %v1645_v11, %v1235_v2  ;;  %v1514_v24 = vsel %vm314_vm0, %v4547_v26, %v661_v63  ;;  %v1092_v63 = vrot.slane %v5010_v14, 2 }
 0x281   : > { %v1040_v9 = vpop.permute.xlu2 %1039 }
 0x283   : > { %670 = vrot.lane.b32.xlu1 %v4799_v21, %s5604_s19  ;;  %v791_v21 = vrot.slane %v4940_v34, 2 }
 0x285   : > { %v1337_v56 = vpop.permute.xlu1 %1336  ;;  %1246 = vrot.lane.b32.xlu0 %v4929_v19, %s3613_s18  ;;  %v4948_v16 = vsel %vm714_vm3, %v790_v35, %v791_v21 }
 0x286   : > { %v1711_v53 = vsel %vm1690_vm9, %v1678_v48, %v1337_v56 }
 0x287   : > { %v1744_v50 = vsel %vm1723_vm10, %v1711_v53, %v1438_v6  ;;  %v1038_v44 = vpop.permute.xlu0 %1037  ;;  %1449 = vrot.lane.b32.xlu2 %v4948_v16, %s3612_s17 }
 0x288   : > { %3328 = vmatmul.msk.f32.gmra.mxu0 %vm1769_vm11, %v1744_v50 }
 0x289   : > { %v1341_v29 = vpop.permute.xlu2 %1340 }
 0x28b   : > { %1047 = vrot.lane.b32.xlu1 %v4863_v52, %s3608_s13 }
 0x28d   : > { %v838_v55 = vpop.permute.xlu1 %837  ;;  %672 = vrot.lane.b32.xlu0 %v4844_v46, %s5604_s19  ;;  %v482_v46 = vld [vmem:[#allocation2 + $0x178] sm:$0x3] }
 0x28e   : > { %v1547_v28 = vsel %vm1525_vm4, %v1514_v24, %v838_v55  ;;  %v616_v6 = vrot.slane %v482_v46, 1  ;;  %v793_v1 = vrot.slane %v482_v46, 2 }
 0x28f   : > { %v1339_v15 = vpop.permute.xlu0 %1338  ;;  %v1580_v13 = vsel %vm1558_vm5, %v1547_v28, %v936_v12  ;;  %947 = vrot.lane.b32.xlu2 %v4851_v25, %s3611_s16 }
 0x290   : > { %v1613_v32 = vsel %vm1591_vm6, %v1580_v13, %v1038_v44  ;;  %v4977_v54 = vsel %vm537_vm1, %v614_v38, %v616_v6  ;;  %v991_v44 = vrot.slane %v5010_v14, 1 }
 0x291   : > { %v842_v37 = vpop.permute.xlu2 %841 }
 0x293   : > { %1348 = vrot.lane.b32.xlu1 %v4960_v58, %s5603_s22 }
 0x295   : > { %v1139_v26 = vpop.permute.xlu1 %1138  ;;  %1049 = vrot.lane.b32.xlu0 %v4911_v59, %s3608_s13 }
 0x296   : > { %v1646_v3 = vsel %vm1624_vm7, %v1613_v32, %v1139_v26 }
 0x297   : > { %v840_v62 = vpop.permute.xlu0 %839  ;;  %v1679_v36 = vsel %vm1657_vm8, %v1646_v3, %v1237_v60  ;;  %1248 = vrot.lane.b32.xlu2 %v4940_v34, %s3613_s18 }
 0x298   : > { %v1712_v7 = vsel %vm1690_vm9, %v1679_v36, %v1339_v15 }
 0x299   : > { %v1143_v57 = vpop.permute.xlu2 %1142 }
 0x29b   : > { %849 = vrot.lane.b32.xlu1 %v4834_v43, %s3607_s9  ;;  %v1515_v43 = vsel %vm314_vm0, %v4621_v49, %v663_v45  ;;  %v5003_v49 = vsel %vm714_vm3, %v791_v21, %v793_v1 }
 0x29c   : > { %v1548_v23 = vsel %vm1525_vm4, %v1515_v43, %v840_v62 }
 0x29d   : > { %v1440_v5 = vpop.permute.xlu1 %1439  ;;  %1350 = vrot.lane.b32.xlu0 %v4977_v54, %s5603_s22 }
 0x29e   : > { %v1745_v10 = vsel %vm1723_vm10, %v1712_v7, %v1440_v5 }
 0x29f   : > { %3329 = vmatmul.msk.f32.gmra.mxu0 %vm1769_vm11, %v1745_v10  ;;  %v1141_v12 = vpop.permute.xlu0 %1140  ;;  %674 = vrot.lane.b32.xlu2 %v4863_v52, %s5604_s19  ;;  %v5008_v52 = vld [vmem:[#allocation2 + $0x180] sm:$0xff] }
 0x2a0   : > { %v1091_v18 = vrot.slane %v5008_v52, 2  ;;  %v990_v53 = vrot.slane %v5008_v52, 1 }
 0x2a1   : > { %v1444_v51 = vpop.permute.xlu2 %1443 }
 0x2a2   : > { %v5028_v21 = vsel %vm714_vm3, %v1091_v18, %v1092_v63  ;;  %v992_v35 = vsel %vm537_vm1, %v990_v53, %v991_v44 }
 0x2a3   : > { %1150 = vrot.lane.b32.xlu1 %v4906_v4, %s3609_s14 }
 0x2a5   : > { %v938_v20 = vpop.permute.xlu1 %937  ;;  %851 = vrot.lane.b32.xlu0 %v4890_v0, %s3607_s9 }
 0x2a6   : > { %v1581_v60 = vsel %vm1558_vm5, %v1548_v23, %v938_v20 }
 0x2a7   : > { %v1442_v2 = vpop.permute.xlu0 %1441  ;;  %v1614_v39 = vsel %vm1591_vm6, %v1581_v60, %v1040_v9  ;;  %1051 = vrot.lane.b32.xlu2 %v4960_v58, %s3608_s13  ;;  %v5022_v9 = vpop.f32.mrf.mxu0 }
 0x2a8   : > { %v1647_v0 = vsel %vm1624_vm7, %v1614_v39, %v1141_v12  ;;  %v5078_v39 = vld [vmem:[#allocation2 + $0x1a0] sm:$0xff] }
 0x2a9   : > { %v942_v11 = vpop.permute.xlu2 %941 }
 0x2ab   : > { %1451 = vrot.lane.b32.xlu1 %v5003_v49, %s3612_s17 }
 0x2ad   : > { %v1239_v41 = vpop.permute.xlu1 %1238  ;;  %1152 = vrot.lane.b32.xlu0 %v4948_v16, %s3609_s14 }
 0x2ae   : > { %v1680_v45 = vsel %vm1657_vm8, %v1647_v0, %v1239_v41  ;;  %v1292_v41 = vrot.slane %v5078_v39, 1 }
 0x2af   : > { %v1713_v48 = vsel %vm1690_vm9, %v1680_v45, %v1341_v29  ;;  %v940_v56 = vpop.permute.xlu0 %939  ;;  %1352 = vrot.lane.b32.xlu2 %v992_v35, %s5603_s22  ;;  %v5036_v29 = vpop.f32.mrf.mxu0 }
 0x2b0   : > { %v1746_v50 = vsel %vm1723_vm10, %v1713_v48, %v1442_v2  ;;  %v486_v2 = vld [vmem:[#allocation2 + $0x198] sm:$0xff] }
 0x2b1   : > { %3330 = vmatmul.msk.f32.gmra.mxu0 %vm1769_vm11, %v1746_v50  ;;  %v1243_v38 = vpop.permute.xlu2 %1242  ;;  %v1291_v0 = vrot.slane %v486_v2, 1 }
 0x2b3   : > { %949 = vrot.lane.b32.xlu1 %v4929_v19, %s3611_s16 }
 0x2b5   : > { %v665_v8 = vpop.permute.xlu1 %664  ;;  %1453 = vrot.lane.b32.xlu0 %v5028_v21, %s3612_s17 }
 0x2b6   : > { %v1516_v24 = vsel %vm314_vm0, %v4623_v40, %v665_v8 }
 0x2b7   : > { %v1241_v55 = vpop.permute.xlu0 %1240  ;;  %v1549_v15 = vsel %vm1525_vm4, %v1516_v24, %v842_v37  ;;  %853 = vrot.lane.b32.xlu2 %v4906_v4, %s3607_s9  ;;  %v5049_v26 = vpop.f32.mrf.mxu0 }
 0x2b8   : > { %v1582_v17 = vsel %vm1558_vm5, %v1549_v15, %v940_v56  ;;  %v1293_v56 = vsel %vm537_vm1, %v1291_v0, %v1292_v41 }
 0x2b9   : > { %v669_v22 = vpop.permute.xlu2 %668 }
 0x2bb   : > { %1250 = vrot.lane.b32.xlu1 %v5008_v52, %s3613_s18 }
 0x2bd   : > { %v1042_v28 = vpop.permute.xlu1 %1041  ;;  %951 = vrot.lane.b32.xlu0 %v4940_v34, %s3611_s16 }
 0x2be   : > { %v1615_v13 = vsel %vm1591_vm6, %v1582_v17, %v1042_v28 }
 0x2bf   : > { %v667_v46 = vpop.permute.xlu0 %666  ;;  %v1648_v40 = vsel %vm1624_vm7, %v1615_v13, %v1143_v57  ;;  %1154 = vrot.lane.b32.xlu2 %v5003_v49, %s3609_s14  ;;  %v5061_v36 = vpop.f32.mrf.mxu0 }
 0x2c0   : > { %v1681_v4 = vsel %vm1657_vm8, %v1648_v40, %v1241_v55  ;;  %v1517_v43 = vsel %vm314_vm0, %v4701_v33, %v667_v46  ;;  %v1393_v55 = vrot.slane %v5078_v39, 2  ;;  %v488_v46 = vld [vmem:[#allocation2 + $0x1a8] sm:$0x3] }
 0x2c1   : > { %v1046_v37 = vpop.permute.xlu2 %1045 }
 0x2c3   : > { %676 = vrot.lane.b32.xlu1 %v4911_v59, %s5604_s19  ;;  %v485_v59 = vld [vmem:[#allocation2 + $0x190] sm:$0x3] }
 0x2c4   : > { %v1094_v7 = vrot.slane %v485_v59, 2  ;;  %v993_v10 = vrot.slane %v485_v59, 1 }
 0x2c5   : > { %v1343_v32 = vpop.permute.xlu1 %1342  ;;  %1252 = vrot.lane.b32.xlu0 %v5010_v14, %s3613_s18 }
 0x2c6   : > { %v1714_v6 = vsel %vm1690_vm9, %v1681_v4, %v1343_v32  ;;  %v1095_v5 = vsel %vm714_vm3, %v1092_v63, %v1094_v7  ;;  %v1395_v4 = vrot.slane %v488_v46, 2 }
 0x2c7   : > { %v1747_v3 = vsel %vm1723_vm10, %v1714_v6, %v1444_v51  ;;  %v1044_v62 = vpop.permute.xlu0 %1043  ;;  %1455 = vrot.lane.b32.xlu2 %v1095_v5, %s3612_s17  ;;  %v5072_v20 = vpop.f32.mrf.mxu0  ;;  %v994_v51 = vsel %vm537_vm1, %v991_v44, %v993_v10 }
 0x2c8   : > { %3331 = vmatmul.msk.f32.gmra.mxu0 %vm1769_vm11, %v1747_v3  ;;  %v1396_v59 = vsel %vm714_vm3, %v1393_v55, %v1395_v4 }
 0x2c9   : > { %v1347_v12 = vpop.permute.xlu2 %1346 }
 0x2cb   : > { %1053 = vrot.lane.b32.xlu1 %v4977_v54, %s3608_s13 }
 0x2cd   : > { %v844_v57 = vpop.permute.xlu1 %843  ;;  %678 = vrot.lane.b32.xlu0 %v4960_v58, %s5604_s19 }
 0x2ce   : > { %v1550_v23 = vsel %vm1525_vm4, %v1517_v43, %v844_v57 }
 0x2cf   : > { %v1345_v1 = vpop.permute.xlu0 %1344  ;;  %v1583_v60 = vsel %vm1558_vm5, %v1550_v23, %v942_v11  ;;  %953 = vrot.lane.b32.xlu2 %v5008_v52, %s3611_s16  ;;  %v5086_v11 = vpop.f32.mrf.mxu0 }
 0x2d0   : > { %v1616_v33 = vsel %vm1591_vm6, %v1583_v60, %v1044_v62  ;;  %v1294_v62 = vrot.slane %v488_v46, 1 }
 0x2d1   : > { %v848_v45 = vpop.permute.xlu2 %847 }
 0x2d2   : > { %v1295_v7 = vsel %vm537_vm1, %v1292_v41, %v1294_v62 }
 0x2d3   : > { %1354 = vrot.lane.b32.xlu1 %v994_v51, %s5603_s22 }
 0x2d5   : > { %v1145_v58 = vpop.permute.xlu1 %1144  ;;  %1055 = vrot.lane.b32.xlu0 %v992_v35, %s3608_s13 }
 0x2d6   : > { %v1649_v18 = vsel %vm1624_vm7, %v1616_v33, %v1145_v58 }
 0x2d7   : > { %v846_v63 = vpop.permute.xlu0 %845  ;;  %v1682_v48 = vsel %vm1657_vm8, %v1649_v18, %v1243_v38  ;;  %1254 = vrot.lane.b32.xlu2 %v486_v2, %s3613_s18  ;;  %v5097_v35 = vpop.f32.mrf.mxu0  ;;  %v1518_v38 = vsel %vm314_vm0, %v4712_v27, %v669_v22 }
 0x2d8   : > { %v1715_v52 = vsel %vm1690_vm9, %v1682_v48, %v1345_v1  ;;  %v1551_v15 = vsel %vm1525_vm4, %v1518_v38, %v846_v63 }
 0x2d9   : > { %v1149_v8 = vpop.permute.xlu2 %1148 }
 0x2db   : > { %855 = vrot.lane.b32.xlu1 %v4948_v16, %s3607_s9  ;;  %v1392_v16 = vrot.slane %v486_v2, 2 }
 0x2dd   : > { %v1446_v53 = vpop.permute.xlu1 %1445  ;;  %1356 = vrot.lane.b32.xlu0 %v1293_v56, %s5603_s22  ;;  %v1394_v27 = vsel %vm714_vm3, %v1392_v16, %v1393_v55 }
 0x2de   : > { %v1748_v50 = vsel %vm1723_vm10, %v1715_v52, %v1446_v53 }
 0x2df   : > { %3332 = vmatmul.msk.f32.gmra.mxu0 %vm1769_vm11, %v1748_v50  ;;  %v1147_v44 = vpop.permute.xlu0 %1146  ;;  %680 = vrot.lane.b32.xlu2 %v4977_v54, %s5604_s19  ;;  %v5110_v13 = vpop.f32.mrf.mxu0  ;;  %s3379_s19 = sshll.u32 %s3677_s28, 8 }
 0x2e1   : > { %v1450_v22 = vpop.permute.xlu2 %1449 }
 0x2e3   : > { %1156 = vrot.lane.b32.xlu1 %v5028_v21, %s3609_s14 }
 0x2e5   : > { %v944_v24 = vpop.permute.xlu1 %943  ;;  %857 = vrot.lane.b32.xlu0 %v5003_v49, %s3607_s9 }
 0x2e6   : > { %v1584_v28 = vsel %vm1558_vm5, %v1551_v15, %v944_v24 }
 0x2e7   : > { %v1448_v17 = vpop.permute.xlu0 %1447  ;;  %v1617_v21 = vsel %vm1591_vm6, %v1584_v28, %v1046_v37  ;;  %1057 = vrot.lane.b32.xlu2 %v994_v51, %s3608_s13  ;;  %v5120_v3 = vpop.f32.mrf.mxu0  ;;  %s5605_s13 = sshll.u32 %s3774_s21, 8 }
 0x2e8   : > { %v1650_v54 = vsel %vm1624_vm7, %v1617_v21, %v1147_v44 }
 0x2eb   : > { %1457 = vrot.lane.b32.xlu1 %v1394_v27, %s3612_s17 }
 0x2ed   : > { %v1245_v49 = vpop.permute.xlu1 %1244  ;;  %1158 = vrot.lane.b32.xlu0 %v1095_v5, %s3609_s14  ;;  %v948_v5 = vpop.permute.xlu2 %947 }
 0x2ee   : > { %v1683_v40 = vsel %vm1657_vm8, %v1650_v54, %v1245_v49  ;;  %v5165_v54 = vld [vmem:[%s5591_s3] ss:$0 sm:$0xff] }
 0x2ef   : > { %v1716_v32 = vsel %vm1690_vm9, %v1683_v40, %v1347_v12  ;;  %v946_v6 = vpop.permute.xlu0 %945  ;;  %1358 = vrot.lane.b32.xlu2 %v1295_v7, %s5603_s22  ;;  %v5130_v12 = vpop.f32.mrf.mxu0  ;;  %v1884_v4 = vadd.f32 %v5165_v54, %v4988_v61  ;;  %v1887_v61 = vadd.f32 %v5165_v54, %v5000_v31 }
 0x2f0   : > { %v1749_v37 = vsel %vm1723_vm10, %v1716_v32, %v1448_v17 }
 0x2f1   : > { %3333 = vmatmul.msk.f32.gmra.mxu0 %vm1769_vm11, %v1749_v37  ;;  %vm1979_vm13 = vcmp.gt.f32.partialorder %v1884_v4, 0.0  ;;  %vm1980_vm15 = vcmp.gt.f32.partialorder %v1887_v61, 0.0 }
 0x2f3   : > { %955 = vrot.lane.b32.xlu1 %v5010_v14, %s3611_s16 }
 0x2f5   : > { %v671_v10 = vpop.permute.xlu1 %670  ;;  %1459 = vrot.lane.b32.xlu0 %v1396_v59, %s3612_s17  ;;  %v1249_v51 = vpop.permute.xlu2 %1248 }
 0x2f6   : > { %v1519_v43 = vsel %vm314_vm0, %v4776_v30, %v671_v10  ;;  %v2011_v10 = vmul.f32 0.01, %v1884_v4 }
 0x2f7   : > { %v1247_v57 = vpop.permute.xlu0 %1246  ;;  %v1552_v1 = vsel %vm1525_vm4, %v1519_v43, %v848_v45  ;;  %v5139_v58 = vpop.f32.mrf.mxu0 }
 0x2f8   : > { %v1585_v14 = vsel %vm1558_vm5, %v1552_v1, %v946_v6 }
 0x2fb   : > { %1256 = vrot.lane.b32.xlu1 %v5078_v39, %s3613_s18  ;;  %s5335_s18 = scalar_lea.vmem %s5589_s1, %s5605_s13  ;;  %s3207_s13 = scalar_lea.hbm %s5595_s7, %s3379_s19 }
 0x2fc   : > { %s3210_s16 = sshll.u32 %s3207_s13, 4  ;;  %s3211_s16 = int_to_ptr.hbm [resolvable:$true] %s3210_s16 }
 0x2fd   : > { %v1048_v23 = vpop.permute.xlu1 %1047  ;;  %v675_v63 = vpop.permute.xlu2 %674  ;;  %s3548_s20 = sshra.s32 %s3211_s16, 4  ;;  %s3549_s20 = int_to_ptr.hbm [resolvable:$true] %s3548_s20 }
 0x2fe   : > { %v1618_v60 = vsel %vm1591_vm6, %v1585_v14, %v1048_v23  ;;  %v1521_v40 = vsel %vm314_vm0, %v4849_v47, %v675_v63  ;;  %v2043_v14 = vsel %vm1979_vm13, %v1884_v4, %v2011_v10  ;;  %s3550_s28 = scalar_lea.hbm %s3549_s20, 256  ;;  %p3555_p3 = scmp.lt.s32.totalorder %s3549_s20, %s5595_s7 }
 0x2ff   : > { %v673_v2 = vpop.permute.xlu0 %672  ;;  %v1651_v33 = vsel %vm1624_vm7, %v1618_v60, %v1149_v8  ;;  %v5145_v39 = vpop.f32.mrf.mxu0  ;;  %p3551_p0 = scmp.ne.s32.totalorder %s3549_s20, %s3550_s28 }
 0x300   : > { %v1684_v0 = vsel %vm1657_vm8, %v1651_v33, %v1247_v57  ;;  %v1520_v56 = vsel %vm314_vm0, %v4778_v42, %v673_v2 }
 0x301   : > { %p3552_p1 = pnand %p3551_p0, %p3694_p5 }
 0x303   : > { %p3553_p2 = pneg %p3552_p1 }
 0x305   : > { %v1349_v41 = vpop.permute.xlu1 %1348  ;;  %v1052_v44 = vpop.permute.xlu2 %1051 }
 0x306   : > { %v1717_v30 = vsel %vm1690_vm9, %v1684_v0, %v1349_v41 }
 0x307   : > { %v1750_v45 = vsel %vm1723_vm10, %v1717_v30, %v1450_v22  ;;  %v1050_v18 = vpop.permute.xlu0 %1049  ;;  %v5150_v53 = vpop.f32.mrf.mxu0 }
 0x308   : > { %3334 = vmatmul.msk.f32.gmra.mxu0 %vm1769_vm11, %v1750_v45 }
 0x30d   : > { %v850_v48 = vpop.permute.xlu1 %849  ;;  %v1353_v17 = vpop.permute.xlu2 %1352 }
 0x30e   : > { %v1553_v50 = vsel %vm1525_vm4, %v1520_v56, %v850_v48  ;;  %v1890_v48 = vadd.f32 %v5165_v54, %v5022_v9  ;;  %v1893_v9 = vadd.f32 %v5165_v54, %v5036_v29 }
 0x30f   : > { %v1351_v52 = vpop.permute.xlu0 %1350  ;;  %v1586_v8 = vsel %vm1558_vm5, %v1553_v50, %v948_v5  ;;  %v5156_v15 = vpop.f32.mrf.mxu0 }
 0x310   : > { %v1619_v16 = vsel %vm1591_vm6, %v1586_v8, %v1050_v18  ;;  %v2012_v18 = vmul.f32 0.01, %v1887_v61  ;;  %vm1981_vm2 = vcmp.gt.f32.partialorder %v1890_v48, 0.0 }
 0x315   : > { %v1151_v38 = vpop.permute.xlu1 %1150  ;;  %v854_v37 = vpop.permute.xlu2 %853 }
 0x316   : > { %v1652_v55 = vsel %vm1624_vm7, %v1619_v16, %v1151_v38 }
 0x317   : > { %v852_v24 = vpop.permute.xlu0 %851  ;;  %v1685_v28 = vsel %vm1657_vm8, %v1652_v55, %v1249_v51  ;;  %v1931_v46 = vpop.f32.mrf.mxu0  ;;  %v2013_v55 = vmul.f32 0.01, %v1890_v48 }
 0x318   : > { %v1718_v42 = vsel %vm1690_vm9, %v1685_v28, %v1351_v52  ;;  %v1932_v49 = vadd.f32 %v5165_v54, %v1931_v46  ;;  %v1554_v6 = vsel %vm1525_vm4, %v1521_v40, %v852_v24  ;;  %v2044_v52 = vsel %vm1980_vm15, %v1887_v61, %v2012_v18 }
 0x31a   : > { %v2027_v62 = vmul.f32 0.01, %v1932_v49  ;;  %vm1995_vm12 = vcmp.gt.f32.partialorder %v1932_v49, 0.0 }
 0x31c   : > { %v2059_v47 = vsel %vm1995_vm12, %v1932_v49, %v2027_v62  ;;  %vm1982_vm12 = vcmp.gt.f32.partialorder %v1893_v9, 0.0 }
 0x31d   : > { %v1452_v27 = vpop.permute.xlu1 %1451  ;;  %v3449_v60 = vpack.i.bf16 %v2059_v47, %v2043_v14  ;;  %v1155_v45 = vpop.permute.xlu2 %1154 }
 0x31e   : > { %v1751_v21 = vsel %vm1723_vm10, %v1718_v42, %v1452_v27 }
 0x31f   : > { %3335 = vmatmul.msk.f32.gmra.mxu0 %vm1769_vm11, %v1751_v21  ;;  %v1153_v22 = vpop.permute.xlu0 %1152  ;;  %v1934_v5 = vpop.f32.mrf.mxu0  ;;  %v2045_v21 = vsel %vm1981_vm2, %v1890_v48, %v2013_v55 }
 0x320   : > { %v1935_v43 = vadd.f32 %v5165_v54, %v1934_v5 }
 0x322   : > { %v2028_v2 = vmul.f32 0.01, %v1935_v43  ;;  %vm1996_vm14 = vcmp.gt.f32.partialorder %v1935_v43, 0.0 }
 0x324   : > { %v2060_v63 = vsel %vm1996_vm14, %v1935_v43, %v2028_v2 }
 0x325   : > { %v950_v32 = vpop.permute.xlu1 %949  ;;  %v3451_v50 = vpack.i.bf16 %v2060_v63, %v2044_v52  ;;  %v1456_v24 = vpop.permute.xlu2 %1455 }
 0x326   : > { %v1587_v59 = vsel %vm1558_vm5, %v1554_v6, %v950_v32  ;;  %v2014_v32 = vmul.f32 0.01, %v1893_v9 }
 0x327   : > { %v1454_v7 = vpop.permute.xlu0 %1453  ;;  %v1620_v57 = vsel %vm1591_vm6, %v1587_v59, %v1052_v44  ;;  %v1937_v41 = vpop.f32.mrf.mxu0  ;;  %v1896_v59 = vadd.f32 %v5165_v54, %v5049_v26 }
 0x328   : > { %v1653_v1 = vsel %vm1624_vm7, %v1620_v57, %v1153_v22  ;;  %v1938_v31 = vadd.f32 %v5165_v54, %v1937_v41  ;;  %v2046_v10 = vsel %vm1982_vm12, %v1893_v9, %v2014_v32 }
 0x329   : > { %v2015_v14 = vmul.f32 0.01, %v1896_v59  ;;  %vm1983_vm14 = vcmp.gt.f32.partialorder %v1896_v59, 0.0 }
 0x32a   : > { %v2029_v44 = vmul.f32 0.01, %v1938_v31  ;;  %vm1997_vm1 = vcmp.gt.f32.partialorder %v1938_v31, 0.0 }
 0x32c   : > { %v2061_v42 = vsel %vm1997_vm1, %v1938_v31, %v2029_v44 }
 0x32d   : > { %v1251_v23 = vpop.permute.xlu1 %1250  ;;  %v3453_v46 = vpack.i.bf16 %v2061_v42, %v2045_v21  ;;  %v954_v29 = vpop.permute.xlu2 %953  ;;  %v1905_v21 = vadd.f32 %v5165_v54, %v5086_v11 }
 0x32e   : > { %v1686_v51 = vsel %vm1657_vm8, %v1653_v1, %v1251_v23 }
 0x32f   : > { %v1719_v33 = vsel %vm1690_vm9, %v1686_v51, %v1353_v17  ;;  %v952_v0 = vpop.permute.xlu0 %951  ;;  %v1940_v38 = vpop.f32.mrf.mxu0 }
 0x330   : > { %v1752_v30 = vsel %vm1723_vm10, %v1719_v33, %v1454_v7  ;;  %3450 = vxpose.xlu1.b32.start [1/16] (narrow) %v3449_v60, 32  ;;  %v1941_v28 = vadd.f32 %v5165_v54, %v1940_v38  ;;  %v1899_v60 = vadd.f32 %v5165_v54, %v5061_v36  ;;  %v2047_v33 = vsel %vm1983_vm14, %v1896_v59, %v2015_v14 }
 0x331   : > { %3336 = vmatmul.msk.f32.gmra.mxu0 %vm1769_vm11, %v1752_v30 }
 0x332   : > { %v2030_v49 = vmul.f32 0.01, %v1941_v28  ;;  %vm1998_vm3 = vcmp.gt.f32.partialorder %v1941_v28, 0.0  ;;  %v2016_v48 = vmul.f32 0.01, %v1899_v60  ;;  %vm1984_vm1 = vcmp.gt.f32.partialorder %v1899_v60, 0.0 }
 0x334   : > { %v2062_v62 = vsel %vm1998_vm3, %v1941_v28, %v2030_v49 }
 0x335   : > { %v677_v56 = vpop.permute.xlu1 %676  ;;  %v3455_v43 = vpack.i.bf16 %v2062_v62, %v2046_v10  ;;  %v1255_v41 = vpop.permute.xlu2 %1254 }
 0x336   : > { %v1522_v16 = vsel %vm314_vm0, %v4851_v25, %v677_v56 }
 0x337   : > { %v1253_v8 = vpop.permute.xlu0 %1252  ;;  %v1555_v17 = vsel %vm1525_vm4, %v1522_v16, %v854_v37  ;;  %v1943_v4 = vpop.f32.mrf.mxu0 }
 0x338   : > { %3452 = vxpose.xlu1.b32.cont [2/16] (narrow) %v3451_v50, 32  ;;  %v1588_v22 = vsel %vm1558_vm5, %v1555_v17, %v952_v0  ;;  %v1944_v37 = vadd.f32 %v5165_v54, %v1943_v4  ;;  %v1902_v50 = vadd.f32 %v5165_v54, %v5072_v20 }
 0x33a   : > { %v2031_v47 = vmul.f32 0.01, %v1944_v37  ;;  %vm1999_vm13 = vcmp.gt.f32.partialorder %v1944_v37, 0.0  ;;  %v2017_v17 = vmul.f32 0.01, %v1902_v50  ;;  %vm1985_vm3 = vcmp.gt.f32.partialorder %v1902_v50, 0.0 }
 0x33c   : > { %v2063_v51 = vsel %vm1999_vm13, %v1944_v37, %v2031_v47  ;;  %v2049_v49 = vsel %vm1985_vm3, %v1902_v50, %v2017_v17  ;;  %vm1986_vm13 = vcmp.gt.f32.partialorder %v1905_v21, 0.0 }
 0x33d   : > { %v1054_v27 = vpop.permute.xlu1 %1053  ;;  %v3457_v0 = vpack.i.bf16 %v2063_v51, %v2047_v33  ;;  %v681_v28 = vpop.permute.xlu2 %680 }
 0x33e   : > { %v1621_v25 = vsel %vm1591_vm6, %v1588_v22, %v1054_v27  ;;  %v1524_v11 = vsel %vm314_vm0, %v4940_v34, %v681_v28 }
 0x33f   : > { %v679_v40 = vpop.permute.xlu0 %678  ;;  %v1654_v6 = vsel %vm1624_vm7, %v1621_v25, %v1155_v45  ;;  %v1946_v23 = vpop.f32.mrf.mxu0 }
 0x340   : > { %3454 = vxpose.xlu1.b32.cont [3/16] (narrow) %v3453_v46, 32  ;;  %v1687_v7 = vsel %vm1657_vm8, %v1654_v6, %v1253_v8  ;;  %v1947_v26 = vadd.f32 %v5165_v54, %v1946_v23  ;;  %v1523_v45 = vsel %vm314_vm0, %v4929_v19, %v679_v40  ;;  %v2048_v8 = vsel %vm1984_vm1, %v1899_v60, %v2016_v48 }
 0x341   : > { %v2018_v6 = vmul.f32 0.01, %v1905_v21 }
 0x342   : > { %v2032_v30 = vmul.f32 0.01, %v1947_v26  ;;  %vm2000_vm15 = vcmp.gt.f32.partialorder %v1947_v26, 0.0 }
 0x343   : > { %v2050_v10 = vsel %vm1986_vm13, %v1905_v21, %v2018_v6 }
 0x344   : > { %v2064_v52 = vsel %vm2000_vm15, %v1947_v26, %v2032_v30  ;;  %v1911_v26 = vadd.f32 %v5165_v54, %v5110_v13 }
 0x345   : > { %v1355_v5 = vpop.permute.xlu1 %1354  ;;  %v3459_v38 = vpack.i.bf16 %v2064_v52, %v2048_v8  ;;  %v1058_v37 = vpop.permute.xlu2 %1057 }
 0x346   : > { %v1720_v57 = vsel %vm1690_vm9, %v1687_v7, %v1355_v5  ;;  %v1908_v7 = vadd.f32 %v5165_v54, %v5097_v35 }
 0x347   : > { %v1753_v61 = vsel %vm1723_vm10, %v1720_v57, %v1456_v24  ;;  %v1056_v1 = vpop.permute.xlu0 %1055  ;;  %v1949_v31 = vpop.f32.mrf.mxu0 }
 0x348   : > { %3456 = vxpose.xlu1.b32.cont [4/16] (narrow) %v3455_v43, 32  ;;  %3337 = vmatmul.msk.f32.gmra.mxu0 %vm1769_vm11, %v1753_v61  ;;  %v1950_v56 = vadd.f32 %v5165_v54, %v1949_v31  ;;  %vm1987_vm15 = vcmp.gt.f32.partialorder %v1908_v7, 0.0  ;;  %v2020_v31 = vmul.f32 0.01, %v1911_v26 }
 0x34a   : > { %v2033_v16 = vmul.f32 0.01, %v1950_v56  ;;  %vm2001_vm2 = vcmp.gt.f32.partialorder %v1950_v56, 0.0 }
 0x34c   : > { %v2065_v20 = vsel %vm2001_vm2, %v1950_v56, %v2033_v16 }
 0x34d   : > { %v856_v2 = vpop.permute.xlu1 %855  ;;  %v3461_v40 = vpack.i.bf16 %v2065_v20, %v2049_v49  ;;  %v1359_v14 = vpop.permute.xlu2 %1358  ;;  %v1920_v20 = vadd.f32 %v5165_v54, %v5139_v58 }
 0x34e   : > { %v1556_v63 = vsel %vm1525_vm4, %v1523_v45, %v856_v2 }
 0x34f   : > { %v1357_v18 = vpop.permute.xlu0 %1356  ;;  %v1589_v36 = vsel %vm1558_vm5, %v1556_v63, %v954_v29  ;;  %v1952_v24 = vpop.f32.mrf.mxu0 }
 0x350   : > { %3458 = vxpose.xlu1.b32.cont [5/16] (narrow) %v3457_v0, 32  ;;  %v1622_v19 = vsel %vm1591_vm6, %v1589_v36, %v1056_v1  ;;  %v1953_v27 = vadd.f32 %v5165_v54, %v1952_v24  ;;  %v2019_v1 = vmul.f32 0.01, %v1908_v7  ;;  %v1914_v36 = vadd.f32 %v5165_v54, %v5120_v3 }
 0x352   : > { %v2034_v4 = vmul.f32 0.01, %v1953_v27  ;;  %vm2002_vm12 = vcmp.gt.f32.partialorder %v1953_v27, 0.0  ;;  %v2051_v2 = vsel %vm1987_vm15, %v1908_v7, %v2019_v1  ;;  %v2021_v50 = vmul.f32 0.01, %v1914_v36  ;;  %v2387_v7 = vld [vmem:[#allocation3 + $0x7c0] sm:$0xff] }
 0x353   : > { %2456 = vmatpush.msra.mxu2 %v2387_v7  ;;  %v2244_v1 = vld [vmem:[#allocation3 + $0x348] sm:$0xff]  ;;  %v2261_v7 = vld [vmem:[#allocation3 + $0x3d0] sm:$0xff] }
 0x354   : > { %v2066_v59 = vsel %vm2002_vm12, %v1953_v27, %v2034_v4  ;;  %v1923_v4 = vadd.f32 %v5165_v54, %v5145_v39  ;;  %v2243_v39 = vld [vmem:[#allocation3 + $0x340] sm:$0xff] }
 0x355   : > { %v1157_v44 = vpop.permute.xlu1 %1156  ;;  %v3463_v43 = vpack.i.bf16 %v2066_v59, %v2050_v10  ;;  %v2259_v59 = vld [vmem:[#allocation3 + $0x3c0] sm:$0xff] }
 0x356   : > { %v1655_v55 = vsel %vm1624_vm7, %v1622_v19, %v1157_v44  ;;  %v2024_v6 = vmul.f32 0.01, %v1923_v4  ;;  %vm1992_vm1 = vcmp.gt.f32.partialorder %v1923_v4, 0.0  ;;  %2427 = vmatpush.msra.mxu1 %v2259_v59  ;;  %v2251_v10 = vld [vmem:[#allocation3 + $0x380] sm:$0xff]  ;;  %v2388_v59 = vld [vmem:[#allocation3 + $0x7c8] sm:$0xff] }
 0x357   : > { %v858_v42 = vpop.permute.xlu0 %857  ;;  %v1688_v9 = vsel %vm1657_vm8, %v1655_v55, %v1255_v41  ;;  %v1917_v55 = vadd.f32 %v5165_v54, %v5130_v12 }
 0x358   : > { %3460 = vxpose.xlu1.b32.cont [6/16] (narrow) %v3459_v38, 32  ;;  %v1721_v22 = vsel %vm1690_vm9, %v1688_v9, %v1357_v18  ;;  %v1557_v57 = vsel %vm1525_vm4, %v1524_v11, %v858_v42  ;;  %vm1988_vm4 = vcmp.gt.f32.partialorder %v1911_v26, 0.0  ;;  %2428 = vmatpush.msra.mxu1 %v2251_v10  ;;  %v2380_v10 = vld [vmem:[#allocation3 + $0x788] sm:$0xff] }
 0x359   : > { %v2052_v48 = vsel %vm1988_vm4, %v1911_v26, %v2020_v31  ;;  %v2022_v28 = vmul.f32 0.01, %v1917_v55 }
 0x35a   : > { %2429 = vmatpush.msra.mxu1 %v2243_v39  ;;  %v2372_v39 = vld [vmem:[#allocation3 + $0x748] sm:$0xff] }
 0x35c   : > { %v1955_v32 = vpop.f32.mrf.mxu0 }
 0x35d   : > { %v1458_v46 = vpop.permute.xlu1 %1457  ;;  %v1956_v62 = vadd.f32 %v5165_v54, %v1955_v32 }
 0x35e   : > { %v1754_v25 = vsel %vm1723_vm10, %v1721_v22, %v1458_v46  ;;  %v2023_v22 = vmul.f32 0.01, %v1920_v20 }
 0x35f   : > { %3338 = vmatmul.msk.f32.gmra.mxu0 %vm1769_vm11, %v1754_v25  ;;  %v1159_v29 = vpop.permute.xlu0 %1158  ;;  %v2035_v47 = vmul.f32 0.01, %v1956_v62  ;;  %vm2003_vm14 = vcmp.gt.f32.partialorder %v1956_v62, 0.0 }
 0x360   : > { %3462 = vxpose.xlu1.b32.cont [7/16] (narrow) %v3461_v40, 32 }
 0x361   : > { %v2067_v34 = vsel %vm2003_vm14, %v1956_v62, %v2035_v47  ;;  %v2056_v62 = vsel %vm1992_vm1, %v1923_v4, %v2024_v6  ;;  %v2371_v47 = vld [vmem:[#allocation3 + $0x740] sm:$0xff]  ;;  %v2148_v6 = vld [vmem:[#allocation3 + $0x48] sm:$0xff] }
 0x362   : > { %v3465_v41 = vpack.i.bf16 %v2067_v34, %v2051_v2  ;;  %v2363_v34 = vld [vmem:[#allocation3 + $0x700] sm:$0xff] }
 0x363   : > { %v2275_v4 = vld [vmem:[#allocation3 + $0x440] sm:$0xff] }
 0x365   : > { %v956_v5 = vpop.permute.xlu1 %955 }
 0x366   : > { %v1590_v61 = vsel %vm1558_vm5, %v1557_v57, %v956_v5  ;;  %vm1989_vm5 = vcmp.gt.f32.partialorder %v1914_v36, 0.0  ;;  %v2260_v5 = vld [vmem:[#allocation3 + $0x3c8] sm:$0xff]  ;;  %v2379_v57 = vld [vmem:[#allocation3 + $0x780] sm:$0xff] }
 0x367   : > { %v1623_v23 = vsel %vm1591_vm6, %v1590_v61, %v1058_v37  ;;  %v1460_v60 = vpop.permute.xlu0 %1459  ;;  %v2053_v19 = vsel %vm1989_vm5, %v1914_v36, %v2021_v50  ;;  %2485 = vmatpush.msra.mxu3 %v2260_v5  ;;  %v1926_v61 = vadd.f32 %v5165_v54, %v5150_v53  ;;  %2457 = vmatpush.msra.mxu2 %v2379_v57  ;;  %v2219_v53 = vld [vmem:[#allocation3 + $0x280] sm:$0xff]  ;;  %v2389_v5 = vld [vmem:[#allocation3 + $0x7d0] sm:$0xff] }
 0x368   : > { %3464 = vxpose.xlu1.b32.cont [8/16] (narrow) %v3463_v43, 32  ;;  %v1656_v35 = vsel %vm1624_vm7, %v1623_v23, %v1159_v29  ;;  %v2252_v43 = vld [vmem:[#allocation3 + $0x388] sm:$0xff]  ;;  %v2235_v23 = vld [vmem:[#allocation3 + $0x300] sm:$0xff]  ;;  %v2253_v57 = vld [vmem:[#allocation3 + $0x390] sm:$0xff] }
 0x369   : > { %2486 = vmatpush.msra.mxu3 %v2252_v43  ;;  %2458 = vmatpush.msra.mxu2 %v2371_v47  ;;  %vm1993_vm3 = vcmp.gt.f32.partialorder %v1926_v61, 0.0  ;;  %v2331_v36 = vld [vmem:[#allocation3 + $0x600] sm:$0xff]  ;;  %v2381_v43 = vld [vmem:[#allocation3 + $0x790] sm:$0xff] }
 0x36a   : > { %2430 = vmatpush.msra.mxu1 %v2235_v23  ;;  %v2195_v50 = vld [vmem:[#allocation3 + $0x1c0] sm:$0xff]  ;;  %v2245_v47 = vld [vmem:[#allocation3 + $0x350] sm:$0xff] }
 0x36b   : > { %2487 = vmatpush.msra.mxu3 %v2244_v1  ;;  %2459 = vmatpush.msra.mxu2 %v2363_v34  ;;  %v2364_v1 = vld [vmem:[#allocation3 + $0x708] sm:$0xff]  ;;  %v2237_v23 = vld [vmem:[#allocation3 + $0x310] sm:$0xff] }
 0x36c   : > { %v2365_v34 = vld [vmem:[#allocation3 + $0x710] sm:$0xff] }
 0x36d   : > { %v1257_v51 = vpop.permute.xlu1 %1256 }
 0x36e   : > { %v1689_v33 = vsel %vm1657_vm8, %v1656_v35, %v1257_v51  ;;  %v1958_v0 = vpop.f32.mrf.mxu0  ;;  %vm1990_vm8 = vcmp.gt.f32.partialorder %v1917_v55, 0.0  ;;  %v2227_v35 = vld [vmem:[#allocation3 + $0x2c0] sm:$0xff] }
 0x36f   : > { %v1722_v30 = vsel %vm1690_vm9, %v1689_v33, %v1359_v14  ;;  %v1959_v45 = vadd.f32 %v5165_v54, %v1958_v0  ;;  %v2054_v42 = vsel %vm1990_vm8, %v1917_v55, %v2022_v28  ;;  %v2236_v14 = vld [vmem:[#allocation3 + $0x308] sm:$0xff]  ;;  %v2355_v51 = vld [vmem:[#allocation3 + $0x6c0] sm:$0xff]  ;;  %2431 = vmatpush.msra.mxu1 %v2227_v35  ;;  %v2357_v35 = vld [vmem:[#allocation3 + $0x6d0] sm:$0xff] }
 0x370   : > { %v1755_v18 = vsel %vm1723_vm10, %v1722_v30, %v1460_v60  ;;  %3466 = vxpose.xlu1.b32.cont [9/16] (narrow) %v3465_v41, 32  ;;  %vm1991_vm10 = vcmp.gt.f32.partialorder %v1920_v20, 0.0  ;;  %v2025_v60 = vmul.f32 0.01, %v1926_v61  ;;  %v2228_v33 = vld [vmem:[#allocation3 + $0x2c8] sm:$0xff]  ;;  %2488 = vmatpush.msra.mxu3 %v2236_v14  ;;  %v2347_v0 = vld [vmem:[#allocation3 + $0x680] sm:$0xff] }
 0x371   : > { %vm2004_vm0 = vcmp.gt.f32.partialorder %v1959_v45, 0.0  ;;  %v2036_v63 = vmul.f32 0.01, %v1959_v45  ;;  %3339 = vmatmul.msk.f32.gmra.mxu0 %vm1769_vm11, %v1755_v18  ;;  %v2055_v49 = vsel %vm1991_vm10, %v1920_v20, %v2023_v22  ;;  %2460 = vmatpush.msra.mxu2 %v2355_v51  ;;  %v2220_v30 = vld [vmem:[#allocation3 + $0x288] sm:$0xff]  ;;  %v2339_v18 = vld [vmem:[#allocation3 + $0x640] sm:$0xff] }
 0x372   : > { %2489 = vmatpush.msra.mxu3 %v2228_v33  ;;  %v2057_v31 = vsel %vm1993_vm3, %v1926_v61, %v2025_v60  ;;  %2432 = vmatpush.msra.mxu1 %v2219_v53  ;;  %v2179_v55 = vld [vmem:[#allocation3 + $0x140] sm:$0xff]  ;;  %v2180_v28 = vld [vmem:[#allocation3 + $0x148] sm:$0xff]  ;;  %v2373_v61 = vld [vmem:[#allocation3 + $0x750] sm:$0xff] }
 0x373   : > { %v2068_v13 = vsel %vm2004_vm0, %v1959_v45, %v2036_v63  ;;  %v2211_v45 = vld [vmem:[#allocation3 + $0x240] sm:$0xff]  ;;  %2461 = vmatpush.msra.mxu2 %v2347_v0  ;;  %v2356_v14 = vld [vmem:[#allocation3 + $0x6c8] sm:$0xff]  ;;  %v2221_v60 = vld [vmem:[#allocation3 + $0x290] sm:$0xff] }
 0x374   : > { %v3467_v56 = vpack.i.bf16 %v2068_v13, %v2052_v48  ;;  %v2212_v13 = vld [vmem:[#allocation3 + $0x248] sm:$0xff]  ;;  %2490 = vmatpush.msra.mxu3 %v2220_v30  ;;  %2433 = vmatpush.msra.mxu1 %v2211_v45  ;;  %v2291_v20 = vld [vmem:[#allocation3 + $0x4c0] sm:$0xff]  ;;  %v2213_v53 = vld [vmem:[#allocation3 + $0x250] sm:$0xff] }
 0x375   : > { %2462 = vmatpush.msra.mxu2 %v2339_v18  ;;  %v2348_v51 = vld [vmem:[#allocation3 + $0x688] sm:$0xff]  ;;  %v2341_v0 = vld [vmem:[#allocation3 + $0x650] sm:$0xff] }
 0x376   : > { %2491 = vmatpush.msra.mxu3 %v2212_v13  ;;  %v2340_v33 = vld [vmem:[#allocation3 + $0x648] sm:$0xff]  ;;  %v2205_v30 = vld [vmem:[#allocation3 + $0x210] sm:$0xff] }
 0x377   : > { %2463 = vmatpush.msra.mxu2 %v2331_v36  ;;  %v2333_v45 = vld [vmem:[#allocation3 + $0x610] sm:$0xff]  ;;  %v2324_v18 = vld [vmem:[#allocation3 + $0x5c8] sm:$0xff] }
 0x378   : > { %3468 = vxpose.xlu1.b32.cont [10/16] (narrow) %v3467_v56, 32  ;;  %v2203_v56 = vld [vmem:[#allocation3 + $0x200] sm:$0xff]  ;;  %v2316_v13 = vld [vmem:[#allocation3 + $0x588] sm:$0xff] }
 0x379   : > { %2434 = vmatpush.msra.mxu1 %v2203_v56  ;;  %v2317_v56 = vld [vmem:[#allocation3 + $0x590] sm:$0xff]  ;;  %v2308_v36 = vld [vmem:[#allocation3 + $0x548] sm:$0xff] }
 0x37b   : > { %2435 = vmatpush.msra.mxu1 %v2195_v50  ;;  %v2309_v50 = vld [vmem:[#allocation3 + $0x550] sm:$0xff] }
 0x385   : > { %v1961_v52 = vpop.f32.mrf.mxu0 }
 0x386   : > { %v1962_v44 = vadd.f32 %v5165_v54, %v1961_v52  ;;  %v2204_v52 = vld [vmem:[#allocation3 + $0x208] sm:$0xff] }
 0x387   : > { %2492 = vmatpush.msra.mxu3 %v2204_v52  ;;  %v2181_v52 = vld [vmem:[#allocation3 + $0x150] sm:$0xff] }
 0x388   : > { %vm2005_vm7 = vcmp.gt.f32.partialorder %v1962_v44, 0.0  ;;  %v2037_v8 = vmul.f32 0.01, %v1962_v44 }
 0x38a   : > { %v2069_v38 = vsel %vm2005_vm7, %v1962_v44, %v2037_v8  ;;  %v2323_v44 = vld [vmem:[#allocation3 + $0x5c0] sm:$0xff]  ;;  %v2196_v8 = vld [vmem:[#allocation3 + $0x1c8] sm:$0xff] }
 0x38b   : > { %v3469_v16 = vpack.i.bf16 %v2069_v38, %v2053_v19  ;;  %v2187_v19 = vld [vmem:[#allocation3 + $0x180] sm:$0xff]  ;;  %2464 = vmatpush.msra.mxu2 %v2323_v44  ;;  %2493 = vmatpush.msra.mxu3 %v2196_v8  ;;  %v2300_v44 = vld [vmem:[#allocation3 + $0x508] sm:$0xff]  ;;  %v2173_v8 = vld [vmem:[#allocation3 + $0x110] sm:$0xff] }
 0x38c   : > { %v2315_v38 = vld [vmem:[#allocation3 + $0x580] sm:$0xff]  ;;  %2436 = vmatpush.msra.mxu1 %v2187_v19  ;;  %v2301_v19 = vld [vmem:[#allocation3 + $0x510] sm:$0xff] }
 0x38d   : > { %3470 = vxpose.xlu1.b32.cont [11/16] (narrow) %v3469_v16, 32  ;;  %v2188_v16 = vld [vmem:[#allocation3 + $0x188] sm:$0xff]  ;;  %2465 = vmatpush.msra.mxu2 %v2315_v38 }
 0x38e   : > { %2494 = vmatpush.msra.mxu3 %v2188_v16  ;;  %2437 = vmatpush.msra.mxu1 %v2179_v55  ;;  %v2292_v38 = vld [vmem:[#allocation3 + $0x4c8] sm:$0xff]  ;;  %v2165_v16 = vld [vmem:[#allocation3 + $0xd0] sm:$0xff] }
 0x38f   : > { %v2293_v55 = vld [vmem:[#allocation3 + $0x4d0] sm:$0xff] }
 0x390   : > { %2495 = vmatpush.msra.mxu3 %v2180_v28  ;;  %v2157_v28 = vld [vmem:[#allocation3 + $0x90] sm:$0xff] }
 0x39c   : > { %v1964_v24 = vpop.f32.mrf.mxu0 }
 0x39d   : > { %v1965_v17 = vadd.f32 %v5165_v54, %v1964_v24  ;;  %v2307_v24 = vld [vmem:[#allocation3 + $0x540] sm:$0xff] }
 0x39e   : > { %2466 = vmatpush.msra.mxu2 %v2307_v24  ;;  %v2284_v24 = vld [vmem:[#allocation3 + $0x488] sm:$0xff] }
 0x39f   : > { %vm2006_vm9 = vcmp.gt.f32.partialorder %v1965_v17, 0.0  ;;  %v2038_v3 = vmul.f32 0.01, %v1965_v17 }
 0x3a1   : > { %v2070_v9 = vsel %vm2006_vm9, %v1965_v17, %v2038_v3  ;;  %v2171_v17 = vld [vmem:[#allocation3 + $0x100] sm:$0xff] }
 0x3a2   : > { %v3471_v27 = vpack.i.bf16 %v2070_v9, %v2054_v42  ;;  %v2299_v3 = vld [vmem:[#allocation3 + $0x500] sm:$0xff]  ;;  %v1929_v42 = vadd.f32 %v5165_v54, %v5156_v15  ;;  %v2172_v9 = vld [vmem:[#allocation3 + $0x108] sm:$0xff]  ;;  %2438 = vmatpush.msra.mxu1 %v2171_v17  ;;  %v2285_v17 = vld [vmem:[#allocation3 + $0x490] sm:$0xff] }
 0x3a3   : > { %2467 = vmatpush.msra.mxu2 %v2299_v3  ;;  %2496 = vmatpush.msra.mxu3 %v2172_v9  ;;  %v2147_v15 = vld [vmem:[#allocation3 + $0x40] sm:$0xff]  ;;  %v2276_v3 = vld [vmem:[#allocation3 + $0x448] sm:$0xff]  ;;  %v2277_v9 = vld [vmem:[#allocation3 + $0x450] sm:$0xff] }
 0x3a4   : > { %3472 = vxpose.xlu1.b32.cont [12/16] (narrow) %v3471_v27, 32  ;;  %v2163_v27 = vld [vmem:[#allocation3 + $0xc0] sm:$0xff]  ;;  %vm1994_vm13 = vcmp.gt.f32.partialorder %v1929_v42, 0.0 }
 0x3a5   : > { %2439 = vmatpush.msra.mxu1 %v2163_v27  ;;  %2468 = vmatpush.msra.mxu2 %v2291_v20 }
 0x3ae   : > { %v1967_v21 = vpop.f32.mrf.mxu0 }
 0x3af   : > { %v1968_v46 = vadd.f32 %v5165_v54, %v1967_v21  ;;  %v2164_v21 = vld [vmem:[#allocation3 + $0xc8] sm:$0xff] }
 0x3b0   : > { %2497 = vmatpush.msra.mxu3 %v2164_v21 }
 0x3b1   : > { %vm2007_vm11 = vcmp.gt.f32.partialorder %v1968_v46, 0.0  ;;  %v2039_v12 = vmul.f32 0.01, %v1968_v46 }
 0x3b3   : > { %v2071_v25 = vsel %vm2007_vm11, %v1968_v46, %v2039_v12  ;;  %v2155_v46 = vld [vmem:[#allocation3 + $0x80] sm:$0xff] }
 0x3b4   : > { %v3473_v40 = vpack.i.bf16 %v2071_v25, %v2055_v49  ;;  %v2283_v12 = vld [vmem:[#allocation3 + $0x480] sm:$0xff]  ;;  %v2026_v49 = vmul.f32 0.01, %v1929_v42  ;;  %2440 = vmatpush.msra.mxu1 %v2155_v46  ;;  %v2141_v46 = vld [vmem:[#allocation3 + $0x10] sm:$0xff] }
 0x3b5   : > { %2469 = vmatpush.msra.mxu2 %v2283_v12  ;;  %v2269_v12 = vld [vmem:[#allocation3 + $0x410] sm:$0xff] }
 0x3b6   : > { %3474 = vxpose.xlu1.b32.cont [13/16] (narrow) %v3473_v40, 32  ;;  %v2156_v40 = vld [vmem:[#allocation3 + $0x88] sm:$0xff]  ;;  %2441 = vmatpush.msra.mxu1 %v2147_v15  ;;  %v2254_v15 = vld [vmem:[#allocation3 + $0x398] sm:$0xff] }
 0x3b7   : > { %2498 = vmatpush.msra.mxu3 %v2156_v40  ;;  %2470 = vmatpush.msra.mxu2 %v2275_v4  ;;  %v2263_v40 = vld [vmem:[#allocation3 + $0x3e0] sm:$0xff]  ;;  %v2382_v4 = vld [vmem:[#allocation3 + $0x798] sm:$0xff] }
 0x3b9   : > { %2499 = vmatpush.msra.mxu3 %v2148_v6  ;;  %v2246_v6 = vld [vmem:[#allocation3 + $0x358] sm:$0xff] }
 0x3c5   : > { %v1970_v32 = vpop.f32.mrf.mxu0 }
 0x3c6   : > { %v1971_v37 = vadd.f32 %v5165_v54, %v1970_v32 }
 0x3c8   : > { %vm2008_vm2 = vcmp.gt.f32.partialorder %v1971_v37, 0.0  ;;  %v2040_v58 = vmul.f32 0.01, %v1971_v37 }
 0x3ca   : > { %v2072_v11 = vsel %vm2008_vm2, %v1971_v37, %v2040_v58  ;;  %v2058_v37 = vsel %vm1994_vm13, %v1929_v42, %v2026_v49  ;;  %v2149_v42 = vld [vmem:[#allocation3 + $0x50] sm:$0xff]  ;;  %v2262_v49 = vld [vmem:[#allocation3 + $0x3d8] sm:$0xff] }
 0x3cb   : > { %v3475_v29 = vpack.i.bf16 %v2072_v11, %v2056_v62  ;;  %v2267_v11 = vld [vmem:[#allocation3 + $0x400] sm:$0xff] }
 0x3cc   : > { %2471 = vmatpush.msra.mxu2 %v2267_v11  ;;  %v2238_v11 = vld [vmem:[#allocation3 + $0x318] sm:$0xff] }
 0x3cd   : > { %3476 = vxpose.xlu1.b32.cont [14/16] (narrow) %v3475_v29, 32  ;;  %v2140_v29 = vld [vmem:[#allocation3 + $0x8] sm:$0xff] }
 0x3ce   : > { %2500 = vmatpush.msra.mxu3 %v2140_v29  ;;  %2543 = vmatpush.msrb.mxu2 %v2261_v7  ;;  %v2247_v29 = vld [vmem:[#allocation3 + $0x360] sm:$0xff] }
 0x3cf   : > { %v2239_v7 = vld [vmem:[#allocation3 + $0x320] sm:$0xff] }
 0x3d0   : > { %2572 = vmatpush.msrb.mxu3 %v2389_v5  ;;  %2544 = vmatpush.msrb.mxu2 %v2253_v57  ;;  %v2230_v5 = vld [vmem:[#allocation3 + $0x2d8] sm:$0xff] }
 0x3d1   : > { %v2222_v57 = vld [vmem:[#allocation3 + $0x298] sm:$0xff] }
 0x3d2   : > { %2573 = vmatpush.msrb.mxu3 %v2381_v43  ;;  %2545 = vmatpush.msrb.mxu2 %v2245_v47  ;;  %v2231_v43 = vld [vmem:[#allocation3 + $0x2e0] sm:$0xff]  ;;  %v2214_v47 = vld [vmem:[#allocation3 + $0x258] sm:$0xff] }
 0x3d4   : > { %2574 = vmatpush.msrb.mxu3 %v2373_v61  ;;  %2546 = vmatpush.msrb.mxu2 %v2237_v23 }
 0x3d6   : > { %2575 = vmatpush.msrb.mxu3 %v2365_v34  ;;  %v2342_v34 = vld [vmem:[#allocation3 + $0x658] sm:$0xff] }
 0x3d8   : > { %2576 = vmatpush.msrb.mxu3 %v2357_v35  ;;  %v2334_v35 = vld [vmem:[#allocation3 + $0x618] sm:$0xff] }
 0x3dc   : > { %v1973_v26 = vpop.f32.mrf.mxu0 }
 0x3dd   : > { %v1974_v2 = vadd.f32 %v5165_v54, %v1973_v26  ;;  %v2229_v26 = vld [vmem:[#allocation3 + $0x2d0] sm:$0xff] }
 0x3de   : > { %2547 = vmatpush.msrb.mxu2 %v2229_v26  ;;  %v2206_v26 = vld [vmem:[#allocation3 + $0x218] sm:$0xff] }
 0x3df   : > { %vm2009_vm12 = vcmp.gt.f32.partialorder %v1974_v2, 0.0  ;;  %v2041_v41 = vmul.f32 0.01, %v1974_v2 }
 0x3e0   : > { %2548 = vmatpush.msrb.mxu2 %v2221_v60  ;;  %v2198_v60 = vld [vmem:[#allocation3 + $0x1d8] sm:$0xff] }
 0x3e1   : > { %v2073_v63 = vsel %vm2009_vm12, %v1974_v2, %v2041_v41  ;;  %v2349_v2 = vld [vmem:[#allocation3 + $0x690] sm:$0xff]  ;;  %v2332_v41 = vld [vmem:[#allocation3 + $0x608] sm:$0xff] }
 0x3e2   : > { %v3477_v48 = vpack.i.bf16 %v2073_v63, %v2057_v31  ;;  %2577 = vmatpush.msrb.mxu3 %v2349_v2  ;;  %2549 = vmatpush.msrb.mxu2 %v2213_v53  ;;  %v2197_v31 = vld [vmem:[#allocation3 + $0x1d0] sm:$0xff]  ;;  %v2326_v2 = vld [vmem:[#allocation3 + $0x5d8] sm:$0xff] }
 0x3e3   : > { %v2325_v63 = vld [vmem:[#allocation3 + $0x5d0] sm:$0xff]  ;;  %v2190_v53 = vld [vmem:[#allocation3 + $0x198] sm:$0xff] }
 0x3e4   : > { %3478 = vxpose.xlu1.b32.cont [15/16] (narrow) %v3477_v48, 32  ;;  %2578 = vmatpush.msrb.mxu3 %v2341_v0  ;;  %v2189_v48 = vld [vmem:[#allocation3 + $0x190] sm:$0xff]  ;;  %v2318_v0 = vld [vmem:[#allocation3 + $0x598] sm:$0xff] }
 0x3e5   : > { %2550 = vmatpush.msrb.mxu2 %v2205_v30 }
 0x3e6   : > { %2579 = vmatpush.msrb.mxu3 %v2333_v45 }
 0x3e7   : > { %2551 = vmatpush.msrb.mxu2 %v2197_v31  ;;  %v2199_v31 = vld [vmem:[#allocation3 + $0x1e0] sm:$0xff] }
 0x3e8   : > { %2580 = vmatpush.msrb.mxu3 %v2325_v63  ;;  %v2310_v63 = vld [vmem:[#allocation3 + $0x558] sm:$0xff] }
 0x3e9   : > { %2552 = vmatpush.msrb.mxu2 %v2189_v48  ;;  %v2191_v48 = vld [vmem:[#allocation3 + $0x1a0] sm:$0xff] }
 0x3ea   : > { %2581 = vmatpush.msrb.mxu3 %v2317_v56  ;;  %v2302_v56 = vld [vmem:[#allocation3 + $0x518] sm:$0xff] }
 0x3eb   : > { %2553 = vmatpush.msrb.mxu2 %v2181_v52  ;;  %v2183_v52 = vld [vmem:[#allocation3 + $0x160] sm:$0xff] }
 0x3ec   : > { %2582 = vmatpush.msrb.mxu3 %v2309_v50  ;;  %v2294_v50 = vld [vmem:[#allocation3 + $0x4d8] sm:$0xff] }
 0x3ed   : > { %2554 = vmatpush.msrb.mxu2 %v2173_v8  ;;  %v2286_v8 = vld [vmem:[#allocation3 + $0x498] sm:$0xff] }
 0x3ee   : > { %v1976_v22 = vpop.f32.mrf.mxu0  ;;  %2583 = vmatpush.msrb.mxu3 %v2301_v19  ;;  %v2175_v19 = vld [vmem:[#allocation3 + $0x120] sm:$0xff] }
 0x3ef   : > { %v1977_v25 = vadd.f32 %v5165_v54, %v1976_v22  ;;  %v2139_v54 = vld [vmem:[#allocation3] sm:$0xff]  ;;  %2555 = vmatpush.msrb.mxu2 %v2165_v16  ;;  %v2268_v22 = vld [vmem:[#allocation3 + $0x408] sm:$0xff]  ;;  %v2278_v16 = vld [vmem:[#allocation3 + $0x458] sm:$0xff] }
 0x3f0   : > { %2442 = vmatpush.msra.mxu1 %v2139_v54  ;;  %2584 = vmatpush.msrb.mxu3 %v2293_v55  ;;  %v2167_v55 = vld [vmem:[#allocation3 + $0xe0] sm:$0xff] }
 0x3f1   : > { %vm2010_vm14 = vcmp.gt.f32.partialorder %v1977_v25, 0.0  ;;  %v2042_v32 = vmul.f32 0.01, %v1977_v25  ;;  %2556 = vmatpush.msrb.mxu2 %v2157_v28  ;;  %v2270_v28 = vld [vmem:[#allocation3 + $0x418] sm:$0xff] }
 0x3f2   : > { %2514 = vmatpush.msrb.mxu1 %v2388_v59  ;;  %2585 = vmatpush.msrb.mxu3 %v2285_v17  ;;  %v2366_v59 = vld [vmem:[#allocation3 + $0x718] sm:$0xff]  ;;  %v2391_v17 = vld [vmem:[#allocation3 + $0x7e0] sm:$0xff] }
 0x3f3   : > { %v2074_v58 = vsel %vm2010_vm14, %v1977_v25, %v2042_v32  ;;  %2557 = vmatpush.msrb.mxu2 %v2149_v42  ;;  %v2390_v25 = vld [vmem:[#allocation3 + $0x7d8] sm:$0xff]  ;;  %v2255_v32 = vld [vmem:[#allocation3 + $0x3a0] sm:$0xff]  ;;  %v2264_v42 = vld [vmem:[#allocation3 + $0x3e8] sm:$0xff] }
 0x3f4   : > { %v3479_v62 = vpack.i.bf16 %v2074_v58, %v2058_v37  ;;  %2515 = vmatpush.msrb.mxu1 %v2380_v10  ;;  %2586 = vmatpush.msrb.mxu3 %v2277_v9  ;;  %v2374_v37 = vld [vmem:[#allocation3 + $0x758] sm:$0xff]  ;;  %v2383_v9 = vld [vmem:[#allocation3 + $0x7a0] sm:$0xff] }
 0x3f5   : > { %2558 = vmatpush.msrb.mxu2 %v2141_v46  ;;  %v2358_v10 = vld [vmem:[#allocation3 + $0x6d8] sm:$0xff]  ;;  %v2375_v46 = vld [vmem:[#allocation3 + $0x760] sm:$0xff] }
 0x3f6   : > { %3480 = vxpose.xlu1.b32.end [16/16] (narrow) %v3479_v62, 32  ;;  %2516 = vmatpush.msrb.mxu1 %v2372_v39  ;;  %v2350_v39 = vld [vmem:[#allocation3 + $0x698] sm:$0xff] }
 0x3f7   : > { %2587 = vmatpush.msrb.mxu3 %v2269_v12  ;;  %v2248_v12 = vld [vmem:[#allocation3 + $0x368] sm:$0xff] }
 0x3f8   : > { %2517 = vmatpush.msrb.mxu1 %v2364_v1 }
 0x3fa   : > { %2518 = vmatpush.msrb.mxu1 %v2356_v14  ;;  %v2223_v14 = vld [vmem:[#allocation3 + $0x2a0] sm:$0xff] }
 0x3fc   : > { %2519 = vmatpush.msrb.mxu1 %v2348_v51  ;;  %v2215_v51 = vld [vmem:[#allocation3 + $0x260] sm:$0xff] }
 0x3fe   : > { %2520 = vmatpush.msrb.mxu1 %v2340_v33  ;;  %v2207_v33 = vld [vmem:[#allocation3 + $0x220] sm:$0xff] }
 0x400   : > { %2521 = vmatpush.msrb.mxu1 %v2332_v41 }
 0x402   : > { %2522 = vmatpush.msrb.mxu1 %v2324_v18  ;;  %v2182_v18 = vld [vmem:[#allocation3 + $0x158] sm:$0xff] }
 0x404   : > { %2523 = vmatpush.msrb.mxu1 %v2316_v13  ;;  %v2174_v13 = vld [vmem:[#allocation3 + $0x118] sm:$0xff] }
 0x406   : > { %2524 = vmatpush.msrb.mxu1 %v2308_v36  ;;  %v2166_v36 = vld [vmem:[#allocation3 + $0xd8] sm:$0xff] }
 0x408   : > { %2525 = vmatpush.msrb.mxu1 %v2300_v44  ;;  %v2158_v44 = vld [vmem:[#allocation3 + $0x98] sm:$0xff] }
 0x40a   : > { %2526 = vmatpush.msrb.mxu1 %v2292_v38  ;;  %v2150_v38 = vld [vmem:[#allocation3 + $0x58] sm:$0xff] }
 0x40c   : > { %2527 = vmatpush.msrb.mxu1 %v2284_v24  ;;  %v2142_v24 = vld [vmem:[#allocation3 + $0x18] sm:$0xff] }
 0x40e   : > { %2528 = vmatpush.msrb.mxu1 %v2276_v3  ;;  %v2159_v3 = vld [vmem:[#allocation3 + $0xa0] sm:$0xff] }
 0x410   : > { %2529 = vmatpush.msrb.mxu1 %v2268_v22  ;;  %v2151_v22 = vld [vmem:[#allocation3 + $0x60] sm:$0xff] }
 0x422   : > { %v3481_v27 = vpop.trf.xlu1 }
 0x423   : > { %v5255_v20 = vunpack.i.h.bf16 %v3481_v27  ;;  %v5257_v21 = vunpack.i.l.bf16 %v3481_v27  ;;  %v2256_v27 = vld [vmem:[#allocation3 + $0x3a8] sm:$0xff] }
 0x425   : > { %2443 = vmatmul.f32.vlgmr.msra.gmra.mxu1 %v5257_v21  ;;  %2472 = vmatmul.f32.vlgmr.msra.gmra.mxu2 %v5255_v20 }
 0x426   : > { %2501 = vmatmul.f32.vlgmr.msra.gmra.mxu3 %v5257_v21  ;;  %2601 = vmatpush.msra.mxu1 %v2262_v49  ;;  %v2143_v49 = vld [vmem:[#allocation3 + $0x20] sm:$0xff] }
 0x427   : > { %2630 = vmatpush.msra.mxu2 %v2390_v25  ;;  %2659 = vmatpush.msra.mxu3 %v2263_v40  ;;  %v2367_v25 = vld [vmem:[#allocation3 + $0x720] sm:$0xff]  ;;  %v2392_v40 = vld [vmem:[#allocation3 + $0x7e8] sm:$0xff] }
 0x428   : > { %2602 = vmatpush.msra.mxu1 %v2254_v15  ;;  %v2240_v15 = vld [vmem:[#allocation3 + $0x328] sm:$0xff] }
 0x429   : > { %2631 = vmatpush.msra.mxu2 %v2382_v4  ;;  %2660 = vmatpush.msra.mxu3 %v2255_v32  ;;  %v2359_v4 = vld [vmem:[#allocation3 + $0x6e0] sm:$0xff]  ;;  %v2384_v32 = vld [vmem:[#allocation3 + $0x7a8] sm:$0xff] }
 0x42a   : > { %v3486_v58 = vpop.trf.xlu1  ;;  %2603 = vmatpush.msra.mxu1 %v2246_v6  ;;  %v2232_v6 = vld [vmem:[#allocation3 + $0x2e8] sm:$0xff] }
 0x42b   : > { %v5262_v62 = vunpack.i.h.bf16 %v3486_v58  ;;  %v5264_v54 = vunpack.i.l.bf16 %v3486_v58  ;;  %2632 = vmatpush.msra.mxu2 %v2374_v37  ;;  %2661 = vmatpush.msra.mxu3 %v2247_v29  ;;  %v2351_v37 = vld [vmem:[#allocation3 + $0x6a0] sm:$0xff]  ;;  %v2376_v58 = vld [vmem:[#allocation3 + $0x768] sm:$0xff] }
 0x42c   : > { %2604 = vmatpush.msra.mxu1 %v2238_v11  ;;  %v2224_v11 = vld [vmem:[#allocation3 + $0x2a8] sm:$0xff]  ;;  %v2343_v29 = vld [vmem:[#allocation3 + $0x660] sm:$0xff] }
 0x42d   : > { %2446 = vmatmul.f32.gmra.mxu1 %v5264_v54  ;;  %2475 = vmatmul.f32.gmra.mxu2 %v5262_v62 }
 0x42e   : > { %2504 = vmatmul.f32.gmra.mxu3 %v5264_v54  ;;  %2633 = vmatpush.msra.mxu2 %v2366_v59  ;;  %v2368_v59 = vld [vmem:[#allocation3 + $0x728] sm:$0xff] }
 0x42f   : > { %2605 = vmatpush.msra.mxu1 %v2230_v5  ;;  %2662 = vmatpush.msra.mxu3 %v2239_v7  ;;  %v2216_v7 = vld [vmem:[#allocation3 + $0x268] sm:$0xff]  ;;  %v2335_v5 = vld [vmem:[#allocation3 + $0x620] sm:$0xff] }
 0x430   : > { %2634 = vmatpush.msra.mxu2 %v2358_v10  ;;  %v2360_v10 = vld [vmem:[#allocation3 + $0x6e8] sm:$0xff] }
 0x431   : > { %2606 = vmatpush.msra.mxu1 %v2222_v57  ;;  %2663 = vmatpush.msra.mxu3 %v2231_v43  ;;  %v2208_v57 = vld [vmem:[#allocation3 + $0x228] sm:$0xff]  ;;  %v2327_v43 = vld [vmem:[#allocation3 + $0x5e0] sm:$0xff] }
 0x432   : > { %v3491_v61 = vpop.trf.xlu1  ;;  %2635 = vmatpush.msra.mxu2 %v2350_v39  ;;  %v2200_v39 = vld [vmem:[#allocation3 + $0x1e8] sm:$0xff] }
 0x433   : > { %v5269_v1 = vunpack.i.h.bf16 %v3491_v61  ;;  %v5271_v23 = vunpack.i.l.bf16 %v3491_v61  ;;  %2607 = vmatpush.msra.mxu1 %v2214_v47  ;;  %2664 = vmatpush.msra.mxu3 %v2223_v14  ;;  %v2352_v47 = vld [vmem:[#allocation3 + $0x6a8] sm:$0xff]  ;;  %v2319_v61 = vld [vmem:[#allocation3 + $0x5a0] sm:$0xff] }
 0x434   : > { %2636 = vmatpush.msra.mxu2 %v2342_v34  ;;  %v2192_v34 = vld [vmem:[#allocation3 + $0x1a8] sm:$0xff] }
 0x435   : > { %2449 = vmatmul.f32.gmra.mxu1 %v5271_v23  ;;  %2478 = vmatmul.f32.gmra.mxu2 %v5269_v1  ;;  %v2344_v14 = vld [vmem:[#allocation3 + $0x668] sm:$0xff] }
 0x436   : > { %2507 = vmatmul.f32.gmra.mxu3 %v5271_v23  ;;  %2608 = vmatpush.msra.mxu1 %v2206_v26  ;;  %v2311_v26 = vld [vmem:[#allocation3 + $0x560] sm:$0xff] }
 0x437   : > { %2637 = vmatpush.msra.mxu2 %v2334_v35  ;;  %2665 = vmatpush.msra.mxu3 %v2215_v51  ;;  %v2184_v35 = vld [vmem:[#allocation3 + $0x168] sm:$0xff] }
 0x438   : > { %2609 = vmatpush.msra.mxu1 %v2198_v60  ;;  %v2336_v51 = vld [vmem:[#allocation3 + $0x628] sm:$0xff]  ;;  %v2303_v60 = vld [vmem:[#allocation3 + $0x520] sm:$0xff] }
 0x439   : > { %2638 = vmatpush.msra.mxu2 %v2326_v2  ;;  %2666 = vmatpush.msra.mxu3 %v2207_v33  ;;  %v2176_v2 = vld [vmem:[#allocation3 + $0x128] sm:$0xff]  ;;  %v2295_v33 = vld [vmem:[#allocation3 + $0x4e0] sm:$0xff] }
 0x43a   : > { %v3496_v41 = vpop.trf.xlu1  ;;  %2610 = vmatpush.msra.mxu1 %v2190_v53  ;;  %v2328_v53 = vld [vmem:[#allocation3 + $0x5e8] sm:$0xff] }
 0x43b   : > { %v5276_v30 = vunpack.i.h.bf16 %v3496_v41  ;;  %v5278_v45 = vunpack.i.l.bf16 %v3496_v41  ;;  %2639 = vmatpush.msra.mxu2 %v2318_v0  ;;  %2667 = vmatpush.msra.mxu3 %v2199_v31  ;;  %v2168_v0 = vld [vmem:[#allocation3 + $0xe8] sm:$0xff]  ;;  %v2287_v41 = vld [vmem:[#allocation3 + $0x4a0] sm:$0xff] }
 0x43c   : > { %2611 = vmatpush.msra.mxu1 %v2182_v18  ;;  %v2320_v18 = vld [vmem:[#allocation3 + $0x5a8] sm:$0xff] }
 0x43d   : > { %2452 = vmatmul.f32.gmra.mxu1 %v5278_v45  ;;  %2481 = vmatmul.f32.gmra.mxu2 %v5276_v30  ;;  %v2160_v31 = vld [vmem:[#allocation3 + $0xa8] sm:$0xff] }
 0x43e   : > { %2510 = vmatmul.f32.gmra.mxu3 %v5278_v45  ;;  %2640 = vmatpush.msra.mxu2 %v2310_v63  ;;  %v2279_v63 = vld [vmem:[#allocation3 + $0x460] sm:$0xff] }
 0x43f   : > { %2612 = vmatpush.msra.mxu1 %v2174_v13  ;;  %2668 = vmatpush.msra.mxu3 %v2191_v48  ;;  %v2312_v13 = vld [vmem:[#allocation3 + $0x568] sm:$0xff] }
 0x440   : > { %2641 = vmatpush.msra.mxu2 %v2302_v56  ;;  %v2152_v48 = vld [vmem:[#allocation3 + $0x68] sm:$0xff]  ;;  %v2271_v56 = vld [vmem:[#allocation3 + $0x420] sm:$0xff] }
 0x441   : > { %2613 = vmatpush.msra.mxu1 %v2166_v36  ;;  %2669 = vmatpush.msra.mxu3 %v2183_v52  ;;  %v2144_v36 = vld [vmem:[#allocation3 + $0x28] sm:$0xff] }
 0x442   : > { %2642 = vmatpush.msra.mxu2 %v2294_v50  ;;  %v2304_v52 = vld [vmem:[#allocation3 + $0x528] sm:$0xff]  ;;  %v2265_v50 = vld [vmem:[#allocation3 + $0x3f0] sm:$0xff] }
 0x443   : > { %2614 = vmatpush.msra.mxu1 %v2158_v44  ;;  %2670 = vmatpush.msra.mxu3 %v2175_v19  ;;  %v2393_v44 = vld [vmem:[#allocation3 + $0x7f0] sm:$0xff] }
 0x444   : > { %2643 = vmatpush.msra.mxu2 %v2286_v8  ;;  %v2296_v8 = vld [vmem:[#allocation3 + $0x4e8] sm:$0xff]  ;;  %v2257_v19 = vld [vmem:[#allocation3 + $0x3b0] sm:$0xff] }
 0x445   : > { %2530 = vmatmul.f32.vlgmr.msrb.gmra.mxu1 %v5255_v20  ;;  %2559 = vmatmul.f32.vlgmr.msrb.gmra.mxu2 %v5257_v21 }
 0x446   : > { %2588 = vmatmul.f32.vlgmr.msrb.gmra.mxu3 %v5255_v20  ;;  %2615 = vmatpush.msra.mxu1 %v2150_v38  ;;  %v2385_v38 = vld [vmem:[#allocation3 + $0x7b0] sm:$0xff] }
 0x447   : > { %2644 = vmatpush.msra.mxu2 %v2278_v16  ;;  %2671 = vmatpush.msra.mxu3 %v2167_v55  ;;  %v2288_v16 = vld [vmem:[#allocation3 + $0x4a8] sm:$0xff]  ;;  %v2249_v55 = vld [vmem:[#allocation3 + $0x370] sm:$0xff] }
 0x448   : > { %2616 = vmatpush.msra.mxu1 %v2142_v24  ;;  %v2377_v24 = vld [vmem:[#allocation3 + $0x770] sm:$0xff] }
 0x449   : > { %2645 = vmatpush.msra.mxu2 %v2270_v28  ;;  %2672 = vmatpush.msra.mxu3 %v2159_v3  ;;  %v2241_v28 = vld [vmem:[#allocation3 + $0x330] sm:$0xff] }
 0x44a   : > { %2688 = vmatpush.msrb.mxu1 %v2391_v17  ;;  %v2280_v17 = vld [vmem:[#allocation3 + $0x468] sm:$0xff]  ;;  %v2369_v3 = vld [vmem:[#allocation3 + $0x730] sm:$0xff] }
 0x44b   : > { %2717 = vmatpush.msrb.mxu2 %v2264_v42  ;;  %2673 = vmatpush.msra.mxu3 %v2151_v22  ;;  %v2233_v42 = vld [vmem:[#allocation3 + $0x2f0] sm:$0xff]  ;;  %v2266_v22 = vld [vmem:[#allocation3 + $0x3f8] sm:$0xff] }
 0x44c   : > { %2689 = vmatpush.msrb.mxu1 %v2383_v9  ;;  %v2272_v9 = vld [vmem:[#allocation3 + $0x428] sm:$0xff] }
 0x44d   : > { %2533 = vmatmul.f32.gmra.mxu1 %v5262_v62  ;;  %2562 = vmatmul.f32.gmra.mxu2 %v5264_v54 }
 0x44e   : > { %2591 = vmatmul.f32.gmra.mxu3 %v5262_v62  ;;  %2718 = vmatpush.msrb.mxu2 %v2256_v27  ;;  %v2361_v27 = vld [vmem:[#allocation3 + $0x6f0] sm:$0xff] }
 0x44f   : > { %2690 = vmatpush.msrb.mxu1 %v2375_v46  ;;  %2674 = vmatpush.msra.mxu3 %v2143_v49  ;;  %v2225_v46 = vld [vmem:[#allocation3 + $0x2b0] sm:$0xff]  ;;  %v2258_v49 = vld [vmem:[#allocation3 + $0x3b8] sm:$0xff] }
 0x450   : > { %2719 = vmatpush.msrb.mxu2 %v2248_v12  ;;  %v2353_v12 = vld [vmem:[#allocation3 + $0x6b0] sm:$0xff] }
 0x451   : > { %2691 = vmatpush.msrb.mxu1 %v2367_v25  ;;  %2746 = vmatpush.msrb.mxu3 %v2392_v40  ;;  %v2217_v25 = vld [vmem:[#allocation3 + $0x270] sm:$0xff] }
 0x452   : > { %2720 = vmatpush.msrb.mxu2 %v2240_v15  ;;  %v2345_v40 = vld [vmem:[#allocation3 + $0x670] sm:$0xff]  ;;  %v2250_v15 = vld [vmem:[#allocation3 + $0x378] sm:$0xff] }
 0x453   : > { %2692 = vmatpush.msrb.mxu1 %v2359_v4  ;;  %2747 = vmatpush.msrb.mxu3 %v2384_v32  ;;  %v2209_v4 = vld [vmem:[#allocation3 + $0x230] sm:$0xff] }
 0x454   : > { %2721 = vmatpush.msrb.mxu2 %v2232_v6  ;;  %v2337_v32 = vld [vmem:[#allocation3 + $0x630] sm:$0xff]  ;;  %v2242_v6 = vld [vmem:[#allocation3 + $0x338] sm:$0xff] }
 0x455   : > { %2536 = vmatmul.f32.gmra.mxu1 %v5269_v1  ;;  %2565 = vmatmul.f32.gmra.mxu2 %v5271_v23 }
 0x456   : > { %2594 = vmatmul.f32.gmra.mxu3 %v5269_v1  ;;  %2693 = vmatpush.msrb.mxu1 %v2351_v37  ;;  %v2201_v37 = vld [vmem:[#allocation3 + $0x1f0] sm:$0xff] }
 0x457   : > { %2748 = vmatpush.msrb.mxu3 %v2376_v58  ;;  %2722 = vmatpush.msrb.mxu2 %v2224_v11  ;;  %v2329_v58 = vld [vmem:[#allocation3 + $0x5f0] sm:$0xff]  ;;  %v2234_v11 = vld [vmem:[#allocation3 + $0x2f8] sm:$0xff] }
 0x458   : > { %2694 = vmatpush.msrb.mxu1 %v2343_v29  ;;  %v2193_v29 = vld [vmem:[#allocation3 + $0x1b0] sm:$0xff] }
 0x459   : > { %2749 = vmatpush.msrb.mxu3 %v2368_v59  ;;  %2723 = vmatpush.msrb.mxu2 %v2216_v7  ;;  %v2321_v59 = vld [vmem:[#allocation3 + $0x5b0] sm:$0xff] }
 0x45a   : > { %2695 = vmatpush.msrb.mxu1 %v2335_v5  ;;  %v2185_v7 = vld [vmem:[#allocation3 + $0x170] sm:$0xff]  ;;  %v2226_v5 = vld [vmem:[#allocation3 + $0x2b8] sm:$0xff] }
 0x45b   : > { %2750 = vmatpush.msrb.mxu3 %v2360_v10  ;;  %2724 = vmatpush.msrb.mxu2 %v2208_v57  ;;  %v2313_v10 = vld [vmem:[#allocation3 + $0x570] sm:$0xff] }
 0x45c   : > { %2696 = vmatpush.msrb.mxu1 %v2327_v43  ;;  %v2177_v57 = vld [vmem:[#allocation3 + $0x130] sm:$0xff]  ;;  %v2218_v43 = vld [vmem:[#allocation3 + $0x278] sm:$0xff] }
 0x45d   : > { %2539 = vmatmul.f32.gmra.mxu1 %v5276_v30  ;;  %2568 = vmatmul.f32.gmra.mxu2 %v5278_v45 }
 0x45e   : > { %2597 = vmatmul.f32.gmra.mxu3 %v5276_v30  ;;  %2725 = vmatpush.msrb.mxu2 %v2200_v39  ;;  %v2305_v39 = vld [vmem:[#allocation3 + $0x530] sm:$0xff] }
 0x45f   : > { %2751 = vmatpush.msrb.mxu3 %v2352_v47  ;;  %2697 = vmatpush.msrb.mxu1 %v2319_v61  ;;  %v2169_v47 = vld [vmem:[#allocation3 + $0xf0] sm:$0xff]  ;;  %v2210_v61 = vld [vmem:[#allocation3 + $0x238] sm:$0xff] }
 0x460   : > { %2726 = vmatpush.msrb.mxu2 %v2192_v34  ;;  %v2297_v34 = vld [vmem:[#allocation3 + $0x4f0] sm:$0xff] }
 0x461   : > { %2752 = vmatpush.msrb.mxu3 %v2344_v14  ;;  %2698 = vmatpush.msrb.mxu1 %v2311_v26  ;;  %v2161_v14 = vld [vmem:[#allocation3 + $0xb0] sm:$0xff] }
 0x462   : > { %2727 = vmatpush.msrb.mxu2 %v2184_v35  ;;  %v2289_v26 = vld [vmem:[#allocation3 + $0x4b0] sm:$0xff]  ;;  %v2202_v35 = vld [vmem:[#allocation3 + $0x1f8] sm:$0xff] }
 0x463   : > { %2753 = vmatpush.msrb.mxu3 %v2336_v51  ;;  %2699 = vmatpush.msrb.mxu1 %v2303_v60  ;;  %v2153_v51 = vld [vmem:[#allocation3 + $0x70] sm:$0xff] }
 0x464   : > { %2728 = vmatpush.msrb.mxu2 %v2176_v2  ;;  %v2281_v60 = vld [vmem:[#allocation3 + $0x470] sm:$0xff]  ;;  %v2194_v2 = vld [vmem:[#allocation3 + $0x1b8] sm:$0xff] }
 0x465   : > { %2617 = vmatmul.f32.vlgmr.msra.gmra.mxu1 %v5257_v21  ;;  %2646 = vmatmul.f32.vlgmr.msra.gmra.mxu2 %v5255_v20 }
 0x466   : > { %2675 = vmatmul.f32.vlgmr.msra.gmra.mxu3 %v5257_v21  ;;  %2700 = vmatpush.msrb.mxu1 %v2295_v33  ;;  %v2145_v33 = vld [vmem:[#allocation3 + $0x30] sm:$0xff] }
 0x467   : > { %2754 = vmatpush.msrb.mxu3 %v2328_v53  ;;  %2729 = vmatpush.msrb.mxu2 %v2168_v0  ;;  %v2273_v53 = vld [vmem:[#allocation3 + $0x430] sm:$0xff]  ;;  %v2394_v0 = vld [vmem:[#allocation3 + $0x7f8] sm:$0xff] }
 0x468   : > { %2701 = vmatpush.msrb.mxu1 %v2287_v41  ;;  %v2186_v41 = vld [vmem:[#allocation3 + $0x178] sm:$0xff] }
 0x469   : > { %2755 = vmatpush.msrb.mxu3 %v2320_v18  ;;  %2730 = vmatpush.msrb.mxu2 %v2160_v31  ;;  %v2386_v18 = vld [vmem:[#allocation3 + $0x7b8] sm:$0xff] }
 0x46a   : > { %2702 = vmatpush.msrb.mxu1 %v2279_v63  ;;  %v2378_v31 = vld [vmem:[#allocation3 + $0x778] sm:$0xff] }
 0x46b   : > { %2756 = vmatpush.msrb.mxu3 %v2312_v13  ;;  %2731 = vmatpush.msrb.mxu2 %v2152_v48  ;;  %v2178_v63 = vld [vmem:[#allocation3 + $0x138] sm:$0xff] }
 0x46c   : > { %2703 = vmatpush.msrb.mxu1 %v2271_v56  ;;  %v2370_v13 = vld [vmem:[#allocation3 + $0x738] sm:$0xff] }
 0x46d   : > { %2620 = vmatmul.f32.gmra.mxu1 %v5264_v54  ;;  %2649 = vmatmul.f32.gmra.mxu2 %v5262_v62  ;;  %v2170_v48 = vld [vmem:[#allocation3 + $0xf8] sm:$0xff] }
 0x46e   : > { %2678 = vmatmul.f32.gmra.mxu3 %v5264_v54  ;;  %2732 = vmatpush.msrb.mxu2 %v2144_v36  ;;  %v2362_v56 = vld [vmem:[#allocation3 + $0x6f8] sm:$0xff] }
 0x46f   : > { %2757 = vmatpush.msrb.mxu3 %v2304_v52  ;;  %2775 = vmatpush.msra.mxu1 %v2265_v50  ;;  %v2162_v36 = vld [vmem:[#allocation3 + $0xb8] sm:$0xff] }
 0x470   : > { %2804 = vmatpush.msra.mxu2 %v2393_v44  ;;  %v2354_v52 = vld [vmem:[#allocation3 + $0x6b8] sm:$0xff] }
 0x471   : > { %2758 = vmatpush.msrb.mxu3 %v2296_v8  ;;  %2776 = vmatpush.msra.mxu1 %v2257_v19  ;;  %v2346_v50 = vld [vmem:[#allocation3 + $0x678] sm:$0xff] }
 0x472   : > { %2805 = vmatpush.msra.mxu2 %v2385_v38  ;;  %v2154_v44 = vld [vmem:[#allocation3 + $0x78] sm:$0xff] }
 0x473   : > { %2759 = vmatpush.msrb.mxu3 %v2288_v16  ;;  %2777 = vmatpush.msra.mxu1 %v2249_v55  ;;  %v2338_v8 = vld [vmem:[#allocation3 + $0x638] sm:$0xff] }
 0x474   : > { %2806 = vmatpush.msra.mxu2 %v2377_v24  ;;  %v2146_v19 = vld [vmem:[#allocation3 + $0x38] sm:$0xff] }
 0x475   : > { %2623 = vmatmul.f32.gmra.mxu1 %v5271_v23  ;;  %2652 = vmatmul.f32.gmra.mxu2 %v5269_v1  ;;  %v2330_v38 = vld [vmem:[#allocation3 + $0x5f8] sm:$0xff] }
 0x476   : > { %2681 = vmatmul.f32.gmra.mxu3 %v5271_v23  ;;  %2778 = vmatpush.msra.mxu1 %v2241_v28  ;;  %v2322_v16 = vld [vmem:[#allocation3 + $0x5b8] sm:$0xff] }
 0x477   : > { %2760 = vmatpush.msrb.mxu3 %v2280_v17  ;;  %2807 = vmatpush.msra.mxu2 %v2369_v3  ;;  %v2314_v24 = vld [vmem:[#allocation3 + $0x578] sm:$0xff] }
 0x478   : > { %2779 = vmatpush.msra.mxu1 %v2233_v42  ;;  %v2306_v28 = vld [vmem:[#allocation3 + $0x538] sm:$0xff] }
 0x479   : > { %2761 = vmatpush.msrb.mxu3 %v2272_v9  ;;  %2808 = vmatpush.msra.mxu2 %v2361_v27  ;;  %v2298_v17 = vld [vmem:[#allocation3 + $0x4f8] sm:$0xff] }
 0x47a   : > { %2780 = vmatpush.msra.mxu1 %v2225_v46  ;;  %v2290_v9 = vld [vmem:[#allocation3 + $0x4b8] sm:$0xff] }
 0x47b   : > { %2833 = vmatpush.msra.mxu3 %v2266_v22  ;;  %2809 = vmatpush.msra.mxu2 %v2353_v12  ;;  %v2282_v22 = vld [vmem:[#allocation3 + $0x478] sm:$0xff] }
 0x47c   : > { %2781 = vmatpush.msra.mxu1 %v2217_v25  ;;  %v2274_v46 = vld [vmem:[#allocation3 + $0x438] sm:$0xff] }
 0x47d   : > { %2834 = vmatpush.msra.mxu3 %v2258_v49  ;;  %2626 = vmatmul.f32.gmra.mxu1 %v5278_v45 }
 0x47e   : > { %2655 = vmatmul.f32.gmra.mxu2 %v5276_v30  ;;  %2684 = vmatmul.f32.gmra.mxu3 %v5278_v45 }
 0x47f   : > { %2810 = vmatpush.msra.mxu2 %v2345_v40  ;;  %2835 = vmatpush.msra.mxu3 %v2250_v15 }
 0x480   : > { %2782 = vmatpush.msra.mxu1 %v2209_v4  ;;  %v2411_v4 = vld [vmem:[%s5335_s18 + $0x80] sm:$0xff] }
 0x481   : > { %2811 = vmatpush.msra.mxu2 %v2337_v32  ;;  %2836 = vmatpush.msra.mxu3 %v2242_v6  ;;  %v2403_v32 = vld [vmem:[%s5335_s18 + $0x40] sm:$0xff] }
 0x482   : > { %2783 = vmatpush.msra.mxu1 %v2201_v37 }
 0x483   : > { %2812 = vmatpush.msra.mxu2 %v2329_v58  ;;  %2837 = vmatpush.msra.mxu3 %v2234_v11 }
 0x484   : > { %2784 = vmatpush.msra.mxu1 %v2193_v29  ;;  %v2395_v29 = vld [vmem:[%s5335_s18] sm:$0xff] }
 0x485   : > { %2813 = vmatpush.msra.mxu2 %v2321_v59  ;;  %2704 = vmatmul.f32.vlgmr.msrb.gmra.mxu1 %v5255_v20 }
 0x486   : > { %2733 = vmatmul.f32.vlgmr.msrb.gmra.mxu2 %v5257_v21  ;;  %2762 = vmatmul.f32.vlgmr.msrb.gmra.mxu3 %v5255_v20 }
 0x487   : > { %2785 = vmatpush.msra.mxu1 %v2185_v7  ;;  %2838 = vmatpush.msra.mxu3 %v2226_v5 }
 0x488   : > { %2814 = vmatpush.msra.mxu2 %v2313_v10 }
 0x489   : > { %2786 = vmatpush.msra.mxu1 %v2177_v57  ;;  %2839 = vmatpush.msra.mxu3 %v2218_v43 }
 0x48a   : > { %2815 = vmatpush.msra.mxu2 %v2305_v39 }
 0x48b   : > { %2787 = vmatpush.msra.mxu1 %v2169_v47  ;;  %2840 = vmatpush.msra.mxu3 %v2210_v61 }
 0x48c   : > { %2816 = vmatpush.msra.mxu2 %v2297_v34 }
 0x48d   : > { %2788 = vmatpush.msra.mxu1 %v2161_v14  ;;  %2841 = vmatpush.msra.mxu3 %v2202_v35 }
 0x48e   : > { %2707 = vmatmul.f32.gmra.mxu1 %v5262_v62  ;;  %2736 = vmatmul.f32.gmra.mxu2 %v5264_v54 }
 0x48f   : > { %2765 = vmatmul.f32.gmra.mxu3 %v5262_v62  ;;  %2817 = vmatpush.msra.mxu2 %v2289_v26  ;;  %v2420_v26 = vld [vmem:[%s5335_s18 + $0xc8] sm:$0xff] }
 0x490   : > { %2789 = vmatpush.msra.mxu1 %v2153_v51  ;;  %2842 = vmatpush.msra.mxu3 %v2194_v2  ;;  %v2404_v2 = vld [vmem:[%s5335_s18 + $0x48] sm:$0xff] }
 0x491   : > { %2818 = vmatpush.msra.mxu2 %v2281_v60 }
 0x492   : > { %2790 = vmatpush.msra.mxu1 %v2145_v33  ;;  %2843 = vmatpush.msra.mxu3 %v2186_v41  ;;  %v2396_v41 = vld [vmem:[%s5335_s18 + $0x8] sm:$0xff] }
 0x493   : > { %2819 = vmatpush.msra.mxu2 %v2273_v53 }
 0x494   : > { %2862 = vmatpush.msrb.mxu1 %v2394_v0  ;;  %2844 = vmatpush.msra.mxu3 %v2178_v63 }
 0x496   : > { %2863 = vmatpush.msrb.mxu1 %v2386_v18  ;;  %2739 = vmatmul.f32.gmra.mxu2 %v5271_v23 }
 0x497   : > { %2710 = vmatmul.f32.gmra.mxu1 %v5269_v1  ;;  %2768 = vmatmul.f32.gmra.mxu3 %v5269_v1 }
 0x498   : > { %2864 = vmatpush.msrb.mxu1 %v2378_v31  ;;  %2845 = vmatpush.msra.mxu3 %v2170_v48  ;;  %v2413_v31 = vld [vmem:[%s5335_s18 + $0x90] sm:$0xff] }
 0x499   : > { %v2405_v48 = vld [vmem:[%s5335_s18 + $0x50] sm:$0xff] }
 0x49a   : > { %2865 = vmatpush.msrb.mxu1 %v2370_v13  ;;  %2846 = vmatpush.msra.mxu3 %v2162_v36 }
 0x49c   : > { %2866 = vmatpush.msrb.mxu1 %v2362_v56  ;;  %2847 = vmatpush.msra.mxu3 %v2154_v44 }
 0x49e   : > { %2867 = vmatpush.msrb.mxu1 %v2354_v52  ;;  %2742 = vmatmul.f32.gmra.mxu2 %v5278_v45 }
 0x49f   : > { %2713 = vmatmul.f32.gmra.mxu1 %v5276_v30  ;;  %2771 = vmatmul.f32.gmra.mxu3 %v5276_v30 }
 0x4a0   : > { %2868 = vmatpush.msrb.mxu1 %v2346_v50  ;;  %2848 = vmatpush.msra.mxu3 %v2146_v19 }
 0x4a2   : > { %2869 = vmatpush.msrb.mxu1 %v2338_v8  ;;  %v2444_v55 = vpop.f32.mrf.mxu1  ;;  %v2397_v8 = vld [vmem:[%s5335_s18 + $0x10] sm:$0xff] }
 0x4a3   : > { %v2445_v10 = vadd.f32 %v2444_v55, %v2395_v29 }
 0x4a4   : > { %2870 = vmatpush.msrb.mxu1 %v2330_v38 }
 0x4a6   : > { %2871 = vmatpush.msrb.mxu1 %v2322_v16  ;;  %2820 = vmatmul.f32.vlgmr.msra.gmra.mxu2 %v5255_v20 }
 0x4a7   : > { %2791 = vmatmul.f32.vlgmr.msra.gmra.mxu1 %v5257_v21  ;;  %2849 = vmatmul.f32.vlgmr.msra.gmra.mxu3 %v5257_v21 }
 0x4a8   : > { %2872 = vmatpush.msrb.mxu1 %v2314_v24  ;;  %v2473_v3 = vpop.f32.mrf.mxu2 }
 0x4a9   : > { %v5322_v42 = vpop.f32.mrf.mxu3  ;;  %v2474_v43 = vadd.f32 %v2473_v3, %v2445_v10 }
 0x4aa   : > { %2873 = vmatpush.msrb.mxu1 %v2306_v28  ;;  %v2447_v27 = vpop.f32.mrf.mxu1  ;;  %v2503_v63 = vadd.f32 %v5322_v42, %v2396_v41  ;;  %v2399_v41 = vld [vmem:[%s5335_s18 + $0x20] sm:$0xff] }
 0x4ab   : > { %v2448_v7 = vadd.f32 %v2447_v27, %v2403_v32 }
 0x4ac   : > { %2874 = vmatpush.msrb.mxu1 %v2298_v17 }
 0x4ae   : > { %2875 = vmatpush.msrb.mxu1 %v2290_v9  ;;  %2823 = vmatmul.f32.gmra.mxu2 %v5262_v62 }
 0x4af   : > { %2794 = vmatmul.f32.gmra.mxu1 %v5264_v54  ;;  %2852 = vmatmul.f32.gmra.mxu3 %v5264_v54  ;;  %v2419_v54 = vld [vmem:[%s5335_s18 + $0xc0] sm:$0xff] }
 0x4b0   : > { %2876 = vmatpush.msrb.mxu1 %v2282_v22  ;;  %v2476_v21 = vpop.f32.mrf.mxu2 }
 0x4b1   : > { %v2505_v12 = vpop.f32.mrf.mxu3  ;;  %v2477_v57 = vadd.f32 %v2476_v21, %v2448_v7  ;;  %v5388_v7 = vld [vmem:[%s5593_s5 + $0x10] sm:$0xff] }
 0x4b2   : > { %2877 = vmatpush.msrb.mxu1 %v2274_v46  ;;  %v2450_v49 = vpop.f32.mrf.mxu1  ;;  %v2506_v18 = vadd.f32 %v2505_v12, %v2404_v2  ;;  %v5362_v46 = vld [vmem:[%s5593_s5] sm:$0xff] }
 0x4b3   : > { %v2451_v37 = vadd.f32 %v2450_v49, %v2411_v4  ;;  %v2406_v4 = vld [vmem:[%s5335_s18 + $0x58] sm:$0xff]  ;;  %v2407_v2 = vld [vmem:[%s5335_s18 + $0x60] sm:$0xff] }
 0x4b6   : > { %2826 = vmatmul.f32.gmra.mxu2 %v5269_v1 }
 0x4b7   : > { %2797 = vmatmul.f32.gmra.mxu1 %v5271_v23  ;;  %2855 = vmatmul.f32.gmra.mxu3 %v5271_v23 }
 0x4b8   : > { %v2479_v25 = vpop.f32.mrf.mxu2 }
 0x4b9   : > { %v2508_v40 = vpop.f32.mrf.mxu3  ;;  %v2480_v5 = vadd.f32 %v2479_v25, %v2451_v37  ;;  %v2422_v25 = vld [vmem:[%s5335_s18 + $0xd8] sm:$0xff] }
 0x4ba   : > { %v2453_v15 = vpop.f32.mrf.mxu1 }
 0x4bb   : > { %v2454_v23 = vadd.f32 %v2453_v15, %v2419_v54  ;;  %v2414_v15 = vld [vmem:[%s5335_s18 + $0x98] sm:$0xff] }
 0x4be   : > { %2829 = vmatmul.f32.gmra.mxu2 %v5276_v30 }
 0x4bf   : > { %2800 = vmatmul.f32.gmra.mxu1 %v5278_v45  ;;  %2858 = vmatmul.f32.gmra.mxu3 %v5278_v45 }
 0x4c0   : > { %v2482_v6 = vpop.f32.mrf.mxu2 }
 0x4c1   : > { %v2483_v58 = vadd.f32 %v2482_v6, %v2454_v23  ;;  %v2511_v11 = vpop.f32.mrf.mxu3 }
 0x4c2   : > { %v2531_v59 = vpop.f32.mrf.mxu1  ;;  %v2512_v51 = vadd.f32 %v2511_v11, %v2420_v26  ;;  %v2423_v26 = vld [vmem:[%s5335_s18 + $0xe0] sm:$0xff] }
 0x4c3   : > { %2943 = vmatpush.msrb.mxu2 %v2483_v58  ;;  %v2532_v36 = vadd.f32 %v2531_v59, %v2503_v63  ;;  %v2398_v58 = vld [vmem:[%s5335_s18 + $0x18] sm:$0xff]  ;;  %v2416_v63 = vld [vmem:[%s5335_s18 + $0xa8] sm:$0xff] }
 0x4c5   : > { %2944 = vmatpush.msrb.mxu2 %v2480_v5 }
 0x4c7   : > { %2878 = vmatmul.f32.vlgmr.msrb.gmra.mxu1 %v5255_v20  ;;  %2945 = vmatpush.msrb.mxu2 %v2477_v57  ;;  %v2412_v20 = vld [vmem:[%s5335_s18 + $0x88] sm:$0xff] }
 0x4c8   : > { %v2560_v45 = vpop.f32.mrf.mxu2  ;;  %v2509_v53 = vadd.f32 %v2508_v40, %v2412_v20  ;;  %v5374_v40 = vld [vmem:[%s5593_s5 + $0x8] sm:$0xff]  ;;  %v2415_v20 = vld [vmem:[%s5335_s18 + $0xa0] sm:$0xff] }
 0x4c9   : > { %v2589_v39 = vpop.f32.mrf.mxu3  ;;  %2946 = vmatpush.msrb.mxu2 %v2474_v43 }
 0x4ca   : > { %v2534_v47 = vpop.f32.mrf.mxu1  ;;  %3340 = vmatmul.msk.f32.vlgmr.msrb.gmra.mxu2 %vm1591_vm6, %v5362_v46 }
 0x4cb   : > { %v2535_v13 = vadd.f32 %v2534_v47, %v2506_v18  ;;  %v5399_v47 = vld [vmem:[%s5593_s5 + $0x18] sm:$0xff] }
 0x4cf   : > { %2881 = vmatmul.f32.gmra.mxu1 %v5262_v62 }
 0x4d0   : > { %v2563_v61 = vpop.f32.mrf.mxu2 }
 0x4d1   : > { %v2592_v34 = vpop.f32.mrf.mxu3  ;;  %v2564_v38 = vadd.f32 %v2563_v61, %v2405_v48 }
 0x4d2   : > { %v2537_v14 = vpop.f32.mrf.mxu1  ;;  %3341 = vmatmul.msk.f32.gmra.mxu2 %vm1591_vm6, %v5374_v40 }
 0x4d3   : > { %v2538_v62 = vadd.f32 %v2537_v14, %v2509_v53  ;;  %v2593_v24 = vadd.f32 %v2592_v34, %v2564_v38 }
 0x4d7   : > { %2884 = vmatmul.f32.gmra.mxu1 %v5269_v1  ;;  %v2421_v1 = vld [vmem:[%s5335_s18 + $0xd0] sm:$0xff] }
 0x4d8   : > { %v2566_v35 = vpop.f32.mrf.mxu2 }
 0x4d9   : > { %v2595_v60 = vpop.f32.mrf.mxu3  ;;  %v2567_v52 = vadd.f32 %v2566_v35, %v2413_v31  ;;  %v3614_v31 = vmov 0  }
 0x4da   : > { %v2540_v33 = vpop.f32.mrf.mxu1  ;;  %3342 = vmatmul.msk.f32.gmra.mxu2 %vm1591_vm6, %v5388_v7  ;;  %3502 = vset.pattern.permute.xlu0 %v3614_v31 }
 0x4db   : > { %v2541_v0 = vadd.f32 %v2540_v33, %v2512_v51  ;;  %v2596_v55 = vadd.f32 %v2595_v60, %v2567_v52  ;;  %3501 = vset.pattern.permute.xlu2 %v3614_v31 }
 0x4dd   : > { %2972 = vmatpush.msrb.mxu3 %v2541_v0 }
 0x4df   : > { %2887 = vmatmul.f32.gmra.mxu1 %v5276_v30  ;;  %2973 = vmatpush.msrb.mxu3 %v2538_v62  ;;  %v2561_v30 = vadd.f32 %v2560_v45, %v2397_v8 }
 0x4e0   : > { %v2569_v56 = vpop.f32.mrf.mxu2 }
 0x4e1   : > { %v2570_v50 = vadd.f32 %v2569_v56, %v2421_v1  ;;  %v2598_v44 = vpop.f32.mrf.mxu3  ;;  %2974 = vmatpush.msrb.mxu3 %v2535_v13  ;;  %v2590_v17 = vadd.f32 %v2589_v39, %v2561_v30  ;;  %v2896_v1 = vld [vmem:[%s5594_s6 + $0x8] sm:$0xff] }
 0x4e2   : > { %v2618_v19 = vpop.f32.mrf.mxu1  ;;  %3343 = vmatmul.msk.f32.gmra.mxu2 %vm1591_vm6, %v5399_v47  ;;  %v2424_v13 = vld [vmem:[%s5335_s18 + $0xe8] sm:$0xff]  ;;  %2906 = vperm.xlu0 %3502, %v2896_v1  }
 0x4e3   : > { %v2599_v16 = vadd.f32 %v2598_v44, %v2570_v50  ;;  %2975 = vmatpush.msrb.mxu3 %v2532_v36  ;;  %v2619_v5 = vadd.f32 %v2618_v19, %v2398_v58  ;;  %v2408_v36 = vld [vmem:[%s5335_s18 + $0x68] sm:$0xff] }
 0x4e4   : > { %3344 = vmatmul.msk.f32.vlgmr.msrb.gmra.mxu3 %vm1591_vm6, %v5362_v46  ;;  %v2400_v19 = vld [vmem:[%s5335_s18 + $0x28] sm:$0xff] }
 0x4e5   : > { %3001 = vmatpush.msra.mxu1 %v2599_v16 }
 0x4e7   : > { %3002 = vmatpush.msra.mxu1 %v2596_v55 }
 0x4e8   : > { %v2647_v28 = vpop.f32.mrf.mxu2 }
 0x4e9   : > { %v5357_v3 = vpop.f32.mrf.mxu3  ;;  %3003 = vmatpush.msra.mxu1 %v2593_v24  ;;  %v2648_v57 = vadd.f32 %v2647_v28, %v2619_v5 }
 0x4ea   : > { %v2621_v42 = vpop.f32.mrf.mxu1  ;;  %v2677_v48 = vadd.f32 %v5357_v3, %v2399_v41 }
 0x4eb   : > { %3004 = vmatpush.msra.mxu1 %v2590_v17  ;;  %v2622_v29 = vadd.f32 %v2621_v42, %v2406_v4  ;;  %v2417_v4 = vld [vmem:[%s5335_s18 + $0xb0] sm:$0xff] }
 0x4ec   : > { %3348 = vmatmul.msk.f32.vlgmr.msra.gmra.mxu1 %vm1591_vm6, %v5362_v46  ;;  %3345 = vmatmul.msk.f32.gmra.mxu3 %vm1591_vm6, %v5374_v40 }
 0x4f0   : > { %v2650_v9 = vpop.f32.mrf.mxu2 }
 0x4f1   : > { %v2679_v27 = vpop.f32.mrf.mxu3  ;;  %v2651_v10 = vadd.f32 %v2650_v9, %v2622_v29 }
 0x4f2   : > { %v2624_v22 = vpop.f32.mrf.mxu1  ;;  %v2680_v18 = vadd.f32 %v2679_v27, %v2407_v2  ;;  %v2895_v27 = vld [vmem:[%s5594_s6] sm:$0xff] }
 0x4f3   : > { %v2625_v32 = vadd.f32 %v2624_v22, %v2414_v15  ;;  %2901 = vperm.xlu2 %3501, %v2895_v27   ;;  %v2425_v15 = vld [vmem:[%s5335_s18 + $0xf0] sm:$0xff] }
 0x4f4   : > { %3349 = vmatmul.msk.f32.gmra.mxu1 %vm1591_vm6, %v5374_v40  ;;  %3346 = vmatmul.msk.f32.gmra.mxu3 %vm1591_vm6, %v5388_v7 }
 0x4f8   : > { %v2653_v21 = vpop.f32.mrf.mxu2 }
 0x4f9   : > { %v2682_v12 = vpop.f32.mrf.mxu3  ;;  %v2654_v59 = vadd.f32 %v2653_v21, %v2625_v32  ;;  %v2409_v32 = vld [vmem:[%s5335_s18 + $0x70] sm:$0xff] }
 0x4fa   : > { %v2627_v49 = vpop.f32.mrf.mxu1  ;;  %v2683_v53 = vadd.f32 %v2682_v12, %v2415_v20 }
 0x4fb   : > { %v2628_v54 = vadd.f32 %v2627_v49, %v2422_v25 }
 0x4fc   : > { %3350 = vmatmul.msk.f32.gmra.mxu1 %vm1591_vm6, %v5388_v7  ;;  %3347 = vmatmul.msk.f32.gmra.mxu3 %vm1591_vm6, %v5399_v47 }
 0x501   : > { %v2656_v23 = vpop.f32.mrf.mxu2  ;;  %v2685_v37 = vpop.f32.mrf.mxu3 }
 0x502   : > { %v2657_v6 = vadd.f32 %v2656_v23, %v2628_v54  ;;  %v2705_v11 = vpop.f32.mrf.mxu1  ;;  %v2686_v51 = vadd.f32 %v2685_v37, %v2423_v26  ;;  %v2897_v54 = vld [vmem:[%s5594_s6 + $0x10] sm:$0xff]  ;;  %v2426_v26 = vld [vmem:[%s5335_s18 + $0xf8] sm:$0xff] }
 0x503   : > { %v2706_v50 = vadd.f32 %v2705_v11, %v2677_v48  ;;  %2911 = vperm.xlu2 %3501, %v2897_v54   ;;  %v2401_v11 = vld [vmem:[%s5335_s18 + $0x30] sm:$0xff] }
 0x504   : > { %3030 = vmatpush.msra.mxu2 %v2657_v6  ;;  %3351 = vmatmul.msk.f32.gmra.mxu1 %vm1591_vm6, %v5399_v47 }
 0x506   : > { %3031 = vmatpush.msra.mxu2 %v2654_v59 }
 0x508   : > { %3032 = vmatpush.msra.mxu2 %v2651_v10 }
 0x509   : > { %v2734_v43 = vpop.f32.mrf.mxu2  ;;  %v2763_v45 = vpop.f32.mrf.mxu3 }
 0x50a   : > { %3033 = vmatpush.msra.mxu2 %v2648_v57  ;;  %v2735_v24 = vadd.f32 %v2734_v43, %v2400_v19 }
 0x50b   : > { %v2708_v39 = vpop.f32.mrf.mxu1  ;;  %3352 = vmatmul.msk.f32.vlgmr.msra.gmra.mxu2 %vm1591_vm6, %v5362_v46 }
 0x50c   : > { %v2709_v56 = vadd.f32 %v2708_v39, %v2680_v18  ;;  %v2764_v42 = vadd.f32 %v2763_v45, %v2735_v24  ;;  %v2898_v45 = vld [vmem:[%s5594_s6 + $0x18] sm:$0xff] }
 0x50d   : > { %2916 = vperm.xlu2 %3501, %v2898_v45  }
 0x511   : > { %v2737_v61 = vpop.f32.mrf.mxu2 }
 0x512   : > { %v2766_v34 = vpop.f32.mrf.mxu3  ;;  %v2738_v30 = vadd.f32 %v2737_v61, %v2408_v36 }
 0x513   : > { %3353 = vmatmul.msk.f32.gmra.mxu2 %vm1591_vm6, %v5374_v40 }
 0x514   : > { %v2711_v14 = vpop.f32.mrf.mxu1  ;;  %v2767_v17 = vadd.f32 %v2766_v34, %v2738_v30 }
 0x515   : > { %v2712_v62 = vadd.f32 %v2711_v14, %v2683_v53 }
 0x519   : > { %v2740_v35 = vpop.f32.mrf.mxu2 }
 0x51a   : > { %v2769_v60 = vpop.f32.mrf.mxu3  ;;  %v2741_v44 = vadd.f32 %v2740_v35, %v2416_v63  ;;  %v2418_v35 = vld [vmem:[%s5335_s18 + $0xb8] sm:$0xff] }
 0x51b   : > { %3354 = vmatmul.msk.f32.gmra.mxu2 %vm1591_vm6, %v5388_v7 }
 0x51c   : > { %v2714_v33 = vpop.f32.mrf.mxu1  ;;  %v2770_v28 = vadd.f32 %v2769_v60, %v2741_v44  ;;  %v2410_v60 = vld [vmem:[%s5335_s18 + $0x78] sm:$0xff] }
 0x51d   : > { %v2715_v0 = vadd.f32 %v2714_v33, %v2686_v51 }
 0x51f   : > { %3059 = vmatpush.msra.mxu3 %v2715_v0  ;;  %v2402_v0 = vld [vmem:[%s5335_s18 + $0x38] sm:$0xff]  ;;  %s301_s18 = sand.u32 1, %s3592_s25  }
 0x520   : > { %s3303_s29 = sshll.u32 %s301_s18, 8  ;;  %s3196_s21 = scalar_lea.sflag [#allocation5], %s301_s18 }
 0x521   : > { %3060 = vmatpush.msra.mxu3 %v2712_v62  ;;  %v2743_v52 = vpop.f32.mrf.mxu2  ;;  %s5484_s22 = scalar_lea.vmem [#allocation6], %s3303_s29  ;;  %s3554_s29 = scalar_lea.hbm %s5595_s7, 512 }
 0x522   : > { %v2744_v8 = vadd.f32 %v2743_v52, %v2424_v13  ;;  %v2772_v38 = vpop.f32.mrf.mxu3  ;;  %s3208_s14 = sshll.u32 %s5484_s22, 4  ;;  %p3556_p4 = scmp.lt.s32.totalorder %s3554_s29, %s3550_s28  ;;  %s3209_s14 = int_to_ptr.vmem [resolvable:$true] %s3208_s14 }
 0x523   : > { %3061 = vmatpush.msra.mxu3 %v2709_v56  ;;  %3355 = vmatmul.msk.f32.gmra.mxu2 %vm1591_vm6, %v5399_v47 }
 0x524   : > { %v2792_v16 = vpop.f32.mrf.mxu1  ;;  %v2773_v55 = vadd.f32 %v2772_v38, %v2744_v8  ;;  %p3557_p7 = por %p3556_p4, %p3555_p3 }
 0x525   : > { %3062 = vmatpush.msra.mxu3 %v2706_v50  ;;  %v2793_v57 = vadd.f32 %v2792_v16, %v2401_v11 }
 0x526   : > { %3356 = vmatmul.msk.f32.vlgmr.msra.gmra.mxu3 %vm1591_vm6, %v5362_v46  ;;  %3088 = vmatpush.msrb.mxu1 %v2773_v55  ;;  %p3558_p8 = pnand %p3557_p7, %p3553_p2 }
 0x528   : > { %3089 = vmatpush.msrb.mxu1 %v2770_v28 }
 0x529   : > { %v2821_v3 = vpop.f32.mrf.mxu2 }
 0x52a   : > { %3090 = vmatpush.msrb.mxu1 %v2767_v17  ;;  %v2850_v12 = vpop.f32.mrf.mxu3  ;;  %v2822_v39 = vadd.f32 %v2821_v3, %v2793_v57 }
 0x52b   : > { %v2851_v62 = vadd.f32 %v2850_v12, %v2402_v0 }
 0x52c   : > { %v2795_v9 = vpop.f32.mrf.mxu1  ;;  %3091 = vmatpush.msrb.mxu1 %v2764_v42 }
 0x52d   : > { %3360 = vmatmul.msk.f32.vlgmr.msrb.gmra.mxu1 %vm1591_vm6, %v5362_v46  ;;  %v2796_v5 = vadd.f32 %v2795_v9, %v2409_v32 }
 0x52e   : > { %3357 = vmatmul.msk.f32.gmra.mxu3 %vm1591_vm6, %v5374_v40 }
 0x531   : > { %v2824_v22 = vpop.f32.mrf.mxu2 }
 0x532   : > { %v2853_v29 = vpop.f32.mrf.mxu3  ;;  %v2825_v43 = vadd.f32 %v2824_v22, %v2796_v5 }
 0x533   : > { %v2854_v41 = vadd.f32 %v2853_v29, %v2410_v60 }
 0x534   : > { %v2798_v21 = vpop.f32.mrf.mxu1 }
 0x535   : > { %3361 = vmatmul.msk.f32.gmra.mxu1 %vm1591_vm6, %v5374_v40  ;;  %v2799_v37 = vadd.f32 %v2798_v21, %v2417_v4 }
 0x536   : > { %3358 = vmatmul.msk.f32.gmra.mxu3 %vm1591_vm6, %v5388_v7 }
 0x539   : > { %v2827_v49 = vpop.f32.mrf.mxu2 }
 0x53a   : > { %v2828_v10 = vadd.f32 %v2827_v49, %v2799_v37  ;;  %v2856_v34 = vpop.f32.mrf.mxu3 }
 0x53b   : > { %v2857_v33 = vadd.f32 %v2856_v34, %v2418_v35 }
 0x53c   : > { %v2801_v25 = vpop.f32.mrf.mxu1 }
 0x53d   : > { %3362 = vmatmul.msk.f32.gmra.mxu1 %vm1591_vm6, %v5388_v7  ;;  %v2802_v23 = vadd.f32 %v2801_v25, %v2425_v15 }
 0x53e   : > { %3359 = vmatmul.msk.f32.gmra.mxu3 %vm1591_vm6, %v5399_v47 }
 0x541   : > { %v2830_v6 = vpop.f32.mrf.mxu2 }
 0x542   : > { %v2831_v58 = vadd.f32 %v2830_v6, %v2802_v23  ;;  %v2859_v20 = vpop.f32.mrf.mxu3 }
 0x543   : > { %v2860_v51 = vadd.f32 %v2859_v20, %v2426_v26 }
 0x544   : > { %v2879_v59 = vpop.f32.mrf.mxu1  ;;  %3117 = vmatpush.msrb.mxu2 %v2831_v58 }
 0x545   : > { %3363 = vmatmul.msk.f32.gmra.mxu1 %vm1591_vm6, %v5399_v47  ;;  %v2880_v1 = vadd.f32 %v2879_v59, %v2851_v62 }
 0x546   : > { %3118 = vmatpush.msrb.mxu2 %v2828_v10 }
 0x548   : > { %3119 = vmatpush.msrb.mxu2 %v2825_v43 }
 0x54a   : > { %3120 = vmatpush.msrb.mxu2 %v2822_v39 }
 0x54b   : > { %3364 = vmatmul.msk.f32.vlgmr.msrb.gmra.mxu2 %vm1591_vm6, %v5362_v46 }
 0x54c   : > { %v2882_v61 = vpop.f32.mrf.mxu1 }
 0x54d   : > { %v2883_v31 = vadd.f32 %v2882_v61, %v2854_v41  ;;  %v2948_v63 = vpop.f32.mrf.mxu2  ;;  %v5479_v36 = vpop.permute.xlu2 %2901 }
 0x553   : > { %3365 = vmatmul.msk.f32.gmra.mxu2 %vm1591_vm6, %v5374_v40 }
 0x554   : > { %v2885_v14 = vpop.f32.mrf.mxu1  ;;  %v5489_v44 = vpop.permute.xlu0 %2906 }
 0x555   : > { %v2886_v18 = vadd.f32 %v2885_v14, %v2857_v33  ;;  %v2951_v48 = vpop.f32.mrf.mxu2 }
 0x556   : > { %v2952_v19 = vadd.f32 %v2951_v48, %v5489_v44 }
 0x558   : > { %3171 = vst [vmem:[%s5484_s22 + $0x40] sm:$0xff] %v2952_v19 }
 0x55b   : > { %3366 = vmatmul.msk.f32.gmra.mxu2 %vm1591_vm6, %v5388_v7 }
 0x55c   : > { %v2888_v2 = vpop.f32.mrf.mxu1 }
 0x55d   : > { %v2889_v53 = vadd.f32 %v2888_v2, %v2860_v51  ;;  %v2954_v50 = vpop.f32.mrf.mxu2  ;;  %v5497_v24 = vpop.permute.xlu2 %2911 }
 0x55e   : > { %v2955_v28 = vadd.f32 %v2954_v50, %v5497_v24 }
 0x55f   : > { %3146 = vmatpush.msrb.mxu3 %v2889_v53 }
 0x560   : > { %3179 = vst [vmem:[%s5484_s22 + $0x80] sm:$0xff] %v2955_v28 }
 0x561   : > { %3147 = vmatpush.msrb.mxu3 %v2886_v18 }
 0x563   : > { %3148 = vmatpush.msrb.mxu3 %v2883_v31  ;;  %3367 = vmatmul.msk.f32.gmra.mxu2 %vm1591_vm6, %v5399_v47 }
 0x565   : > { %3149 = vmatpush.msrb.mxu3 %v2880_v1  ;;  %v2957_v8 = vpop.f32.mrf.mxu2 }
 0x566   : > { %3368 = vmatmul.msk.f32.vlgmr.msrb.gmra.mxu3 %vm1591_vm6, %v5362_v46  ;;  %v2949_v46 = vadd.f32 %v2948_v63, %v5479_v36 }
 0x567   : > { %v2977_v13 = vpop.f32.mrf.mxu3  ;;  %v5507_v21 = vpop.permute.xlu2 %2916 }
 0x568   : > { %3163 = vst [vmem:[%s5484_s22] sm:$0xff] %v2949_v46  ;;  %v2958_v12 = vadd.f32 %v2957_v8, %v5507_v21 }
 0x569   : > { %v3006_v56 = vpop.f32.mrf.mxu1 }
 0x56a   : > { %3187 = vst [vmem:[%s5484_s22 + $0xc0] sm:$0xff] %v2958_v12 }
 0x56e   : > { %3369 = vmatmul.msk.f32.gmra.mxu3 %vm1591_vm6, %v5374_v40  ;;  %v2978_v40 = vadd.f32 %v2977_v13, %v5479_v36 }
 0x56f   : > { %v2980_v52 = vpop.f32.mrf.mxu3 }
 0x570   : > { %3164 = vst [vmem:[%s5484_s22 + $0x8] sm:$0xff] %v2978_v40  ;;  %v2981_v38 = vadd.f32 %v2980_v52, %v5489_v44 }
 0x572   : > { %3172 = vst [vmem:[%s5484_s22 + $0x48] sm:$0xff] %v2981_v38 }
 0x576   : > { %3370 = vmatmul.msk.f32.gmra.mxu3 %vm1591_vm6, %v5388_v7  ;;  %v3007_v7 = vadd.f32 %v3006_v56, %v5479_v36 }
 0x577   : > { %v2983_v30 = vpop.f32.mrf.mxu3 }
 0x578   : > { %3165 = vst [vmem:[%s5484_s22 + $0x10] sm:$0xff] %v3007_v7  ;;  %v2984_v17 = vadd.f32 %v2983_v30, %v5497_v24 }
 0x57a   : > { %3180 = vst [vmem:[%s5484_s22 + $0x88] sm:$0xff] %v2984_v17 }
 0x57e   : > { %3371 = vmatmul.msk.f32.gmra.mxu3 %vm1591_vm6, %v5399_v47  ;;  %v3009_v47 = vpop.f32.mrf.mxu1 }
 0x57f   : > { %v3010_v16 = vadd.f32 %v3009_v47, %v5489_v44  ;;  %v2986_v27 = vpop.f32.mrf.mxu3 }
 0x580   : > { %v2987_v49 = vadd.f32 %v2986_v27, %v5507_v21 }
 0x581   : > { %3173 = vst [vmem:[%s5484_s22 + $0x50] sm:$0xff] %v3010_v16 }
 0x582   : > { %3188 = vst [vmem:[%s5484_s22 + $0xc8] sm:$0xff] %v2987_v49 }
 0x586   : > { %v3012_v55 = vpop.f32.mrf.mxu1 }
 0x587   : > { %v3013_v9 = vadd.f32 %v3012_v55, %v5497_v24 }
 0x589   : > { %3181 = vst [vmem:[%s5484_s22 + $0x90] sm:$0xff] %v3013_v9 }
 0x58e   : > { %v3035_v3 = vpop.f32.mrf.mxu2  ;;  %v3015_v22 = vpop.f32.mrf.mxu1 }
 0x58f   : > { %v3036_v42 = vadd.f32 %v3035_v3, %v5479_v36  ;;  %v3016_v54 = vadd.f32 %v3015_v22, %v5507_v21 }
 0x591   : > { %3166 = vst [vmem:[%s5484_s22 + $0x18] sm:$0xff] %v3036_v42 }
 0x592   : > { %3189 = vst [vmem:[%s5484_s22 + $0xd0] sm:$0xff] %v3016_v54 }
 0x596   : > { %v3038_v25 = vpop.f32.mrf.mxu2 }
 0x597   : > { %v3039_v15 = vadd.f32 %v3038_v25, %v5489_v44 }
 0x599   : > { %3174 = vst [vmem:[%s5484_s22 + $0x58] sm:$0xff] %v3039_v15 }
 0x59e   : > { %v3041_v32 = vpop.f32.mrf.mxu2 }
 0x59f   : > { %v3042_v37 = vadd.f32 %v3041_v32, %v5497_v24 }
 0x5a1   : > { %3182 = vst [vmem:[%s5484_s22 + $0x98] sm:$0xff] %v3042_v37 }
 0x5a6   : > { %v3044_v59 = vpop.f32.mrf.mxu2 }
 0x5a7   : > { %v3045_v5 = vadd.f32 %v3044_v59, %v5507_v21 }
 0x5a9   : > { %v3064_v4 = vpop.f32.mrf.mxu3  ;;  %3190 = vst [vmem:[%s5484_s22 + $0xd8] sm:$0xff] %v3045_v5 }
 0x5aa   : > { %v3065_v23 = vadd.f32 %v3064_v4, %v5479_v36  ;;  %v3093_v6 = vpop.f32.mrf.mxu1 }
 0x5ab   : > { %v3094_v58 = vadd.f32 %v3093_v6, %v5479_v36 }
 0x5ac   : > { %3167 = vst [vmem:[%s5484_s22 + $0x20] sm:$0xff] %v3065_v23 }
 0x5ad   : > { %3168 = vst [vmem:[%s5484_s22 + $0x28] sm:$0xff] %v3094_v58 }
 0x5b1   : > { %v3067_v11 = vpop.f32.mrf.mxu3 }
 0x5b2   : > { %v3068_v29 = vadd.f32 %v3067_v11, %v5489_v44  ;;  %v3096_v39 = vpop.f32.mrf.mxu1 }
 0x5b3   : > { %v3097_v34 = vadd.f32 %v3096_v39, %v5489_v44 }
 0x5b4   : > { %3175 = vst [vmem:[%s5484_s22 + $0x60] sm:$0xff] %v3068_v29 }
 0x5b5   : > { %3176 = vst [vmem:[%s5484_s22 + $0x68] sm:$0xff] %v3097_v34 }
 0x5b9   : > { %v3070_v10 = vpop.f32.mrf.mxu3 }
 0x5ba   : > { %v3071_v57 = vadd.f32 %v3070_v10, %v5497_v24  ;;  %v3099_v61 = vpop.f32.mrf.mxu1 }
 0x5bb   : > { %v3100_v35 = vadd.f32 %v3099_v61, %v5497_v24 }
 0x5bc   : > { %3183 = vst [vmem:[%s5484_s22 + $0xa0] sm:$0xff] %v3071_v57 }
 0x5bd   : > { %3184 = vst [vmem:[%s5484_s22 + $0xa8] sm:$0xff] %v3100_v35 }
 0x5c1   : > { %v3073_v43 = vpop.f32.mrf.mxu3 }
 0x5c2   : > { %v3074_v45 = vadd.f32 %v3073_v43, %v5507_v21  ;;  %v3102_v20 = vpop.f32.mrf.mxu1 }
 0x5c3   : > { %v3103_v51 = vadd.f32 %v3102_v20, %v5507_v21 }
 0x5c4   : > { %3191 = vst [vmem:[%s5484_s22 + $0xe0] sm:$0xff] %v3074_v45 }
 0x5c5   : > { %3192 = vst [vmem:[%s5484_s22 + $0xe8] sm:$0xff] %v3103_v51 }
 0x5ce   : > { %v3122_v14 = vpop.f32.mrf.mxu2 }
 0x5cf   : > { %v3123_v26 = vadd.f32 %v3122_v14, %v5479_v36 }
 0x5d1   : > { %3169 = vst [vmem:[%s5484_s22 + $0x30] sm:$0xff] %v3123_v26 }
 0x5d6   : > { %v3125_v60 = vpop.f32.mrf.mxu2 }
 0x5d7   : > { %v3126_v2 = vadd.f32 %v3125_v60, %v5489_v44 }
 0x5d9   : > { %3177 = vst [vmem:[%s5484_s22 + $0x70] sm:$0xff] %v3126_v2 }
 0x5de   : > { %v3128_v33 = vpop.f32.mrf.mxu2 }
 0x5df   : > { %v3129_v53 = vadd.f32 %v3128_v33, %v5497_v24 }
 0x5e1   : > { %3185 = vst [vmem:[%s5484_s22 + $0xb0] sm:$0xff] %v3129_v53 }
 0x5e6   : > { %v3131_v0 = vpop.f32.mrf.mxu2 }
 0x5e7   : > { %v3132_v41 = vadd.f32 %v3131_v0, %v5507_v21 }
 0x5e9   : > { %v3151_v18 = vpop.f32.mrf.mxu3  ;;  %3193 = vst [vmem:[%s5484_s22 + $0xf0] sm:$0xff] %v3132_v41 }
 0x5ea   : > { %v3152_v62 = vadd.f32 %v3151_v18, %v5479_v36 }
 0x5ec   : > { %3170 = vst [vmem:[%s5484_s22 + $0x38] sm:$0xff] %v3152_v62 }
 0x5f1   : > { %v3154_v31 = vpop.f32.mrf.mxu3 }
 0x5f2   : > { %v3155_v1 = vadd.f32 %v3154_v31, %v5489_v44 }
 0x5f4   : > { %3178 = vst [vmem:[%s5484_s22 + $0x78] sm:$0xff] %v3155_v1 }
 0x5f9   : > { %v3157_v63 = vpop.f32.mrf.mxu3 }
 0x5fa   : > { %v3158_v13 = vadd.f32 %v3157_v63, %v5497_v24 }
 0x5fc   : > { %3186 = vst [vmem:[%s5484_s22 + $0xb8] sm:$0xff] %v3158_v13 }
 0x601   : > { %v3160_v48 = vpop.f32.mrf.mxu3 }
 0x602   : > { %v3161_v56 = vadd.f32 %v3160_v48, %v5507_v21 }
 0x604   : > { %3194 = vst [vmem:[%s5484_s22 + $0xf8] sm:$0xff] %v3161_v56 }
 0x605   : > { %3561 = shalt.err (!%p3558_p8)
}
 0x606   : > { %s3615_s18 = smov 1024  }
 0x607   : > { %3390 = dma.vmem_to_hbm [thread:$0]  (%p3694_p5), %s3209_s14, 4096, %s3211_s16, %s3196_s21, %s3615_s18, %s3615_s18, %s3612_s17  }
 0x608 PF: > { %p3402_p9 = scmp.ge.s32.totalorder %s3600_s27, 2  ;;  %s3225_s22 = sand.u32 1, %s3588_s24  }
 0x609   : > { %s3226_s9 = scalar_lea.sflag [#allocation5], %s3225_s22 }
 0x60a   : > { %p3397_p10 = pnand %p3402_p9, %p3698_p6 }
 0x60c   : > { %p3398_p11 = pneg %p3397_p10 }
 0x60e   : > { %3583 = dma.done.wait (%p3398_p11), %s3226_s9, 4096  }
 0x60f   : > { %3585 = vsyncadd (%p3398_p11), %s3226_s9, 4294963200  ;;  %p18_p12 = scmp.ge.s32.totalorder %s3681_s30, 4   ;;  %s5606_s24 = smov %s3592_s25 }
 0x610   : > { %s5607_s25 = smov %s3596_s26  ;;  %s5608_s26 = smov %s3692_s10 }
 0x611   : > { %s5609_s27 = smov %s3681_s30  ;;  %20 = sbr.rel (!%p18_p12) target bundleno = 4 (0x4), region = 92 }
 0x616   :  { %3232 = vsyncpa [#allocation4], 1 }
 0x617   :  { %3234 = vsyncpa [#allocation4 + $0x1], 1 }
 0x618   :  { %3235 = vsyncpa [#allocation5], 1 }
 0x619   :  { %3237 = vsyncpa [#allocation5 + $0x1], 1 }

</bundles_post_ra>
